<compile_context>
chip_gen: v5e
topology: v5e:2x2
jax: 0.10.0
libtpu: 0.0.40
codegen_flags: <defaults>
</compile_context>

<pallas_src>
import jax
import jax.numpy as jnp
from jax.experimental import pallas as pl
from jax.experimental.pallas import tpu as pltpu

_EPS = 1e-5  # PyTorch BatchNorm2d default


def _phase_encoder_v2_kernel(
    x_ref,      # [B, 2*Cin, F, T]        VMEM f32 (NCHW input, resident across grid)
    tapw_ref,   # [2*Cout * 2*Cin * 3]    SMEM f32, (mid_ch, in_ch, tap) flat
    midb_ref,   # [2*Cout]                SMEM f32, complex-conv channel bias
    gamma_ref,  # [2*Cout]                SMEM f32, BN weight
    beta_ref,   # [2*Cout]                SMEM f32, BN bias
    w2_ref,     # [Cout * 2*Cout]         SMEM f32, 1x1-conv weight (out_ch, mid_ch) flat
    b2_ref,     # [Cout]                  SMEM f32, 1x1-conv bias
    out_ref,    # [1, B, F, Tw]           VMEM f32, output block for this channel
    midn_ref,   # [2*Cout, B, F, Tw]      VMEM f32 scratch: BN-normalized mid channels
):
    B, n_ch, F, T = x_ref.shape
    C2 = midn_ref.shape[0]          # 2*Cout mid channels
    Tw = out_ref.shape[-1]          # T - 2
    n_taps = n_ch * 3
    o = pl.program_id(0)            # output channel of the 1x1 conv

    # ---- shared phase (program 0 only): complex conv + fused BatchNorm ----
    @pl.when(o == 0)
    def _():
        # Hoist the lane-shifted tap planes: 2*Cin*3 slices total, computed once
        # and reused by every mid channel (instead of 2*Cin*3*C2 re-slices).
        x_all = x_ref[...]                                  # single load [B, n_ch, F, T]
        taps = []
        for ch in range(n_ch):
            plane = x_all[:, ch]                            # [B, F, T]
            for k in range(3):
                taps.append(plane[:, :, k:k + Tw])          # [B, F, Tw]

        inv_n = 1.0 / float(B * F * Tw)
        for m in range(C2):                                 # small C2: fully unrolled
            acc = jnp.zeros((B, F, Tw), jnp.float32)
            for t in range(n_taps):
                acc = acc + tapw_ref[m * n_taps + t] * taps[t]
            acc = acc + midb_ref[m]

            # One-pass BN stats + single-FMA normalize (scale/shift folded).
            s = jnp.sum(acc)
            ss = jnp.sum(acc * acc)
            mean = s * inv_n
            var = ss * inv_n - mean * mean                  # biased var (training BN)
            scale = gamma_ref[m] * jax.lax.rsqrt(var + _EPS)
            shift = beta_ref[m] - mean * scale
            midn_ref[m] = acc * scale + shift

    # ---- per-output-channel phase (every program): 1x1 conv over normalized mids ----
    acc = jnp.zeros((B, F, Tw), jnp.float32) + b2_ref[o]
    for m in range(C2):
        acc = acc + w2_ref[o * C2 + m] * midn_ref[m]
    out_ref[0] = acc                                        # lane-dense contiguous block


def phase_encoder_v2(x, real_w, real_b, imag_w, imag_b, gamma, beta, w2, b2):
    """Forward pass of PhaseEncoderV2.

    x:        [B, 2*Cin, F, T] f32 (first Cin channels = real, last Cin = imag)
    real_w:   [Cout, Cin, 1, 3], real_b: [Cout]   (ComplexConv2d.real_conv)
    imag_w:   [Cout, Cin, 1, 3], imag_b: [Cout]   (ComplexConv2d.imag_conv)
    gamma, beta: [2*Cout]                         (BatchNorm2d affine)
    w2:       [Cout, 2*Cout, 1, 1], b2: [Cout]    (cplx2real 1x1 conv)
    Returns [B, Cout, F, T-2] f32 (NCHW).
    """
    B, n_ch, F, T = x.shape
    Cout, Cin = real_w.shape[0], real_w.shape[1]
    assert n_ch == 2 * Cin, "expected re/im channel pairs on dim 1"
    C2 = 2 * Cout
    Tw = T - 2

    f32 = jnp.float32
    wr = real_w[:, :, 0, :].astype(f32)                     # [Cout, Cin, 3]
    wi = imag_w[:, :, 0, :].astype(f32)
    # Fold the complex channel mixing into per-mid-channel tap coefficients over
    # the 2*Cin input planes (real channels first, then imag channels):
    #   real_out[o] = +Wr * re - Wi * im     imag_out[o] = +Wi * re + Wr * im
    tap_w = jnp.concatenate(
        [jnp.concatenate([wr, -wi], axis=1),                # real-out mid channels
         jnp.concatenate([wi, wr], axis=1)],                # imag-out mid channels
        axis=0)                                             # [2*Cout, 2*Cin, 3]
    mid_b = jnp.concatenate([real_b - imag_b, imag_b + real_b]).astype(f32)  # [2*Cout]
    w2_flat = w2.reshape(Cout, C2).reshape(-1).astype(f32)  # (out_ch, mid_ch) flat

    smem = pl.BlockSpec(memory_space=pltpu.MemorySpace.SMEM)
    grid_spec = pltpu.PrefetchScalarGridSpec(
        num_scalar_prefetch=0,
        grid=(Cout,),
        in_specs=[
            # Full input block, same block index every step -> stays resident in VMEM.
            pl.BlockSpec((B, n_ch, F, T), lambda o: (0, 0, 0, 0)),
            smem, smem, smem, smem, smem, smem,
        ],
        # Channel-major output: each program writes one contiguous [1,B,F,Tw] slab.
        out_specs=pl.BlockSpec((1, B, F, Tw), lambda o: (o, 0, 0, 0)),
        scratch_shapes=[pltpu.VMEM((C2, B, F, Tw), jnp.float32)],
    )

    # Rough resident-set estimate (+ headroom for (8,128) padding & double buffers).
    resident_bytes = 4 * (B * n_ch * F * T + C2 * B * F * Tw + 2 * B * F * Tw)
    vmem_limit = int(min(max(4 * resident_bytes, 8 * 1024 * 1024), 48 * 1024 * 1024))

    out_cbft = pl.pallas_call(
        _phase_encoder_v2_kernel,
        out_shape=jax.ShapeDtypeStruct((Cout, B, F, Tw), jnp.float32),
        grid_spec=grid_spec,
        compiler_params=pltpu.CompilerParams(
            # "arbitrary": programs o>0 read program-0's scratch, so the channel
            # grid must run sequentially on one core (do NOT mark "parallel").
            dimension_semantics=("arbitrary",),
            vmem_limit_bytes=vmem_limit,
        ),
    )(x.astype(f32), tap_w.reshape(-1), mid_b, gamma.astype(f32),
      beta.astype(f32), w2_flat, b2.astype(f32))

    return jnp.transpose(out_cbft, (1, 0, 2, 3))            # back to NCHW [B,Cout,F,Tw]


def _reference(x, real_w, real_b, imag_w, imag_b, gamma, beta, w2, b2):
    """Pure-JAX reference matching the PyTorch forward (training-mode BN)."""
    Cin = real_w.shape[1]
    re, im = x[:, :Cin], x[:, Cin:]

    def conv(inp, w, b):
        y = jax.lax.conv_general_dilated(
            inp, w, window_strides=(1, 1), padding="VALID",
            dimension_numbers=("NCHW", "OIHW", "NCHW"))
        return y + b[None, :, None, None]

    real = conv(re, real_w, real_b) - conv(im, imag_w, imag_b)
    imag = conv(re, imag_w, imag_b) + conv(im, real_w, real_b)
    mid = jnp.concatenate([real, imag], axis=1)             # [B, 2*Cout, F, T-2]

    mean = jnp.mean(mid, axis=(0, 2, 3), keepdims=True)
    var = jnp.mean((mid - mean) ** 2, axis=(0, 2, 3), keepdims=True)
    y = (mid - mean) * jax.lax.rsqrt(var + _EPS)
    y = y * gamma[None, :, None, None] + beta[None, :, None, None]

    out = jax.lax.conv_general_dilated(
        y, w2, window_strides=(1, 1), padding="VALID",
        dimension_numbers=("NCHW", "OIHW", "NCHW"))
    return out + b2[None, :, None, None]


if __name__ == "__main__":
    key = jax.random.PRNGKey(0)
    ks = jax.random.split(key, 9)

    # Small shapes consistent with the module defaults:
    # in_channels=1 (so X has 2 channels: re, im), out_channels=4.
    B, Cin, Cout, F, T = 2, 1, 4, 16, 16
    x = jax.random.normal(ks[0], (B, 2 * Cin, F, T), jnp.float32)

    real_w = 0.05 * jax.random.normal(ks[1], (Cout, Cin, 1, 3), jnp.float32)
    imag_w = 0.05 * jax.random.normal(ks[2], (Cout, Cin, 1, 3), jnp.float32)
    real_b = 0.1 * jax.random.normal(ks[3], (Cout,), jnp.float32)
    imag_b = 0.1 * jax.random.normal(ks[4], (Cout,), jnp.float32)
    gamma = 1.0 + 0.1 * jax.random.normal(ks[5], (2 * Cout,), jnp.float32)
    beta = 0.1 * jax.random.normal(ks[6], (2 * Cout,), jnp.float32)
    w2 = 0.2 * jax.random.normal(ks[7], (Cout, 2 * Cout, 1, 1), jnp.float32)
    b2 = 0.1 * jax.random.normal(ks[8], (Cout,), jnp.float32)

    out = phase_encoder_v2(x, real_w, real_b, imag_w, imag_b, gamma, beta, w2, b2)
    jax.block_until_ready(out)
    assert out.shape == (B, Cout, F, T - 2), out.shape

    ref = _reference(x, real_w, real_b, imag_w, imag_b, gamma, beta, w2, b2)
    max_err = float(jnp.max(jnp.abs(out - ref)))
    assert jnp.allclose(out, ref, atol=2e-4, rtol=2e-4), f"max abs err = {max_err}"

    print("KERNEL_OK")
</pallas_src>

<mosaic_0001>
module attributes {stable_mosaic.version = 11 : i64} {
  func.func @_phase_encoder_v2_kernel(%arg0: i32, %arg1: memref<2x2x16x16xf32, #tpu.memory_space<vmem>>, %arg2: memref<48xf32, #tpu.memory_space<smem>>, %arg3: memref<8xf32, #tpu.memory_space<smem>>, %arg4: memref<8xf32, #tpu.memory_space<smem>>, %arg5: memref<8xf32, #tpu.memory_space<smem>>, %arg6: memref<32xf32, #tpu.memory_space<smem>>, %arg7: memref<4xf32, #tpu.memory_space<smem>>, %arg8: memref<1x2x16x14xf32, #tpu.memory_space<vmem>>, %arg9: memref<8x2x16x14xf32, #tpu.memory_space<vmem>>) attributes {dimension_semantics = [#tpu.dimension_semantics<arbitrary>], iteration_bounds = array<i64: 4>, scalar_prefetch = 0 : i64, scratch_operands = 1 : i64, tpu.core_type = #tpu.core_type<tc>, window_params = [{pipeline_mode = #tpu.pipeline_mode<synchronous>, transform_indices = @transform_0, window_bounds = array<i64: 2, 2, 16, 16>}, {transform_indices = @transform_1, window_bounds = array<i64: 48>}, {transform_indices = @transform_2, window_bounds = array<i64: 8>}, {transform_indices = @transform_3, window_bounds = array<i64: 8>}, {transform_indices = @transform_4, window_bounds = array<i64: 8>}, {transform_indices = @transform_5, window_bounds = array<i64: 32>}, {transform_indices = @transform_6, window_bounds = array<i64: 4>}, {transform_indices = @transform_7, window_bounds = array<i64: 1, 2, 16, 14>}]} {
    %c0_i32 = arith.constant 0 : i32
    %0 = arith.cmpi eq, %arg0, %c0_i32 : i32
    %1 = arith.extui %0 : i1 to i32
    %c0_i32_0 = arith.constant 0 : i32
    %2 = arith.cmpi ne, %1, %c0_i32_0 : i32
    scf.if %2 {
      %c0_37 = arith.constant 0 : index
      %c0_38 = arith.constant 0 : index
      %c0_39 = arith.constant 0 : index
      %c0_40 = arith.constant 0 : index
      %83 = vector.load %arg1[%c0_37, %c0_38, %c0_39, %c0_40] : memref<2x2x16x16xf32, #tpu.memory_space<vmem>>, vector<2x2x16x16xf32>
      %84 = vector.extract_strided_slice %83 {offsets = [0, 0, 0, 0], sizes = [2, 1, 16, 16], strides = [1, 1, 1, 1]} : vector<2x2x16x16xf32> to vector<2x1x16x16xf32>
      %85 = vector.shape_cast %84 : vector<2x1x16x16xf32> to vector<2x16x16xf32>
      %86 = vector.extract_strided_slice %85 {offsets = [0, 0, 0], sizes = [2, 16, 14], strides = [1, 1, 1]} : vector<2x16x16xf32> to vector<2x16x14xf32>
      %87 = vector.extract_strided_slice %85 {offsets = [0, 0, 1], sizes = [2, 16, 14], strides = [1, 1, 1]} : vector<2x16x16xf32> to vector<2x16x14xf32>
      %88 = vector.extract_strided_slice %85 {offsets = [0, 0, 2], sizes = [2, 16, 14], strides = [1, 1, 1]} : vector<2x16x16xf32> to vector<2x16x14xf32>
      %89 = vector.extract_strided_slice %83 {offsets = [0, 1, 0, 0], sizes = [2, 1, 16, 16], strides = [1, 1, 1, 1]} : vector<2x2x16x16xf32> to vector<2x1x16x16xf32>
      %90 = vector.shape_cast %89 : vector<2x1x16x16xf32> to vector<2x16x16xf32>
      %91 = vector.extract_strided_slice %90 {offsets = [0, 0, 0], sizes = [2, 16, 14], strides = [1, 1, 1]} : vector<2x16x16xf32> to vector<2x16x14xf32>
      %92 = vector.extract_strided_slice %90 {offsets = [0, 0, 1], sizes = [2, 16, 14], strides = [1, 1, 1]} : vector<2x16x16xf32> to vector<2x16x14xf32>
      %93 = vector.extract_strided_slice %90 {offsets = [0, 0, 2], sizes = [2, 16, 14], strides = [1, 1, 1]} : vector<2x16x16xf32> to vector<2x16x14xf32>
      %cst_41 = arith.constant 0.000000e+00 : f32
      %94 = vector.broadcast %cst_41 : f32 to vector<2x16x14xf32>
      %c0_42 = arith.constant 0 : index
      %95 = memref.load %arg2[%c0_42] : memref<48xf32, #tpu.memory_space<smem>>
      %96 = vector.broadcast %95 : f32 to vector<2x16x14xf32>
      %97 = arith.mulf %96, %86 : vector<2x16x14xf32>
      %98 = arith.addf %94, %97 : vector<2x16x14xf32>
      %c1_43 = arith.constant 1 : index
      %99 = memref.load %arg2[%c1_43] : memref<48xf32, #tpu.memory_space<smem>>
      %100 = vector.broadcast %99 : f32 to vector<2x16x14xf32>
      %101 = arith.mulf %100, %87 : vector<2x16x14xf32>
      %102 = arith.addf %98, %101 : vector<2x16x14xf32>
      %c2_44 = arith.constant 2 : index
      %103 = memref.load %arg2[%c2_44] : memref<48xf32, #tpu.memory_space<smem>>
      %104 = vector.broadcast %103 : f32 to vector<2x16x14xf32>
      %105 = arith.mulf %104, %88 : vector<2x16x14xf32>
      %106 = arith.addf %102, %105 : vector<2x16x14xf32>
      %c3_45 = arith.constant 3 : index
      %107 = memref.load %arg2[%c3_45] : memref<48xf32, #tpu.memory_space<smem>>
      %108 = vector.broadcast %107 : f32 to vector<2x16x14xf32>
      %109 = arith.mulf %108, %91 : vector<2x16x14xf32>
      %110 = arith.addf %106, %109 : vector<2x16x14xf32>
      %c4_46 = arith.constant 4 : index
      %111 = memref.load %arg2[%c4_46] : memref<48xf32, #tpu.memory_space<smem>>
      %112 = vector.broadcast %111 : f32 to vector<2x16x14xf32>
      %113 = arith.mulf %112, %92 : vector<2x16x14xf32>
      %114 = arith.addf %110, %113 : vector<2x16x14xf32>
      %c5_47 = arith.constant 5 : index
      %115 = memref.load %arg2[%c5_47] : memref<48xf32, #tpu.memory_space<smem>>
      %116 = vector.broadcast %115 : f32 to vector<2x16x14xf32>
      %117 = arith.mulf %116, %93 : vector<2x16x14xf32>
      %118 = arith.addf %114, %117 : vector<2x16x14xf32>
      %c0_48 = arith.constant 0 : index
      %119 = memref.load %arg3[%c0_48] : memref<8xf32, #tpu.memory_space<smem>>
      %120 = vector.broadcast %119 : f32 to vector<2x16x14xf32>
      %121 = arith.addf %118, %120 : vector<2x16x14xf32>
      %122 = vector.shape_cast %121 : vector<2x16x14xf32> to vector<1x2x16x14xf32>
      %cst_49 = arith.constant dense<0.000000e+00> : vector<1xf32>
      %123 = vector.multi_reduction <add>, %122, %cst_49 [1, 2, 3] : vector<1x2x16x14xf32> to vector<1xf32>
      %124 = vector.shape_cast %123 : vector<1xf32> to vector<1x1x1x1xf32>
      %125 = vector.extract %124[0, 0, 0, 0] : f32 from vector<1x1x1x1xf32>
      %126 = arith.mulf %121, %121 : vector<2x16x14xf32>
      %127 = vector.shape_cast %126 : vector<2x16x14xf32> to vector<1x2x16x14xf32>
      %cst_50 = arith.constant dense<0.000000e+00> : vector<1xf32>
      %128 = vector.multi_reduction <add>, %127, %cst_50 [1, 2, 3] : vector<1x2x16x14xf32> to vector<1xf32>
      %129 = vector.shape_cast %128 : vector<1xf32> to vector<1x1x1x1xf32>
      %130 = vector.extract %129[0, 0, 0, 0] : f32 from vector<1x1x1x1xf32>
      %cst_51 = arith.constant 0.00223214296 : f32
      %131 = arith.mulf %125, %cst_51 : f32
      %cst_52 = arith.constant 0.00223214296 : f32
      %132 = arith.mulf %130, %cst_52 : f32
      %133 = arith.mulf %131, %131 : f32
      %134 = arith.subf %132, %133 : f32
      %c0_53 = arith.constant 0 : index
      %135 = memref.load %arg4[%c0_53] : memref<8xf32, #tpu.memory_space<smem>>
      %cst_54 = arith.constant 9.99999974E-6 : f32
      %136 = arith.addf %134, %cst_54 : f32
      %137 = math.rsqrt %136 : f32
      %138 = arith.mulf %135, %137 : f32
      %c0_55 = arith.constant 0 : index
      %139 = memref.load %arg5[%c0_55] : memref<8xf32, #tpu.memory_space<smem>>
      %140 = arith.mulf %131, %138 : f32
      %141 = arith.subf %139, %140 : f32
      %142 = vector.broadcast %138 : f32 to vector<2x16x14xf32>
      %143 = arith.mulf %121, %142 : vector<2x16x14xf32>
      %144 = vector.broadcast %141 : f32 to vector<2x16x14xf32>
      %145 = arith.addf %143, %144 : vector<2x16x14xf32>
      %c0_56 = arith.constant 0 : index
      %c0_57 = arith.constant 0 : index
      %c0_58 = arith.constant 0 : index
      %c0_59 = arith.constant 0 : index
      %146 = vector.load %arg9[%c0_56, %c0_57, %c0_58, %c0_59] : memref<8x2x16x14xf32, #tpu.memory_space<vmem>>, vector<1x2x16x14xf32>
      %147 = vector.shape_cast %146 : vector<1x2x16x14xf32> to vector<2x16x14xf32>
      %148 = vector.shape_cast %145 : vector<2x16x14xf32> to vector<1x2x16x14xf32>
      tpu.vector_store %arg9[%c0_56, %c0_57, %c0_58, %c0_59], %148 {strides = array<i32>} : memref<8x2x16x14xf32, #tpu.memory_space<vmem>>, vector<1x2x16x14xf32>,
      %cst_60 = arith.constant 0.000000e+00 : f32
      %149 = vector.broadcast %cst_60 : f32 to vector<2x16x14xf32>
      %c6_61 = arith.constant 6 : index
      %150 = memref.load %arg2[%c6_61] : memref<48xf32, #tpu.memory_space<smem>>
      %151 = vector.broadcast %150 : f32 to vector<2x16x14xf32>
      %152 = arith.mulf %151, %86 : vector<2x16x14xf32>
      %153 = arith.addf %149, %152 : vector<2x16x14xf32>
      %c7_62 = arith.constant 7 : index
      %154 = memref.load %arg2[%c7_62] : memref<48xf32, #tpu.memory_space<smem>>
      %155 = vector.broadcast %154 : f32 to vector<2x16x14xf32>
      %156 = arith.mulf %155, %87 : vector<2x16x14xf32>
      %157 = arith.addf %153, %156 : vector<2x16x14xf32>
      %c8 = arith.constant 8 : index
      %158 = memref.load %arg2[%c8] : memref<48xf32, #tpu.memory_space<smem>>
      %159 = vector.broadcast %158 : f32 to vector<2x16x14xf32>
      %160 = arith.mulf %159, %88 : vector<2x16x14xf32>
      %161 = arith.addf %157, %160 : vector<2x16x14xf32>
      %c9 = arith.constant 9 : index
      %162 = memref.load %arg2[%c9] : memref<48xf32, #tpu.memory_space<smem>>
      %163 = vector.broadcast %162 : f32 to vector<2x16x14xf32>
      %164 = arith.mulf %163, %91 : vector<2x16x14xf32>
      %165 = arith.addf %161, %164 : vector<2x16x14xf32>
      %c10 = arith.constant 10 : index
      %166 = memref.load %arg2[%c10] : memref<48xf32, #tpu.memory_space<smem>>
      %167 = vector.broadcast %166 : f32 to vector<2x16x14xf32>
      %168 = arith.mulf %167, %92 : vector<2x16x14xf32>
      %169 = arith.addf %165, %168 : vector<2x16x14xf32>
      %c11 = arith.constant 11 : index
      %170 = memref.load %arg2[%c11] : memref<48xf32, #tpu.memory_space<smem>>
      %171 = vector.broadcast %170 : f32 to vector<2x16x14xf32>
      %172 = arith.mulf %171, %93 : vector<2x16x14xf32>
      %173 = arith.addf %169, %172 : vector<2x16x14xf32>
      %c1_63 = arith.constant 1 : index
      %174 = memref.load %arg3[%c1_63] : memref<8xf32, #tpu.memory_space<smem>>
      %175 = vector.broadcast %174 : f32 to vector<2x16x14xf32>
      %176 = arith.addf %173, %175 : vector<2x16x14xf32>
      %177 = vector.shape_cast %176 : vector<2x16x14xf32> to vector<1x2x16x14xf32>
      %cst_64 = arith.constant dense<0.000000e+00> : vector<1xf32>
      %178 = vector.multi_reduction <add>, %177, %cst_64 [1, 2, 3] : vector<1x2x16x14xf32> to vector<1xf32>
      %179 = vector.shape_cast %178 : vector<1xf32> to vector<1x1x1x1xf32>
      %180 = vector.extract %179[0, 0, 0, 0] : f32 from vector<1x1x1x1xf32>
      %181 = arith.mulf %176, %176 : vector<2x16x14xf32>
      %182 = vector.shape_cast %181 : vector<2x16x14xf32> to vector<1x2x16x14xf32>
      %cst_65 = arith.constant dense<0.000000e+00> : vector<1xf32>
      %183 = vector.multi_reduction <add>, %182, %cst_65 [1, 2, 3] : vector<1x2x16x14xf32> to vector<1xf32>
      %184 = vector.shape_cast %183 : vector<1xf32> to vector<1x1x1x1xf32>
      %185 = vector.extract %184[0, 0, 0, 0] : f32 from vector<1x1x1x1xf32>
      %cst_66 = arith.constant 0.00223214296 : f32
      %186 = arith.mulf %180, %cst_66 : f32
      %cst_67 = arith.constant 0.00223214296 : f32
      %187 = arith.mulf %185, %cst_67 : f32
      %188 = arith.mulf %186, %186 : f32
      %189 = arith.subf %187, %188 : f32
      %c1_68 = arith.constant 1 : index
      %190 = memref.load %arg4[%c1_68] : memref<8xf32, #tpu.memory_space<smem>>
      %cst_69 = arith.constant 9.99999974E-6 : f32
      %191 = arith.addf %189, %cst_69 : f32
      %192 = math.rsqrt %191 : f32
      %193 = arith.mulf %190, %192 : f32
      %c1_70 = arith.constant 1 : index
      %194 = memref.load %arg5[%c1_70] : memref<8xf32, #tpu.memory_space<smem>>
      %195 = arith.mulf %186, %193 : f32
      %196 = arith.subf %194, %195 : f32
      %197 = vector.broadcast %193 : f32 to vector<2x16x14xf32>
      %198 = arith.mulf %176, %197 : vector<2x16x14xf32>
      %199 = vector.broadcast %196 : f32 to vector<2x16x14xf32>
      %200 = arith.addf %198, %199 : vector<2x16x14xf32>
      %c1_71 = arith.constant 1 : index
      %c0_72 = arith.constant 0 : index
      %c0_73 = arith.constant 0 : index
      %c0_74 = arith.constant 0 : index
      %201 = vector.load %arg9[%c1_71, %c0_72, %c0_73, %c0_74] : memref<8x2x16x14xf32, #tpu.memory_space<vmem>>, vector<1x2x16x14xf32>
      %202 = vector.shape_cast %201 : vector<1x2x16x14xf32> to vector<2x16x14xf32>
      %203 = vector.shape_cast %200 : vector<2x16x14xf32> to vector<1x2x16x14xf32>
      tpu.vector_store %arg9[%c1_71, %c0_72, %c0_73, %c0_74], %203 {strides = array<i32>} : memref<8x2x16x14xf32, #tpu.memory_space<vmem>>, vector<1x2x16x14xf32>,
      %cst_75 = arith.constant 0.000000e+00 : f32
      %204 = vector.broadcast %cst_75 : f32 to vector<2x16x14xf32>
      %c12 = arith.constant 12 : index
      %205 = memref.load %arg2[%c12] : memref<48xf32, #tpu.memory_space<smem>>
      %206 = vector.broadcast %205 : f32 to vector<2x16x14xf32>
      %207 = arith.mulf %206, %86 : vector<2x16x14xf32>
      %208 = arith.addf %204, %207 : vector<2x16x14xf32>
      %c13 = arith.constant 13 : index
      %209 = memref.load %arg2[%c13] : memref<48xf32, #tpu.memory_space<smem>>
      %210 = vector.broadcast %209 : f32 to vector<2x16x14xf32>
      %211 = arith.mulf %210, %87 : vector<2x16x14xf32>
      %212 = arith.addf %208, %211 : vector<2x16x14xf32>
      %c14 = arith.constant 14 : index
      %213 = memref.load %arg2[%c14] : memref<48xf32, #tpu.memory_space<smem>>
      %214 = vector.broadcast %213 : f32 to vector<2x16x14xf32>
      %215 = arith.mulf %214, %88 : vector<2x16x14xf32>
      %216 = arith.addf %212, %215 : vector<2x16x14xf32>
      %c15 = arith.constant 15 : index
      %217 = memref.load %arg2[%c15] : memref<48xf32, #tpu.memory_space<smem>>
      %218 = vector.broadcast %217 : f32 to vector<2x16x14xf32>
      %219 = arith.mulf %218, %91 : vector<2x16x14xf32>
      %220 = arith.addf %216, %219 : vector<2x16x14xf32>
      %c16 = arith.constant 16 : index
      %221 = memref.load %arg2[%c16] : memref<48xf32, #tpu.memory_space<smem>>
      %222 = vector.broadcast %221 : f32 to vector<2x16x14xf32>
      %223 = arith.mulf %222, %92 : vector<2x16x14xf32>
      %224 = arith.addf %220, %223 : vector<2x16x14xf32>
      %c17 = arith.constant 17 : index
      %225 = memref.load %arg2[%c17] : memref<48xf32, #tpu.memory_space<smem>>
      %226 = vector.broadcast %225 : f32 to vector<2x16x14xf32>
      %227 = arith.mulf %226, %93 : vector<2x16x14xf32>
      %228 = arith.addf %224, %227 : vector<2x16x14xf32>
      %c2_76 = arith.constant 2 : index
      %229 = memref.load %arg3[%c2_76] : memref<8xf32, #tpu.memory_space<smem>>
      %230 = vector.broadcast %229 : f32 to vector<2x16x14xf32>
      %231 = arith.addf %228, %230 : vector<2x16x14xf32>
      %232 = vector.shape_cast %231 : vector<2x16x14xf32> to vector<1x2x16x14xf32>
      %cst_77 = arith.constant dense<0.000000e+00> : vector<1xf32>
      %233 = vector.multi_reduction <add>, %232, %cst_77 [1, 2, 3] : vector<1x2x16x14xf32> to vector<1xf32>
      %234 = vector.shape_cast %233 : vector<1xf32> to vector<1x1x1x1xf32>
      %235 = vector.extract %234[0, 0, 0, 0] : f32 from vector<1x1x1x1xf32>
      %236 = arith.mulf %231, %231 : vector<2x16x14xf32>
      %237 = vector.shape_cast %236 : vector<2x16x14xf32> to vector<1x2x16x14xf32>
      %cst_78 = arith.constant dense<0.000000e+00> : vector<1xf32>
      %238 = vector.multi_reduction <add>, %237, %cst_78 [1, 2, 3] : vector<1x2x16x14xf32> to vector<1xf32>
      %239 = vector.shape_cast %238 : vector<1xf32> to vector<1x1x1x1xf32>
      %240 = vector.extract %239[0, 0, 0, 0] : f32 from vector<1x1x1x1xf32>
      %cst_79 = arith.constant 0.00223214296 : f32
      %241 = arith.mulf %235, %cst_79 : f32
      %cst_80 = arith.constant 0.00223214296 : f32
      %242 = arith.mulf %240, %cst_80 : f32
      %243 = arith.mulf %241, %241 : f32
      %244 = arith.subf %242, %243 : f32
      %c2_81 = arith.constant 2 : index
      %245 = memref.load %arg4[%c2_81] : memref<8xf32, #tpu.memory_space<smem>>
      %cst_82 = arith.constant 9.99999974E-6 : f32
      %246 = arith.addf %244, %cst_82 : f32
      %247 = math.rsqrt %246 : f32
      %248 = arith.mulf %245, %247 : f32
      %c2_83 = arith.constant 2 : index
      %249 = memref.load %arg5[%c2_83] : memref<8xf32, #tpu.memory_space<smem>>
      %250 = arith.mulf %241, %248 : f32
      %251 = arith.subf %249, %250 : f32
      %252 = vector.broadcast %248 : f32 to vector<2x16x14xf32>
      %253 = arith.mulf %231, %252 : vector<2x16x14xf32>
      %254 = vector.broadcast %251 : f32 to vector<2x16x14xf32>
      %255 = arith.addf %253, %254 : vector<2x16x14xf32>
      %c2_84 = arith.constant 2 : index
      %c0_85 = arith.constant 0 : index
      %c0_86 = arith.constant 0 : index
      %c0_87 = arith.constant 0 : index
      %256 = vector.load %arg9[%c2_84, %c0_85, %c0_86, %c0_87] : memref<8x2x16x14xf32, #tpu.memory_space<vmem>>, vector<1x2x16x14xf32>
      %257 = vector.shape_cast %256 : vector<1x2x16x14xf32> to vector<2x16x14xf32>
      %258 = vector.shape_cast %255 : vector<2x16x14xf32> to vector<1x2x16x14xf32>
      tpu.vector_store %arg9[%c2_84, %c0_85, %c0_86, %c0_87], %258 {strides = array<i32>} : memref<8x2x16x14xf32, #tpu.memory_space<vmem>>, vector<1x2x16x14xf32>,
      %cst_88 = arith.constant 0.000000e+00 : f32
      %259 = vector.broadcast %cst_88 : f32 to vector<2x16x14xf32>
      %c18 = arith.constant 18 : index
      %260 = memref.load %arg2[%c18] : memref<48xf32, #tpu.memory_space<smem>>
      %261 = vector.broadcast %260 : f32 to vector<2x16x14xf32>
      %262 = arith.mulf %261, %86 : vector<2x16x14xf32>
      %263 = arith.addf %259, %262 : vector<2x16x14xf32>
      %c19 = arith.constant 19 : index
      %264 = memref.load %arg2[%c19] : memref<48xf32, #tpu.memory_space<smem>>
      %265 = vector.broadcast %264 : f32 to vector<2x16x14xf32>
      %266 = arith.mulf %265, %87 : vector<2x16x14xf32>
      %267 = arith.addf %263, %266 : vector<2x16x14xf32>
      %c20 = arith.constant 20 : index
      %268 = memref.load %arg2[%c20] : memref<48xf32, #tpu.memory_space<smem>>
      %269 = vector.broadcast %268 : f32 to vector<2x16x14xf32>
      %270 = arith.mulf %269, %88 : vector<2x16x14xf32>
      %271 = arith.addf %267, %270 : vector<2x16x14xf32>
      %c21 = arith.constant 21 : index
      %272 = memref.load %arg2[%c21] : memref<48xf32, #tpu.memory_space<smem>>
      %273 = vector.broadcast %272 : f32 to vector<2x16x14xf32>
      %274 = arith.mulf %273, %91 : vector<2x16x14xf32>
      %275 = arith.addf %271, %274 : vector<2x16x14xf32>
      %c22 = arith.constant 22 : index
      %276 = memref.load %arg2[%c22] : memref<48xf32, #tpu.memory_space<smem>>
      %277 = vector.broadcast %276 : f32 to vector<2x16x14xf32>
      %278 = arith.mulf %277, %92 : vector<2x16x14xf32>
      %279 = arith.addf %275, %278 : vector<2x16x14xf32>
      %c23 = arith.constant 23 : index
      %280 = memref.load %arg2[%c23] : memref<48xf32, #tpu.memory_space<smem>>
      %281 = vector.broadcast %280 : f32 to vector<2x16x14xf32>
      %282 = arith.mulf %281, %93 : vector<2x16x14xf32>
      %283 = arith.addf %279, %282 : vector<2x16x14xf32>
      %c3_89 = arith.constant 3 : index
      %284 = memref.load %arg3[%c3_89] : memref<8xf32, #tpu.memory_space<smem>>
      %285 = vector.broadcast %284 : f32 to vector<2x16x14xf32>
      %286 = arith.addf %283, %285 : vector<2x16x14xf32>
      %287 = vector.shape_cast %286 : vector<2x16x14xf32> to vector<1x2x16x14xf32>
      %cst_90 = arith.constant dense<0.000000e+00> : vector<1xf32>
      %288 = vector.multi_reduction <add>, %287, %cst_90 [1, 2, 3] : vector<1x2x16x14xf32> to vector<1xf32>
      %289 = vector.shape_cast %288 : vector<1xf32> to vector<1x1x1x1xf32>
      %290 = vector.extract %289[0, 0, 0, 0] : f32 from vector<1x1x1x1xf32>
      %291 = arith.mulf %286, %286 : vector<2x16x14xf32>
      %292 = vector.shape_cast %291 : vector<2x16x14xf32> to vector<1x2x16x14xf32>
      %cst_91 = arith.constant dense<0.000000e+00> : vector<1xf32>
      %293 = vector.multi_reduction <add>, %292, %cst_91 [1, 2, 3] : vector<1x2x16x14xf32> to vector<1xf32>
      %294 = vector.shape_cast %293 : vector<1xf32> to vector<1x1x1x1xf32>
      %295 = vector.extract %294[0, 0, 0, 0] : f32 from vector<1x1x1x1xf32>
      %cst_92 = arith.constant 0.00223214296 : f32
      %296 = arith.mulf %290, %cst_92 : f32
      %cst_93 = arith.constant 0.00223214296 : f32
      %297 = arith.mulf %295, %cst_93 : f32
      %298 = arith.mulf %296, %296 : f32
      %299 = arith.subf %297, %298 : f32
      %c3_94 = arith.constant 3 : index
      %300 = memref.load %arg4[%c3_94] : memref<8xf32, #tpu.memory_space<smem>>
      %cst_95 = arith.constant 9.99999974E-6 : f32
      %301 = arith.addf %299, %cst_95 : f32
      %302 = math.rsqrt %301 : f32
      %303 = arith.mulf %300, %302 : f32
      %c3_96 = arith.constant 3 : index
      %304 = memref.load %arg5[%c3_96] : memref<8xf32, #tpu.memory_space<smem>>
      %305 = arith.mulf %296, %303 : f32
      %306 = arith.subf %304, %305 : f32
      %307 = vector.broadcast %303 : f32 to vector<2x16x14xf32>
      %308 = arith.mulf %286, %307 : vector<2x16x14xf32>
      %309 = vector.broadcast %306 : f32 to vector<2x16x14xf32>
      %310 = arith.addf %308, %309 : vector<2x16x14xf32>
      %c3_97 = arith.constant 3 : index
      %c0_98 = arith.constant 0 : index
      %c0_99 = arith.constant 0 : index
      %c0_100 = arith.constant 0 : index
      %311 = vector.load %arg9[%c3_97, %c0_98, %c0_99, %c0_100] : memref<8x2x16x14xf32, #tpu.memory_space<vmem>>, vector<1x2x16x14xf32>
      %312 = vector.shape_cast %311 : vector<1x2x16x14xf32> to vector<2x16x14xf32>
      %313 = vector.shape_cast %310 : vector<2x16x14xf32> to vector<1x2x16x14xf32>
      tpu.vector_store %arg9[%c3_97, %c0_98, %c0_99, %c0_100], %313 {strides = array<i32>} : memref<8x2x16x14xf32, #tpu.memory_space<vmem>>, vector<1x2x16x14xf32>,
      %cst_101 = arith.constant 0.000000e+00 : f32
      %314 = vector.broadcast %cst_101 : f32 to vector<2x16x14xf32>
      %c24 = arith.constant 24 : index
      %315 = memref.load %arg2[%c24] : memref<48xf32, #tpu.memory_space<smem>>
      %316 = vector.broadcast %315 : f32 to vector<2x16x14xf32>
      %317 = arith.mulf %316, %86 : vector<2x16x14xf32>
      %318 = arith.addf %314, %317 : vector<2x16x14xf32>
      %c25 = arith.constant 25 : index
      %319 = memref.load %arg2[%c25] : memref<48xf32, #tpu.memory_space<smem>>
      %320 = vector.broadcast %319 : f32 to vector<2x16x14xf32>
      %321 = arith.mulf %320, %87 : vector<2x16x14xf32>
      %322 = arith.addf %318, %321 : vector<2x16x14xf32>
      %c26 = arith.constant 26 : index
      %323 = memref.load %arg2[%c26] : memref<48xf32, #tpu.memory_space<smem>>
      %324 = vector.broadcast %323 : f32 to vector<2x16x14xf32>
      %325 = arith.mulf %324, %88 : vector<2x16x14xf32>
      %326 = arith.addf %322, %325 : vector<2x16x14xf32>
      %c27 = arith.constant 27 : index
      %327 = memref.load %arg2[%c27] : memref<48xf32, #tpu.memory_space<smem>>
      %328 = vector.broadcast %327 : f32 to vector<2x16x14xf32>
      %329 = arith.mulf %328, %91 : vector<2x16x14xf32>
      %330 = arith.addf %326, %329 : vector<2x16x14xf32>
      %c28 = arith.constant 28 : index
      %331 = memref.load %arg2[%c28] : memref<48xf32, #tpu.memory_space<smem>>
      %332 = vector.broadcast %331 : f32 to vector<2x16x14xf32>
      %333 = arith.mulf %332, %92 : vector<2x16x14xf32>
      %334 = arith.addf %330, %333 : vector<2x16x14xf32>
      %c29 = arith.constant 29 : index
      %335 = memref.load %arg2[%c29] : memref<48xf32, #tpu.memory_space<smem>>
      %336 = vector.broadcast %335 : f32 to vector<2x16x14xf32>
      %337 = arith.mulf %336, %93 : vector<2x16x14xf32>
      %338 = arith.addf %334, %337 : vector<2x16x14xf32>
      %c4_102 = arith.constant 4 : index
      %339 = memref.load %arg3[%c4_102] : memref<8xf32, #tpu.memory_space<smem>>
      %340 = vector.broadcast %339 : f32 to vector<2x16x14xf32>
      %341 = arith.addf %338, %340 : vector<2x16x14xf32>
      %342 = vector.shape_cast %341 : vector<2x16x14xf32> to vector<1x2x16x14xf32>
      %cst_103 = arith.constant dense<0.000000e+00> : vector<1xf32>
      %343 = vector.multi_reduction <add>, %342, %cst_103 [1, 2, 3] : vector<1x2x16x14xf32> to vector<1xf32>
      %344 = vector.shape_cast %343 : vector<1xf32> to vector<1x1x1x1xf32>
      %345 = vector.extract %344[0, 0, 0, 0] : f32 from vector<1x1x1x1xf32>
      %346 = arith.mulf %341, %341 : vector<2x16x14xf32>
      %347 = vector.shape_cast %346 : vector<2x16x14xf32> to vector<1x2x16x14xf32>
      %cst_104 = arith.constant dense<0.000000e+00> : vector<1xf32>
      %348 = vector.multi_reduction <add>, %347, %cst_104 [1, 2, 3] : vector<1x2x16x14xf32> to vector<1xf32>
      %349 = vector.shape_cast %348 : vector<1xf32> to vector<1x1x1x1xf32>
      %350 = vector.extract %349[0, 0, 0, 0] : f32 from vector<1x1x1x1xf32>
      %cst_105 = arith.constant 0.00223214296 : f32
      %351 = arith.mulf %345, %cst_105 : f32
      %cst_106 = arith.constant 0.00223214296 : f32
      %352 = arith.mulf %350, %cst_106 : f32
      %353 = arith.mulf %351, %351 : f32
      %354 = arith.subf %352, %353 : f32
      %c4_107 = arith.constant 4 : index
      %355 = memref.load %arg4[%c4_107] : memref<8xf32, #tpu.memory_space<smem>>
      %cst_108 = arith.constant 9.99999974E-6 : f32
      %356 = arith.addf %354, %cst_108 : f32
      %357 = math.rsqrt %356 : f32
      %358 = arith.mulf %355, %357 : f32
      %c4_109 = arith.constant 4 : index
      %359 = memref.load %arg5[%c4_109] : memref<8xf32, #tpu.memory_space<smem>>
      %360 = arith.mulf %351, %358 : f32
      %361 = arith.subf %359, %360 : f32
      %362 = vector.broadcast %358 : f32 to vector<2x16x14xf32>
      %363 = arith.mulf %341, %362 : vector<2x16x14xf32>
      %364 = vector.broadcast %361 : f32 to vector<2x16x14xf32>
      %365 = arith.addf %363, %364 : vector<2x16x14xf32>
      %c4_110 = arith.constant 4 : index
      %c0_111 = arith.constant 0 : index
      %c0_112 = arith.constant 0 : index
      %c0_113 = arith.constant 0 : index
      %366 = vector.load %arg9[%c4_110, %c0_111, %c0_112, %c0_113] : memref<8x2x16x14xf32, #tpu.memory_space<vmem>>, vector<1x2x16x14xf32>
      %367 = vector.shape_cast %366 : vector<1x2x16x14xf32> to vector<2x16x14xf32>
      %368 = vector.shape_cast %365 : vector<2x16x14xf32> to vector<1x2x16x14xf32>
      tpu.vector_store %arg9[%c4_110, %c0_111, %c0_112, %c0_113], %368 {strides = array<i32>} : memref<8x2x16x14xf32, #tpu.memory_space<vmem>>, vector<1x2x16x14xf32>,
      %cst_114 = arith.constant 0.000000e+00 : f32
      %369 = vector.broadcast %cst_114 : f32 to vector<2x16x14xf32>
      %c30 = arith.constant 30 : index
      %370 = memref.load %arg2[%c30] : memref<48xf32, #tpu.memory_space<smem>>
      %371 = vector.broadcast %370 : f32 to vector<2x16x14xf32>
      %372 = arith.mulf %371, %86 : vector<2x16x14xf32>
      %373 = arith.addf %369, %372 : vector<2x16x14xf32>
      %c31 = arith.constant 31 : index
      %374 = memref.load %arg2[%c31] : memref<48xf32, #tpu.memory_space<smem>>
      %375 = vector.broadcast %374 : f32 to vector<2x16x14xf32>
      %376 = arith.mulf %375, %87 : vector<2x16x14xf32>
      %377 = arith.addf %373, %376 : vector<2x16x14xf32>
      %c32 = arith.constant 32 : index
      %378 = memref.load %arg2[%c32] : memref<48xf32, #tpu.memory_space<smem>>
      %379 = vector.broadcast %378 : f32 to vector<2x16x14xf32>
      %380 = arith.mulf %379, %88 : vector<2x16x14xf32>
      %381 = arith.addf %377, %380 : vector<2x16x14xf32>
      %c33 = arith.constant 33 : index
      %382 = memref.load %arg2[%c33] : memref<48xf32, #tpu.memory_space<smem>>
      %383 = vector.broadcast %382 : f32 to vector<2x16x14xf32>
      %384 = arith.mulf %383, %91 : vector<2x16x14xf32>
      %385 = arith.addf %381, %384 : vector<2x16x14xf32>
      %c34 = arith.constant 34 : index
      %386 = memref.load %arg2[%c34] : memref<48xf32, #tpu.memory_space<smem>>
      %387 = vector.broadcast %386 : f32 to vector<2x16x14xf32>
      %388 = arith.mulf %387, %92 : vector<2x16x14xf32>
      %389 = arith.addf %385, %388 : vector<2x16x14xf32>
      %c35 = arith.constant 35 : index
      %390 = memref.load %arg2[%c35] : memref<48xf32, #tpu.memory_space<smem>>
      %391 = vector.broadcast %390 : f32 to vector<2x16x14xf32>
      %392 = arith.mulf %391, %93 : vector<2x16x14xf32>
      %393 = arith.addf %389, %392 : vector<2x16x14xf32>
      %c5_115 = arith.constant 5 : index
      %394 = memref.load %arg3[%c5_115] : memref<8xf32, #tpu.memory_space<smem>>
      %395 = vector.broadcast %394 : f32 to vector<2x16x14xf32>
      %396 = arith.addf %393, %395 : vector<2x16x14xf32>
      %397 = vector.shape_cast %396 : vector<2x16x14xf32> to vector<1x2x16x14xf32>
      %cst_116 = arith.constant dense<0.000000e+00> : vector<1xf32>
      %398 = vector.multi_reduction <add>, %397, %cst_116 [1, 2, 3] : vector<1x2x16x14xf32> to vector<1xf32>
      %399 = vector.shape_cast %398 : vector<1xf32> to vector<1x1x1x1xf32>
      %400 = vector.extract %399[0, 0, 0, 0] : f32 from vector<1x1x1x1xf32>
      %401 = arith.mulf %396, %396 : vector<2x16x14xf32>
      %402 = vector.shape_cast %401 : vector<2x16x14xf32> to vector<1x2x16x14xf32>
      %cst_117 = arith.constant dense<0.000000e+00> : vector<1xf32>
      %403 = vector.multi_reduction <add>, %402, %cst_117 [1, 2, 3] : vector<1x2x16x14xf32> to vector<1xf32>
      %404 = vector.shape_cast %403 : vector<1xf32> to vector<1x1x1x1xf32>
      %405 = vector.extract %404[0, 0, 0, 0] : f32 from vector<1x1x1x1xf32>
      %cst_118 = arith.constant 0.00223214296 : f32
      %406 = arith.mulf %400, %cst_118 : f32
      %cst_119 = arith.constant 0.00223214296 : f32
      %407 = arith.mulf %405, %cst_119 : f32
      %408 = arith.mulf %406, %406 : f32
      %409 = arith.subf %407, %408 : f32
      %c5_120 = arith.constant 5 : index
      %410 = memref.load %arg4[%c5_120] : memref<8xf32, #tpu.memory_space<smem>>
      %cst_121 = arith.constant 9.99999974E-6 : f32
      %411 = arith.addf %409, %cst_121 : f32
      %412 = math.rsqrt %411 : f32
      %413 = arith.mulf %410, %412 : f32
      %c5_122 = arith.constant 5 : index
      %414 = memref.load %arg5[%c5_122] : memref<8xf32, #tpu.memory_space<smem>>
      %415 = arith.mulf %406, %413 : f32
      %416 = arith.subf %414, %415 : f32
      %417 = vector.broadcast %413 : f32 to vector<2x16x14xf32>
      %418 = arith.mulf %396, %417 : vector<2x16x14xf32>
      %419 = vector.broadcast %416 : f32 to vector<2x16x14xf32>
      %420 = arith.addf %418, %419 : vector<2x16x14xf32>
      %c5_123 = arith.constant 5 : index
      %c0_124 = arith.constant 0 : index
      %c0_125 = arith.constant 0 : index
      %c0_126 = arith.constant 0 : index
      %421 = vector.load %arg9[%c5_123, %c0_124, %c0_125, %c0_126] : memref<8x2x16x14xf32, #tpu.memory_space<vmem>>, vector<1x2x16x14xf32>
      %422 = vector.shape_cast %421 : vector<1x2x16x14xf32> to vector<2x16x14xf32>
      %423 = vector.shape_cast %420 : vector<2x16x14xf32> to vector<1x2x16x14xf32>
      tpu.vector_store %arg9[%c5_123, %c0_124, %c0_125, %c0_126], %423 {strides = array<i32>} : memref<8x2x16x14xf32, #tpu.memory_space<vmem>>, vector<1x2x16x14xf32>,
      %cst_127 = arith.constant 0.000000e+00 : f32
      %424 = vector.broadcast %cst_127 : f32 to vector<2x16x14xf32>
      %c36 = arith.constant 36 : index
      %425 = memref.load %arg2[%c36] : memref<48xf32, #tpu.memory_space<smem>>
      %426 = vector.broadcast %425 : f32 to vector<2x16x14xf32>
      %427 = arith.mulf %426, %86 : vector<2x16x14xf32>
      %428 = arith.addf %424, %427 : vector<2x16x14xf32>
      %c37 = arith.constant 37 : index
      %429 = memref.load %arg2[%c37] : memref<48xf32, #tpu.memory_space<smem>>
      %430 = vector.broadcast %429 : f32 to vector<2x16x14xf32>
      %431 = arith.mulf %430, %87 : vector<2x16x14xf32>
      %432 = arith.addf %428, %431 : vector<2x16x14xf32>
      %c38 = arith.constant 38 : index
      %433 = memref.load %arg2[%c38] : memref<48xf32, #tpu.memory_space<smem>>
      %434 = vector.broadcast %433 : f32 to vector<2x16x14xf32>
      %435 = arith.mulf %434, %88 : vector<2x16x14xf32>
      %436 = arith.addf %432, %435 : vector<2x16x14xf32>
      %c39 = arith.constant 39 : index
      %437 = memref.load %arg2[%c39] : memref<48xf32, #tpu.memory_space<smem>>
      %438 = vector.broadcast %437 : f32 to vector<2x16x14xf32>
      %439 = arith.mulf %438, %91 : vector<2x16x14xf32>
      %440 = arith.addf %436, %439 : vector<2x16x14xf32>
      %c40 = arith.constant 40 : index
      %441 = memref.load %arg2[%c40] : memref<48xf32, #tpu.memory_space<smem>>
      %442 = vector.broadcast %441 : f32 to vector<2x16x14xf32>
      %443 = arith.mulf %442, %92 : vector<2x16x14xf32>
      %444 = arith.addf %440, %443 : vector<2x16x14xf32>
      %c41 = arith.constant 41 : index
      %445 = memref.load %arg2[%c41] : memref<48xf32, #tpu.memory_space<smem>>
      %446 = vector.broadcast %445 : f32 to vector<2x16x14xf32>
      %447 = arith.mulf %446, %93 : vector<2x16x14xf32>
      %448 = arith.addf %444, %447 : vector<2x16x14xf32>
      %c6_128 = arith.constant 6 : index
      %449 = memref.load %arg3[%c6_128] : memref<8xf32, #tpu.memory_space<smem>>
      %450 = vector.broadcast %449 : f32 to vector<2x16x14xf32>
      %451 = arith.addf %448, %450 : vector<2x16x14xf32>
      %452 = vector.shape_cast %451 : vector<2x16x14xf32> to vector<1x2x16x14xf32>
      %cst_129 = arith.constant dense<0.000000e+00> : vector<1xf32>
      %453 = vector.multi_reduction <add>, %452, %cst_129 [1, 2, 3] : vector<1x2x16x14xf32> to vector<1xf32>
      %454 = vector.shape_cast %453 : vector<1xf32> to vector<1x1x1x1xf32>
      %455 = vector.extract %454[0, 0, 0, 0] : f32 from vector<1x1x1x1xf32>
      %456 = arith.mulf %451, %451 : vector<2x16x14xf32>
      %457 = vector.shape_cast %456 : vector<2x16x14xf32> to vector<1x2x16x14xf32>
      %cst_130 = arith.constant dense<0.000000e+00> : vector<1xf32>
      %458 = vector.multi_reduction <add>, %457, %cst_130 [1, 2, 3] : vector<1x2x16x14xf32> to vector<1xf32>
      %459 = vector.shape_cast %458 : vector<1xf32> to vector<1x1x1x1xf32>
      %460 = vector.extract %459[0, 0, 0, 0] : f32 from vector<1x1x1x1xf32>
      %cst_131 = arith.constant 0.00223214296 : f32
      %461 = arith.mulf %455, %cst_131 : f32
      %cst_132 = arith.constant 0.00223214296 : f32
      %462 = arith.mulf %460, %cst_132 : f32
      %463 = arith.mulf %461, %461 : f32
      %464 = arith.subf %462, %463 : f32
      %c6_133 = arith.constant 6 : index
      %465 = memref.load %arg4[%c6_133] : memref<8xf32, #tpu.memory_space<smem>>
      %cst_134 = arith.constant 9.99999974E-6 : f32
      %466 = arith.addf %464, %cst_134 : f32
      %467 = math.rsqrt %466 : f32
      %468 = arith.mulf %465, %467 : f32
      %c6_135 = arith.constant 6 : index
      %469 = memref.load %arg5[%c6_135] : memref<8xf32, #tpu.memory_space<smem>>
      %470 = arith.mulf %461, %468 : f32
      %471 = arith.subf %469, %470 : f32
      %472 = vector.broadcast %468 : f32 to vector<2x16x14xf32>
      %473 = arith.mulf %451, %472 : vector<2x16x14xf32>
      %474 = vector.broadcast %471 : f32 to vector<2x16x14xf32>
      %475 = arith.addf %473, %474 : vector<2x16x14xf32>
      %c6_136 = arith.constant 6 : index
      %c0_137 = arith.constant 0 : index
      %c0_138 = arith.constant 0 : index
      %c0_139 = arith.constant 0 : index
      %476 = vector.load %arg9[%c6_136, %c0_137, %c0_138, %c0_139] : memref<8x2x16x14xf32, #tpu.memory_space<vmem>>, vector<1x2x16x14xf32>
      %477 = vector.shape_cast %476 : vector<1x2x16x14xf32> to vector<2x16x14xf32>
      %478 = vector.shape_cast %475 : vector<2x16x14xf32> to vector<1x2x16x14xf32>
      tpu.vector_store %arg9[%c6_136, %c0_137, %c0_138, %c0_139], %478 {strides = array<i32>} : memref<8x2x16x14xf32, #tpu.memory_space<vmem>>, vector<1x2x16x14xf32>,
      %cst_140 = arith.constant 0.000000e+00 : f32
      %479 = vector.broadcast %cst_140 : f32 to vector<2x16x14xf32>
      %c42 = arith.constant 42 : index
      %480 = memref.load %arg2[%c42] : memref<48xf32, #tpu.memory_space<smem>>
      %481 = vector.broadcast %480 : f32 to vector<2x16x14xf32>
      %482 = arith.mulf %481, %86 : vector<2x16x14xf32>
      %483 = arith.addf %479, %482 : vector<2x16x14xf32>
      %c43 = arith.constant 43 : index
      %484 = memref.load %arg2[%c43] : memref<48xf32, #tpu.memory_space<smem>>
      %485 = vector.broadcast %484 : f32 to vector<2x16x14xf32>
      %486 = arith.mulf %485, %87 : vector<2x16x14xf32>
      %487 = arith.addf %483, %486 : vector<2x16x14xf32>
      %c44 = arith.constant 44 : index
      %488 = memref.load %arg2[%c44] : memref<48xf32, #tpu.memory_space<smem>>
      %489 = vector.broadcast %488 : f32 to vector<2x16x14xf32>
      %490 = arith.mulf %489, %88 : vector<2x16x14xf32>
      %491 = arith.addf %487, %490 : vector<2x16x14xf32>
      %c45 = arith.constant 45 : index
      %492 = memref.load %arg2[%c45] : memref<48xf32, #tpu.memory_space<smem>>
      %493 = vector.broadcast %492 : f32 to vector<2x16x14xf32>
      %494 = arith.mulf %493, %91 : vector<2x16x14xf32>
      %495 = arith.addf %491, %494 : vector<2x16x14xf32>
      %c46 = arith.constant 46 : index
      %496 = memref.load %arg2[%c46] : memref<48xf32, #tpu.memory_space<smem>>
      %497 = vector.broadcast %496 : f32 to vector<2x16x14xf32>
      %498 = arith.mulf %497, %92 : vector<2x16x14xf32>
      %499 = arith.addf %495, %498 : vector<2x16x14xf32>
      %c47 = arith.constant 47 : index
      %500 = memref.load %arg2[%c47] : memref<48xf32, #tpu.memory_space<smem>>
      %501 = vector.broadcast %500 : f32 to vector<2x16x14xf32>
      %502 = arith.mulf %501, %93 : vector<2x16x14xf32>
      %503 = arith.addf %499, %502 : vector<2x16x14xf32>
      %c7_141 = arith.constant 7 : index
      %504 = memref.load %arg3[%c7_141] : memref<8xf32, #tpu.memory_space<smem>>
      %505 = vector.broadcast %504 : f32 to vector<2x16x14xf32>
      %506 = arith.addf %503, %505 : vector<2x16x14xf32>
      %507 = vector.shape_cast %506 : vector<2x16x14xf32> to vector<1x2x16x14xf32>
      %cst_142 = arith.constant dense<0.000000e+00> : vector<1xf32>
      %508 = vector.multi_reduction <add>, %507, %cst_142 [1, 2, 3] : vector<1x2x16x14xf32> to vector<1xf32>
      %509 = vector.shape_cast %508 : vector<1xf32> to vector<1x1x1x1xf32>
      %510 = vector.extract %509[0, 0, 0, 0] : f32 from vector<1x1x1x1xf32>
      %511 = arith.mulf %506, %506 : vector<2x16x14xf32>
      %512 = vector.shape_cast %511 : vector<2x16x14xf32> to vector<1x2x16x14xf32>
      %cst_143 = arith.constant dense<0.000000e+00> : vector<1xf32>
      %513 = vector.multi_reduction <add>, %512, %cst_143 [1, 2, 3] : vector<1x2x16x14xf32> to vector<1xf32>
      %514 = vector.shape_cast %513 : vector<1xf32> to vector<1x1x1x1xf32>
      %515 = vector.extract %514[0, 0, 0, 0] : f32 from vector<1x1x1x1xf32>
      %cst_144 = arith.constant 0.00223214296 : f32
      %516 = arith.mulf %510, %cst_144 : f32
      %cst_145 = arith.constant 0.00223214296 : f32
      %517 = arith.mulf %515, %cst_145 : f32
      %518 = arith.mulf %516, %516 : f32
      %519 = arith.subf %517, %518 : f32
      %c7_146 = arith.constant 7 : index
      %520 = memref.load %arg4[%c7_146] : memref<8xf32, #tpu.memory_space<smem>>
      %cst_147 = arith.constant 9.99999974E-6 : f32
      %521 = arith.addf %519, %cst_147 : f32
      %522 = math.rsqrt %521 : f32
      %523 = arith.mulf %520, %522 : f32
      %c7_148 = arith.constant 7 : index
      %524 = memref.load %arg5[%c7_148] : memref<8xf32, #tpu.memory_space<smem>>
      %525 = arith.mulf %516, %523 : f32
      %526 = arith.subf %524, %525 : f32
      %527 = vector.broadcast %523 : f32 to vector<2x16x14xf32>
      %528 = arith.mulf %506, %527 : vector<2x16x14xf32>
      %529 = vector.broadcast %526 : f32 to vector<2x16x14xf32>
      %530 = arith.addf %528, %529 : vector<2x16x14xf32>
      %c7_149 = arith.constant 7 : index
      %c0_150 = arith.constant 0 : index
      %c0_151 = arith.constant 0 : index
      %c0_152 = arith.constant 0 : index
      %531 = vector.load %arg9[%c7_149, %c0_150, %c0_151, %c0_152] : memref<8x2x16x14xf32, #tpu.memory_space<vmem>>, vector<1x2x16x14xf32>
      %532 = vector.shape_cast %531 : vector<1x2x16x14xf32> to vector<2x16x14xf32>
      %533 = vector.shape_cast %530 : vector<2x16x14xf32> to vector<1x2x16x14xf32>
      tpu.vector_store %arg9[%c7_149, %c0_150, %c0_151, %c0_152], %533 {strides = array<i32>} : memref<8x2x16x14xf32, #tpu.memory_space<vmem>>, vector<1x2x16x14xf32>,
    } else {
    }
    %cst = arith.constant 0.000000e+00 : f32
    %3 = vector.broadcast %cst : f32 to vector<2x16x14xf32>
    %4 = arith.index_cast %arg0 : i32 to index
    %5 = memref.load %arg7[%4] : memref<4xf32, #tpu.memory_space<smem>>
    %6 = vector.broadcast %5 : f32 to vector<2x16x14xf32>
    %7 = arith.addf %3, %6 : vector<2x16x14xf32>
    %c8_i32 = arith.constant 8 : i32
    %8 = arith.muli %arg0, %c8_i32 : i32
    %c0_i32_1 = arith.constant 0 : i32
    %9 = arith.addi %8, %c0_i32_1 : i32
    %10 = arith.index_cast %9 : i32 to index
    %11 = memref.load %arg6[%10] : memref<32xf32, #tpu.memory_space<smem>>
    %c0 = arith.constant 0 : index
    %c0_2 = arith.constant 0 : index
    %c0_3 = arith.constant 0 : index
    %c0_4 = arith.constant 0 : index
    %12 = vector.load %arg9[%c0, %c0_2, %c0_3, %c0_4] : memref<8x2x16x14xf32, #tpu.memory_space<vmem>>, vector<1x2x16x14xf32>
    %13 = vector.shape_cast %12 : vector<1x2x16x14xf32> to vector<2x16x14xf32>
    %14 = vector.broadcast %11 : f32 to vector<2x16x14xf32>
    %15 = arith.mulf %14, %13 : vector<2x16x14xf32>
    %16 = arith.addf %7, %15 : vector<2x16x14xf32>
    %c8_i32_5 = arith.constant 8 : i32
    %17 = arith.muli %arg0, %c8_i32_5 : i32
    %c1_i32 = arith.constant 1 : i32
    %18 = arith.addi %17, %c1_i32 : i32
    %19 = arith.index_cast %18 : i32 to index
    %20 = memref.load %arg6[%19] : memref<32xf32, #tpu.memory_space<smem>>
    %c1 = arith.constant 1 : index
    %c0_6 = arith.constant 0 : index
    %c0_7 = arith.constant 0 : index
    %c0_8 = arith.constant 0 : index
    %21 = vector.load %arg9[%c1, %c0_6, %c0_7, %c0_8] : memref<8x2x16x14xf32, #tpu.memory_space<vmem>>, vector<1x2x16x14xf32>
    %22 = vector.shape_cast %21 : vector<1x2x16x14xf32> to vector<2x16x14xf32>
    %23 = vector.broadcast %20 : f32 to vector<2x16x14xf32>
    %24 = arith.mulf %23, %22 : vector<2x16x14xf32>
    %25 = arith.addf %16, %24 : vector<2x16x14xf32>
    %c8_i32_9 = arith.constant 8 : i32
    %26 = arith.muli %arg0, %c8_i32_9 : i32
    %c2_i32 = arith.constant 2 : i32
    %27 = arith.addi %26, %c2_i32 : i32
    %28 = arith.index_cast %27 : i32 to index
    %29 = memref.load %arg6[%28] : memref<32xf32, #tpu.memory_space<smem>>
    %c2 = arith.constant 2 : index
    %c0_10 = arith.constant 0 : index
    %c0_11 = arith.constant 0 : index
    %c0_12 = arith.constant 0 : index
    %30 = vector.load %arg9[%c2, %c0_10, %c0_11, %c0_12] : memref<8x2x16x14xf32, #tpu.memory_space<vmem>>, vector<1x2x16x14xf32>
    %31 = vector.shape_cast %30 : vector<1x2x16x14xf32> to vector<2x16x14xf32>
    %32 = vector.broadcast %29 : f32 to vector<2x16x14xf32>
    %33 = arith.mulf %32, %31 : vector<2x16x14xf32>
    %34 = arith.addf %25, %33 : vector<2x16x14xf32>
    %c8_i32_13 = arith.constant 8 : i32
    %35 = arith.muli %arg0, %c8_i32_13 : i32
    %c3_i32 = arith.constant 3 : i32
    %36 = arith.addi %35, %c3_i32 : i32
    %37 = arith.index_cast %36 : i32 to index
    %38 = memref.load %arg6[%37] : memref<32xf32, #tpu.memory_space<smem>>
    %c3 = arith.constant 3 : index
    %c0_14 = arith.constant 0 : index
    %c0_15 = arith.constant 0 : index
    %c0_16 = arith.constant 0 : index
    %39 = vector.load %arg9[%c3, %c0_14, %c0_15, %c0_16] : memref<8x2x16x14xf32, #tpu.memory_space<vmem>>, vector<1x2x16x14xf32>
    %40 = vector.shape_cast %39 : vector<1x2x16x14xf32> to vector<2x16x14xf32>
    %41 = vector.broadcast %38 : f32 to vector<2x16x14xf32>
    %42 = arith.mulf %41, %40 : vector<2x16x14xf32>
    %43 = arith.addf %34, %42 : vector<2x16x14xf32>
    %c8_i32_17 = arith.constant 8 : i32
    %44 = arith.muli %arg0, %c8_i32_17 : i32
    %c4_i32 = arith.constant 4 : i32
    %45 = arith.addi %44, %c4_i32 : i32
    %46 = arith.index_cast %45 : i32 to index
    %47 = memref.load %arg6[%46] : memref<32xf32, #tpu.memory_space<smem>>
    %c4 = arith.constant 4 : index
    %c0_18 = arith.constant 0 : index
    %c0_19 = arith.constant 0 : index
    %c0_20 = arith.constant 0 : index
    %48 = vector.load %arg9[%c4, %c0_18, %c0_19, %c0_20] : memref<8x2x16x14xf32, #tpu.memory_space<vmem>>, vector<1x2x16x14xf32>
    %49 = vector.shape_cast %48 : vector<1x2x16x14xf32> to vector<2x16x14xf32>
    %50 = vector.broadcast %47 : f32 to vector<2x16x14xf32>
    %51 = arith.mulf %50, %49 : vector<2x16x14xf32>
    %52 = arith.addf %43, %51 : vector<2x16x14xf32>
    %c8_i32_21 = arith.constant 8 : i32
    %53 = arith.muli %arg0, %c8_i32_21 : i32
    %c5_i32 = arith.constant 5 : i32
    %54 = arith.addi %53, %c5_i32 : i32
    %55 = arith.index_cast %54 : i32 to index
    %56 = memref.load %arg6[%55] : memref<32xf32, #tpu.memory_space<smem>>
    %c5 = arith.constant 5 : index
    %c0_22 = arith.constant 0 : index
    %c0_23 = arith.constant 0 : index
    %c0_24 = arith.constant 0 : index
    %57 = vector.load %arg9[%c5, %c0_22, %c0_23, %c0_24] : memref<8x2x16x14xf32, #tpu.memory_space<vmem>>, vector<1x2x16x14xf32>
    %58 = vector.shape_cast %57 : vector<1x2x16x14xf32> to vector<2x16x14xf32>
    %59 = vector.broadcast %56 : f32 to vector<2x16x14xf32>
    %60 = arith.mulf %59, %58 : vector<2x16x14xf32>
    %61 = arith.addf %52, %60 : vector<2x16x14xf32>
    %c8_i32_25 = arith.constant 8 : i32
    %62 = arith.muli %arg0, %c8_i32_25 : i32
    %c6_i32 = arith.constant 6 : i32
    %63 = arith.addi %62, %c6_i32 : i32
    %64 = arith.index_cast %63 : i32 to index
    %65 = memref.load %arg6[%64] : memref<32xf32, #tpu.memory_space<smem>>
    %c6 = arith.constant 6 : index
    %c0_26 = arith.constant 0 : index
    %c0_27 = arith.constant 0 : index
    %c0_28 = arith.constant 0 : index
    %66 = vector.load %arg9[%c6, %c0_26, %c0_27, %c0_28] : memref<8x2x16x14xf32, #tpu.memory_space<vmem>>, vector<1x2x16x14xf32>
    %67 = vector.shape_cast %66 : vector<1x2x16x14xf32> to vector<2x16x14xf32>
    %68 = vector.broadcast %65 : f32 to vector<2x16x14xf32>
    %69 = arith.mulf %68, %67 : vector<2x16x14xf32>
    %70 = arith.addf %61, %69 : vector<2x16x14xf32>
    %c8_i32_29 = arith.constant 8 : i32
    %71 = arith.muli %arg0, %c8_i32_29 : i32
    %c7_i32 = arith.constant 7 : i32
    %72 = arith.addi %71, %c7_i32 : i32
    %73 = arith.index_cast %72 : i32 to index
    %74 = memref.load %arg6[%73] : memref<32xf32, #tpu.memory_space<smem>>
    %c7 = arith.constant 7 : index
    %c0_30 = arith.constant 0 : index
    %c0_31 = arith.constant 0 : index
    %c0_32 = arith.constant 0 : index
    %75 = vector.load %arg9[%c7, %c0_30, %c0_31, %c0_32] : memref<8x2x16x14xf32, #tpu.memory_space<vmem>>, vector<1x2x16x14xf32>
    %76 = vector.shape_cast %75 : vector<1x2x16x14xf32> to vector<2x16x14xf32>
    %77 = vector.broadcast %74 : f32 to vector<2x16x14xf32>
    %78 = arith.mulf %77, %76 : vector<2x16x14xf32>
    %79 = arith.addf %70, %78 : vector<2x16x14xf32>
    %c0_33 = arith.constant 0 : index
    %c0_34 = arith.constant 0 : index
    %c0_35 = arith.constant 0 : index
    %c0_36 = arith.constant 0 : index
    %80 = vector.load %arg8[%c0_33, %c0_34, %c0_35, %c0_36] : memref<1x2x16x14xf32, #tpu.memory_space<vmem>>, vector<1x2x16x14xf32>
    %81 = vector.shape_cast %80 : vector<1x2x16x14xf32> to vector<2x16x14xf32>
    %82 = vector.shape_cast %79 : vector<2x16x14xf32> to vector<1x2x16x14xf32>
    tpu.vector_store %arg8[%c0_33, %c0_34, %c0_35, %c0_36], %82 {strides = array<i32>} : memref<1x2x16x14xf32, #tpu.memory_space<vmem>>, vector<1x2x16x14xf32>,
    return
  }
  func.func @transform_0(%arg0: i32) -> (i32, i32, i32, i32) {
    %c0_i32 = arith.constant 0 : i32
    %c0_i32_0 = arith.constant 0 : i32
    %c0_i32_1 = arith.constant 0 : i32
    %c0_i32_2 = arith.constant 0 : i32
    %c0_i32_3 = arith.constant 0 : i32
    return %c0_i32, %c0_i32_0, %c0_i32_1, %c0_i32_2 : i32, i32, i32, i32
  }
  func.func @transform_1(%arg0: i32) -> i32 {
    %c0_i32 = arith.constant 0 : i32
    %c0_i32_0 = arith.constant 0 : i32
    return %c0_i32 : i32
  }
  func.func @transform_2(%arg0: i32) -> i32 {
    %c0_i32 = arith.constant 0 : i32
    %c0_i32_0 = arith.constant 0 : i32
    return %c0_i32 : i32
  }
  func.func @transform_3(%arg0: i32) -> i32 {
    %c0_i32 = arith.constant 0 : i32
    %c0_i32_0 = arith.constant 0 : i32
    return %c0_i32 : i32
  }
  func.func @transform_4(%arg0: i32) -> i32 {
    %c0_i32 = arith.constant 0 : i32
    %c0_i32_0 = arith.constant 0 : i32
    return %c0_i32 : i32
  }
  func.func @transform_5(%arg0: i32) -> i32 {
    %c0_i32 = arith.constant 0 : i32
    %c0_i32_0 = arith.constant 0 : i32
    return %c0_i32 : i32
  }
  func.func @transform_6(%arg0: i32) -> i32 {
    %c0_i32 = arith.constant 0 : i32
    %c0_i32_0 = arith.constant 0 : i32
    return %c0_i32 : i32
  }
  func.func @transform_7(%arg0: i32) -> (i32, i32, i32, i32) {
    %c0_i32 = arith.constant 0 : i32
    %c0_i32_0 = arith.constant 0 : i32
    %c0_i32_1 = arith.constant 0 : i32
    %c0_i32_2 = arith.constant 0 : i32
    return %arg0, %c0_i32, %c0_i32_0, %c0_i32_1 : i32, i32, i32, i32
  }
}

</mosaic_0001>

<bundles_post_ra>
// kernel: tpu_custom_call.1
= control target key start
LH: loop header
LB: loop body
LE: loop exit
PB: predicated region body
PF: predicated region fallthrough
CT: control target
= control target key end

     0   :  { %12 = vsyncpa [#allocation4], 0  ;;  %s3728_s0 = inlined_call_operand.hbm [shape: f32[2,2,16,16], index: 0, kind: input, shape index: {}]   ;;  %s3729_s1 = inlined_call_operand.hbm [shape: f32[48], index: 1, kind: input, shape index: {}]   ;;  %s3730_s2 = inlined_call_operand.vmem [shape: f32[8], index: 2, kind: input, shape index: {}]   ;;  %s3731_s3 = inlined_call_operand.vmem [shape: f32[8], index: 3, kind: input, shape index: {}]   ;;  %s3732_s4 = inlined_call_operand.vmem [shape: f32[8], index: 4, kind: input, shape index: {}]   ;;  %s3733_s5 = inlined_call_operand.vmem [shape: f32[32], index: 5, kind: input, shape index: {}]   ;;  %s3734_s6 = inlined_call_operand.vmem [shape: f32[4], index: 6, kind: input, shape index: {}]   ;;  %s3735_s7 = inlined_call_operand.vmem [shape: f32[4,2,16,14], index: 7, kind: output, shape index: {}]  }
   0x1   :  { %13 = vsyncpa [#allocation5], 0 }
   0x2   :  { %14 = vsyncpa [#allocation6], 0 }
   0x3   :  { %15 = vsyncpa [#allocation10], 0 }
   0x4   :  { %16 = vsyncpa [#allocation13], 0  ;;  %s2696_s24 = smov 0  }
   0x5 LB: > { %s246_s27 = sshll.u32 %s3731_s3, 4  ;;  %s2705_s28 = sadd.s32 4294967295, %s2643_s24   ;;  %s2643_s24 = sphi %s2696_s24, %s22_s24   ;;  %s247_s27 = int_to_ptr.vmem [resolvable:$true] %s246_s27 }
   0x6   : > { %p2243_p0 = scmp.ge.s32.totalorder %s2643_s24, 1  ;;  %p200_p1 = scmp.lt.s32.totalorder %s2643_s24, 5 }
   0x7   : > { %p2244_p2 = scmp.ne.s32.totalorder %s2705_s28, 0  ;;  %p2432_p3 = scmp.eq.s32.totalorder %s2705_s28, 0 }
   0x8   : > { %p2711_p4 = pnand %p2243_p0, %p200_p1  ;;  %s266_s9 = sshll.u32 %s3733_s5, 4  ;;  %s267_s9 = int_to_ptr.vmem [resolvable:$true] %s266_s9 }
   0x9   : > { %s211_s12 = sshll.u32 %s3728_s0, 4  ;;  %s2645_s14 = smov [#allocation3]   ;;  %s212_s12 = int_to_ptr.hbm [resolvable:$true] %s211_s12 }
   0xa   : > { %p2410_p5 = pneg %p2711_p4  ;;  %s213_s15 = sshll.u32 %s2645_s14, 4  ;;  %s214_s15 = int_to_ptr.vmem [resolvable:$true] %s213_s15 }
   0xb   : > { %s2646_s16 = smov [#allocation9]   ;;  %s2647_s17 = smov [#allocation12]  }
   0xc   : > { %p2725_p6 = pnand %p2432_p3, %p2410_p5  ;;  %s2648_s18 = smov 128  }
   0xd   : > { %s2649_s19 = smov 8   ;;  %s226_s22 = sshll.u32 %s3729_s1, 4  ;;  %s227_s22 = int_to_ptr.hbm [resolvable:$true] %s226_s22 }
   0xe   : > { %2422 = dma.vmem_to_smem (!%p2725_p6), %s247_s27, 16, %s2646_s16, [#allocation10]  }
   0xf   : > { %2428 = dma.vmem_to_smem (!%p2725_p6), %s267_s9, 16, %s2647_s17, [#allocation13]  }
  0x10   : > { %2413 = dma.hbm_to_vmem [thread:$0]  (!%p2725_p6), %s212_s12, 1024, %s214_s15, [#allocation4], %s2648_s18, %s2648_s18, %s2649_s19  }
  0x11   : > { %s236_s26 = sshll.u32 %s3730_s2, 4  ;;  %s2650_s30 = smov [#allocation7]   ;;  %s237_s26 = int_to_ptr.vmem [resolvable:$true] %s236_s26 }
  0x12   : > { %2416 = dma.hbm_to_smem (!%p2725_p6), %s227_s22, 16, %s2650_s30, [#allocation5]  }
  0x13   : > { %s2651_s27 = smov [#allocation8]   ;;  %s256_s10 = sshll.u32 %s3732_s4, 4  ;;  %s257_s10 = int_to_ptr.vmem [resolvable:$true] %s256_s10 }
  0x14   : > { %2419 = dma.vmem_to_smem (!%p2725_p6), %s237_s26, 16, %s2651_s27, [#allocation6]  }
  0x15   : > { %s276_s14 = sshll.u32 %s3734_s6, 4  ;;  %s2652_s15 = smov [#allocation11]   ;;  %s277_s14 = int_to_ptr.vmem [resolvable:$true] %s276_s14 }
  0x16   : > { %2425 = dma.vmem_to_smem (!%p2725_p6), %s257_s10, 16, %s2652_s15, [#allocation10]  }
  0x17   : > { %s2653_s16 = smov [#allocation14]   ;;  %289 = sbr.rel (%p2711_p4) target bundleno = 1647 (0x66f), region = 48 }
  0x18   : > { %2431 = dma.vmem_to_smem (!%p2725_p6), %s277_s14, 16, %s2653_s16, [#allocation13]  }
  0x1c   : > { %2622 = dma.done.wait (%p2432_p3), [#allocation4], 1024  }
  0x1d   : > { %2624 = vsyncadd (%p2432_p3), [#allocation4], 4294966272 }
  0x1e   : > { %2626 = dma.done.wait (%p2432_p3), [#allocation5], 16  }
  0x1f   : > { %2628 = vsyncadd (%p2432_p3), [#allocation5], 4294967280 }
  0x20   : > { %2630 = dma.done.wait (%p2432_p3), [#allocation6], 16  }
  0x21   : > { %2632 = vsyncadd (%p2432_p3), [#allocation6], 4294967280 }
  0x22   : > { %2634 = dma.done.wait (%p2432_p3), [#allocation10], 32  }
  0x23   : > { %2636 = vsyncadd (%p2432_p3), [#allocation10], 4294967264 }
  0x24   : > { %2638 = dma.done.wait (%p2432_p3), [#allocation13], 32  }
  0x25   : > { %2640 = vsyncadd (%p2432_p3), [#allocation13], 4294967264 }
  0x26   : > { %326 = sfence }
  0x27   : > { %p348_p7 = scmp.lt.s32.totalorder %s2705_s28, 3  ;;  %s2262_s20 = sld [smem:[#allocation7 + $0x1]] (!%p2244_p2) }
  0x28   : > { %356 = sbr.rel (%p2244_p2) target bundleno = 1611 (0x64b), region = 80  ;;  %s2263_s21 = sld [smem:[#allocation7 + $0x2]] (!%p2244_p2) }
  0x29   : > { %s349_s29 = scalar_select %p348_p7, %s2705_s28, 3 }
  0x2a   : > { %s2654_s22 = smov (!%p2244_p2), 127   ;;  %s2655_s23 = smov (!%p2244_p2), 126  }
  0x2b   : > { %s2333_s13 = sshll.u32 %s349_s29, 5  ;;  %s2265_s25 = sld [smem:[#allocation7 + $0x4]] (!%p2244_p2) }
  0x2c   : > { %s2782_s19 = scalar_lea.vmem %s3735_s7, %s2333_s13  ;;  %s2266_s26 = sld [smem:[#allocation7 + $0x5]] (!%p2244_p2) }
  0x2d   : > { %v2786_v0 = vld [vmem:[#allocation3 + $0x20] sm:$0xff]  ;;  %v376_v2 = vstv %s2262_s20  ;;  %v2792_v6 = vld [vmem:[#allocation3 + $0x8] sm:$0xff]  ;;  %v2806_v12 = vld [vmem:[#allocation3 + $0x10] sm:$0xff]  ;;  %s2268_s30 = sld [smem:[#allocation7 + $0x7]]  ;;  %vm495_vm0 = vcmask 113664  }
  0x2e   : > { %v2788_v1 = vld [vmem:[#allocation3] sm:$0xff]  ;;  %v379_v3 = vmul.f32 %v376_v2, %v2786_v0  ;;  %v402_v5 = vstv %s2263_s21  ;;  %v378_v9 = vmul.f32 %v376_v2, %v2792_v6  ;;  %v2800_v10 = vld [vmem:[#allocation3 + $0x28] sm:$0xff]  ;;  %v2813_v17 = vld [vmem:[#allocation3 + $0x30] sm:$0xff]  ;;  %s2269_s27 = sld [smem:[#allocation7 + $0x8]] }
  0x2f   : > { %v377_v4 = vmul.f32 %v376_v2, %v2788_v1  ;;  %v404_v7 = vmul.f32 %v402_v5, %v2792_v6  ;;  %v403_v8 = vmul.f32 %v402_v5, %v2788_v1  ;;  %v380_v11 = vmul.f32 %v376_v2, %v2800_v10  ;;  %v2815_v18 = vld [vmem:[#allocation3 + $0x18] sm:$0xff]  ;;  %s2272_s8 = sld [smem:[#allocation7 + $0xb]] }
  0x30   : > { %389 = vrot.lane.b32.xlu1 %v379_v3, %s2654_s22  ;;  %v406_v13 = vmul.f32 %v402_v5, %v2800_v10  ;;  %v405_v14 = vmul.f32 %v402_v5, %v2786_v0  ;;  %v2823_v23 = vld [vmem:[#allocation3 + $0x38] sm:$0xff]  ;;  %s2271_s9 = sld [smem:[#allocation7 + $0xa]] }
  0x31   : > { %385 = vrot.lane.b32.xlu0 %v377_v4, %s2654_s22  ;;  %413 = vrot.lane.b32.xlu2 %v404_v7, %s2655_s23  ;;  %v438_v15 = vstv %s2265_s25  ;;  %s365_s10 = sld [smem:[#allocation7]] }
  0x32   : > { %v439_v16 = vmul.f32 %v438_v15, %v2806_v12  ;;  %v441_v19 = vmul.f32 %v438_v15, %v2813_v17  ;;  %v440_v20 = vmul.f32 %v438_v15, %v2815_v18  ;;  %v464_v21 = vstv %s2266_s26  ;;  %s2264_s11 = sld [smem:[#allocation7 + $0x3]] }
  0x33   : > { %v465_v22 = vmul.f32 %v464_v21, %v2806_v12  ;;  %v442_v24 = vmul.f32 %v438_v15, %v2823_v23  ;;  %v466_v25 = vmul.f32 %v464_v21, %v2815_v18  ;;  %v467_v26 = vmul.f32 %v464_v21, %v2813_v17  ;;  %s489_s12 = sld [smem:[#allocation8]] }
  0x34   : > { %v468_v27 = vmul.f32 %v464_v21, %v2823_v23  ;;  %v579_v28 = vstv %s2268_s30  ;;  %v605_v32 = vstv %s2269_s27  ;;  %s2277_s14 = sld [smem:[#allocation7 + $0xd]] }
  0x35   : > { %v580_v29 = vmul.f32 %v579_v28, %v2788_v1  ;;  %v581_v30 = vmul.f32 %v579_v28, %v2792_v6  ;;  %v582_v31 = vmul.f32 %v579_v28, %v2786_v0  ;;  %v608_v33 = vmul.f32 %v605_v32, %v2786_v0  ;;  %s2278_s15 = sld [smem:[#allocation7 + $0xe]] }
  0x36   : > { %v606_v34 = vmul.f32 %v605_v32, %v2788_v1  ;;  %v607_v35 = vmul.f32 %v605_v32, %v2792_v6  ;;  %v583_v36 = vmul.f32 %v579_v28, %v2800_v10  ;;  %v2848_v37 = vstv %s2272_s8  ;;  %s2280_s16 = sld [smem:[#allocation7 + $0x10]] }
  0x37   : > { %v609_v38 = vmul.f32 %v605_v32, %v2800_v10  ;;  %v668_v39 = vmul.f32 %v2848_v37, %v2806_v12  ;;  %v2855_v40 = vstv %s2271_s9  ;;  %v669_v45 = vmul.f32 %v2848_v37, %v2815_v18  ;;  %s2281_s29 = sld [smem:[#allocation7 + $0x11]] }
  0x38   : > { %411 = vrot.lane.b32.xlu1 %v403_v8, %s2655_s23  ;;  %v644_v41 = vmul.f32 %v2855_v40, %v2813_v17  ;;  %v642_v42 = vmul.f32 %v2855_v40, %v2806_v12  ;;  %v643_v43 = vmul.f32 %v2855_v40, %v2815_v18  ;;  %v366_v49 = vstv %s365_s10  ;;  %s2267_s13 = sld [smem:[#allocation7 + $0x6]] }
  0x39   : > { %387 = vrot.lane.b32.xlu0 %v378_v9, %s2654_s22  ;;  %391 = vrot.lane.b32.xlu2 %v380_v11, %s2654_s22  ;;  %v367_v52 = vmul.f32 %v366_v49, %v2788_v1  ;;  %v428_v54 = vstv %s2264_s11  ;;  %v369_v60 = vmul.f32 %v366_v49, %v2786_v0  ;;  %v368_v61 = vmul.f32 %v366_v49, %v2792_v6  ;;  %s2270_s17 = sld [smem:[#allocation7 + $0x9]] }
  0x3a   : > { %v429_v56 = vmul.f32 %v428_v54, %v2806_v12  ;;  %v671_v62 = vmul.f32 %v2848_v37, %v2823_v23  ;;  %v431_v7 = vmul.f32 %v428_v54, %v2813_v17  ;;  %v370_v11 = vmul.f32 %v366_v49, %v2800_v10  ;;  %s2273_s18 = sld [smem:[#allocation8 + $0x1]] }
  0x3b   : > { %v490_v21 = vstv %s489_s12  ;;  %s2286_s20 = sld [smem:[#allocation7 + $0x13]] }
  0x3c   : > { %s2287_s10 = sld [smem:[#allocation7 + $0x14]] }
  0x3d   : > { %s2289_s11 = sld [smem:[#allocation7 + $0x16]] }
  0x3e   : > { %s536_s12 = sld [smem:[#allocation9]] }
  0x40   : > { %417 = vrot.lane.b32.xlu1 %v406_v13, %s2655_s23 }
  0x41   : > { %415 = vrot.lane.b32.xlu0 %v405_v14, %s2655_s23  ;;  %447 = vrot.lane.b32.xlu2 %v439_v16, %s2654_s22  ;;  %v430_v14 = vmul.f32 %v428_v54, %v2815_v18 }
  0x48   : > { %451 = vrot.lane.b32.xlu1 %v441_v19, %s2654_s22 }
  0x49   : > { %449 = vrot.lane.b32.xlu0 %v440_v20, %s2654_s22  ;;  %473 = vrot.lane.b32.xlu2 %v465_v22, %s2655_s23 }
  0x50   : > { %453 = vrot.lane.b32.xlu1 %v442_v24, %s2654_s22 }
  0x51   : > { %475 = vrot.lane.b32.xlu0 %v466_v25, %s2655_s23  ;;  %477 = vrot.lane.b32.xlu2 %v467_v26, %s2655_s23 }
  0x58   : > { %618 = vrot.lane.b32.xlu1 %v608_v33, %s2655_s23 }
  0x59   : > { %479 = vrot.lane.b32.xlu0 %v468_v27, %s2655_s23  ;;  %594 = vrot.lane.b32.xlu2 %v583_v36, %s2654_s22 }
  0x60   : > { %676 = vrot.lane.b32.xlu1 %v668_v39, %s2655_s23 }
  0x61   : > { %588 = vrot.lane.b32.xlu0 %v580_v29, %s2654_s22  ;;  %654 = vrot.lane.b32.xlu2 %v644_v41, %s2654_s22 }
  0x69   : > { %590 = vrot.lane.b32.xlu0 %v581_v30, %s2654_s22 }
  0x71   : > { %592 = vrot.lane.b32.xlu0 %v582_v31, %s2654_s22  ;;  %v432_v31 = vmul.f32 %v428_v54, %v2823_v23 }
  0x79   : > { %614 = vrot.lane.b32.xlu0 %v606_v34, %s2655_s23 }
  0x81   : > { %616 = vrot.lane.b32.xlu0 %v607_v35, %s2655_s23 }
  0x89   : > { %620 = vrot.lane.b32.xlu0 %v609_v38, %s2655_s23 }
  0x8b   : > { %v414_v44 = vpop.permute.xlu2 %413 }
  0x91   : > { %650 = vrot.lane.b32.xlu0 %v642_v42, %s2654_s22 }
  0x93   : > { %v392_v48 = vpop.permute.xlu2 %391 }
  0x94   : > { %v400_v20 = vadd.f32 %v392_v48, %v370_v11 }
  0x99   : > { %652 = vrot.lane.b32.xlu0 %v643_v43, %s2654_s22 }
  0x9b   : > { %v448_v53 = vpop.permute.xlu2 %447 }
  0xa1   : > { %678 = vrot.lane.b32.xlu0 %v669_v45, %s2655_s23 }
  0xa2   : > { %v390_v46 = vpop.permute.xlu1 %389 }
  0xa3   : > { %v386_v47 = vpop.permute.xlu0 %385  ;;  %v399_v2 = vadd.f32 %v390_v46, %v369_v60  ;;  %v474_v4 = vpop.permute.xlu2 %473 }
  0xa4   : > { %v397_v55 = vadd.f32 %v386_v47, %v367_v52 }
  0xa9   : > { %682 = vrot.lane.b32.xlu0 %v671_v62, %s2655_s23  ;;  %v645_v62 = vmul.f32 %v2855_v40, %v2823_v23 }
  0xaa   : > { %v412_v50 = vpop.permute.xlu1 %411 }
  0xab   : > { %v388_v51 = vpop.permute.xlu0 %387  ;;  %v423_v57 = vadd.f32 %v412_v50, %v397_v55  ;;  %v478_v25 = vpop.permute.xlu2 %477 }
  0xac   : > { %v398_v3 = vadd.f32 %v388_v51, %v368_v61  ;;  %v670_v61 = vmul.f32 %v2848_v37, %v2813_v17 }
  0xad   : > { %v433_v63 = vadd.f32 %v429_v56, %v423_v57 }
  0xae   : > { %v424_v13 = vadd.f32 %v414_v44, %v398_v3 }
  0xaf   : > { %v459_v8 = vadd.f32 %v448_v53, %v433_v63  ;;  %v2914_v63 = vstv %s2277_s14  ;;  %s551_s14 = sld [smem:[#allocation11]] }
  0xb0   : > { %v434_v24 = vadd.f32 %v430_v14, %v424_v13  ;;  %v784_v3 = vmul.f32 %v2914_v63, %v2792_v6  ;;  %v785_v37 = vmul.f32 %v2914_v63, %v2786_v0 }
  0xb1   : > { %v485_v19 = vadd.f32 %v474_v4, %v459_v8 }
  0xb2   : > { %v418_v58 = vpop.permute.xlu1 %417 }
  0xb3   : > { %v416_v59 = vpop.permute.xlu0 %415  ;;  %v2879_v27 = vadd.f32 %v490_v21, %v485_v19  ;;  %v426_v29 = vadd.f32 %v418_v58, %v400_v20 }
  0xb4   : > { %v425_v5 = vadd.f32 %v416_v59, %v399_v2  ;;  %v783_v2 = vmul.f32 %v2914_v63, %v2788_v1 }
  0xb5   : > { %v512_v34 = vmul.f32 %v2879_v27, %v2879_v27  ;;  %v436_v38 = vadd.f32 %v432_v31, %v426_v29  ;;  %v496_v43 = vsel %vm495_vm0, %v2879_v27, 0.0  ;;  %v569_v29 = vstv %s2267_s13 }
  0xb6   : > { %v435_v16 = vadd.f32 %v431_v7, %v425_v5  ;;  %791 = vrot.lane.b32.xlu0 %v783_v2, %s2654_s22  ;;  %v2925_v5 = vstv %s2278_s15  ;;  %v570_v31 = vmul.f32 %v569_v29, %v2788_v1  ;;  %s2290_s15 = sld [smem:[#allocation7 + $0x17]] }
  0xb7   : > { %v516_v49 = vsel %vm495_vm0, %v512_v34, 0.0  ;;  %v809_v7 = vmul.f32 %v2925_v5, %v2788_v1  ;;  %v812_v13 = vmul.f32 %v2925_v5, %v2800_v10 }
  0xba   : > { %v452_v15 = vpop.permute.xlu1 %451 }
  0xbb   : > { %v450_v9 = vpop.permute.xlu0 %449  ;;  %v461_v22 = vadd.f32 %v452_v15, %v435_v16  ;;  %v2936_v15 = vstv %s2280_s16 }
  0xbc   : > { %v460_v26 = vadd.f32 %v450_v9, %v434_v24  ;;  %v810_v9 = vmul.f32 %v2925_v5, %v2792_v6  ;;  %v845_v16 = vmul.f32 %v2936_v15, %v2806_v12  ;;  %v846_v20 = vmul.f32 %v2936_v15, %v2815_v18 }
  0xbd   : > { %v487_v30 = vadd.f32 %v478_v25, %v461_v22  ;;  %v2944_v24 = vstv %s2281_s29 }
  0xbe   : > { %793 = vrot.lane.b32.xlu0 %v784_v3, %s2654_s22  ;;  %v872_v25 = vmul.f32 %v2944_v24, %v2815_v18 }
  0xbf   : > { %v2886_v36 = vadd.f32 %v490_v21, %v487_v30 }
  0xc1   : > { %v514_v48 = vmul.f32 %v2886_v36, %v2886_v36  ;;  %v499_v52 = vsel %vm495_vm0, %v2886_v36, 0.0 }
  0xc2   : > { %v454_v35 = vpop.permute.xlu1 %453 }
  0xc3   : > { %v476_v28 = vpop.permute.xlu0 %475  ;;  %v462_v42 = vadd.f32 %v454_v35, %v436_v38  ;;  %v519_v56 = vsel %vm495_vm0, %v514_v48, 0.0 }
  0xc4   : > { %v486_v32 = vadd.f32 %v476_v28, %v460_v26 }
  0xc6   : > { %v2882_v33 = vadd.f32 %v490_v21, %v486_v32  ;;  %795 = vrot.lane.b32.xlu0 %v785_v37, %s2654_s22  ;;  %v571_v32 = vmul.f32 %v569_v29, %v2792_v6 }
  0xc8   : > { %v513_v39 = vmul.f32 %v2882_v33, %v2882_v33  ;;  %v497_v41 = vsel %vm495_vm0, %v2882_v33, 0.0 }
  0xc9   : > { %v498_v46 = vadd.f32 %v497_v41, %v496_v43  ;;  %v631_v41 = vstv %s2270_s17 }
  0xca   : > { %v517_v44 = vsel %vm495_vm0, %v513_v39, 0.0  ;;  %v619_v22 = vpop.permute.xlu1 %618  ;;  %v632_v43 = vmul.f32 %v631_v41, %v2806_v12  ;;  %v635_v37 = vmul.f32 %v631_v41, %v2823_v23 }
  0xcb   : > { %v480_v45 = vpop.permute.xlu0 %479  ;;  %v518_v50 = vadd.f32 %v517_v44, %v516_v49  ;;  %v500_v53 = vadd.f32 %v499_v52, %v498_v46  ;;  %v573_v44 = vmul.f32 %v569_v29, %v2800_v10  ;;  %v874_v52 = vmul.f32 %v2944_v24, %v2823_v23 }
  0xcc   : > { %v488_v47 = vadd.f32 %v480_v45, %v462_v42  ;;  %v633_v45 = vmul.f32 %v631_v41, %v2815_v18 }
  0xcd   : > { %v520_v58 = vadd.f32 %v519_v56, %v518_v50 }
  0xce   : > { %v2898_v51 = vadd.f32 %v490_v21, %v488_v47  ;;  %817 = vrot.lane.b32.xlu0 %v809_v7, %s2655_s23  ;;  %v595_v21 = vpop.permute.xlu2 %594 }
  0xcf   : > { %v603_v56 = vadd.f32 %v595_v21, %v573_v44 }
  0xd0   : > { %v501_v54 = vsel %vm495_vm0, %v2898_v51, 0.0  ;;  %v515_v55 = vmul.f32 %v2898_v51, %v2898_v51 }
  0xd1   : > { %v502_v57 = vadd.f32 %v501_v54, %v500_v53 }
  0xd2   : > { %v521_v59 = vsel %vm495_vm0, %v515_v55, 0.0  ;;  %v677_v28 = vpop.permute.xlu1 %676  ;;  %v572_v55 = vmul.f32 %v569_v29, %v2786_v0 }
  0xd3   : > { %503 = vadd.xlane.f32.xlu1 %v502_v57  ;;  %v522_v60 = vadd.f32 %v521_v59, %v520_v58  ;;  %v589_v4 = vpop.permute.xlu0 %588 }
  0xd4   : > { %v600_v34 = vadd.f32 %v589_v4, %v570_v31  ;;  %v693_v31 = vstv %s2273_s18  ;;  %s2276_s18 = sld [smem:[#allocation7 + $0xc]] }
  0xd5   : > { %523 = vadd.xlane.f32.xlu2 %v522_v60 }
  0xd6   : > { %819 = vrot.lane.b32.xlu0 %v810_v9, %s2655_s23  ;;  %v655_v30 = vpop.permute.xlu2 %654 }
  0xdb   : > { %v591_v40 = vpop.permute.xlu0 %590 }
  0xdc   : > { %v601_v35 = vadd.f32 %v591_v40, %v571_v32 }
  0xde   : > { %823 = vrot.lane.b32.xlu0 %v812_v13, %s2655_s23 }
  0xe3   : > { %v593_v8 = vpop.permute.xlu0 %592 }
  0xe4   : > { %v602_v2 = vadd.f32 %v593_v8, %v572_v55 }
  0xe6   : > { %853 = vrot.lane.b32.xlu0 %v845_v16, %s2654_s22 }
  0xeb   : > { %v615_v11 = vpop.permute.xlu0 %614 }
  0xec   : > { %680 = vrot.lane.b32.xlu1 %v670_v61, %s2655_s23  ;;  %v626_v47 = vadd.f32 %v615_v11, %v600_v34 }
  0xed   : > { %656 = vrot.lane.b32.xlu2 %v645_v62, %s2654_s22 }
  0xee   : > { %855 = vrot.lane.b32.xlu0 %v846_v20, %s2654_s22  ;;  %v636_v57 = vadd.f32 %v632_v43, %v626_v47  ;;  %v634_v20 = vmul.f32 %v631_v41, %v2813_v17 }
  0xf3   : > { %v617_v14 = vpop.permute.xlu0 %616 }
  0xf4   : > { %v627_v48 = vadd.f32 %v617_v14, %v601_v35  ;;  %v628_v14 = vadd.f32 %v619_v22, %v602_v2 }
  0xf6   : > { %881 = vrot.lane.b32.xlu0 %v872_v25, %s2655_s23  ;;  %v637_v58 = vadd.f32 %v633_v45, %v627_v48  ;;  %v638_v32 = vadd.f32 %v634_v20, %v628_v14 }
  0xfb   : > { %v621_v19 = vpop.permute.xlu0 %620 }
  0xfc   : > { %v629_v3 = vadd.f32 %v621_v19, %v603_v56 }
  0xfe   : > { %885 = vrot.lane.b32.xlu0 %v874_v52, %s2655_s23  ;;  %v639_v29 = vadd.f32 %v635_v37, %v629_v3  ;;  %v847_v3 = vmul.f32 %v2936_v15, %v2813_v17 }
 0x103   : > { %v651_v26 = vpop.permute.xlu0 %650 }
 0x104   : > { %v662_v40 = vadd.f32 %v651_v26, %v636_v57 }
 0x106   : > { %v688_v21 = vadd.f32 %v677_v28, %v662_v40  ;;  %v873_v40 = vmul.f32 %v2944_v24, %v2813_v17 }
 0x108   : > { %v2960_v34 = vadd.f32 %v693_v31, %v688_v21 }
 0x10a   : > { %v714_v22 = vmul.f32 %v2960_v34, %v2960_v34  ;;  %v698_v43 = vsel %vm495_vm0, %v2960_v34, 0.0 }
 0x10b   : > { %v653_v38 = vpop.permute.xlu0 %652 }
 0x10c   : > { %v663_v7 = vadd.f32 %v653_v38, %v637_v58  ;;  %v664_v38 = vadd.f32 %v655_v30, %v638_v32  ;;  %v718_v30 = vsel %vm495_vm0, %v714_v22, 0.0 }
 0x113   : > { %v679_v4 = vpop.permute.xlu0 %678 }
 0x114   : > { %v689_v25 = vadd.f32 %v679_v4, %v663_v7  ;;  %v848_v4 = vmul.f32 %v2936_v15, %v2823_v23 }
 0x116   : > { %v2962_v26 = vadd.f32 %v693_v31, %v689_v25 }
 0x118   : > { %v699_v44 = vsel %vm495_vm0, %v2962_v26, 0.0 }
 0x119   : > { %v700_v47 = vadd.f32 %v699_v44, %v698_v43 }
 0x11b   : > { %v683_v19 = vpop.permute.xlu0 %682 }
 0x128   : > { %v3026_v25 = vpop.permute.xlu0 %791 }
 0x146   : > { %v504_v39 = vpop.xlane.xlu1 %503 }
 0x147   : > { %v505_v42 = vrot.slane %v504_v39, 4 }
 0x148   : > { %v524_v46 = vpop.xlane.xlu2 %523 }
 0x149   : > { %v506_v49 = vadd.f32 %v505_v42, %v504_v39  ;;  %v525_v50 = vrot.slane %v524_v46, 4  ;;  %v715_v39 = vmul.f32 %v2962_v26, %v2962_v26 }
 0x14b   : > { %v526_v53 = vadd.f32 %v525_v50, %v524_v46  ;;  %v507_v54 = vrot.slane %v506_v49, 2  ;;  %v719_v46 = vsel %vm495_vm0, %v715_v39, 0.0 }
 0x14d   : > { %v527_v59 = vrot.slane %v526_v53, 2  ;;  %v508_v60 = vadd.f32 %v507_v54, %v506_v49 }
 0x14f   : > { %v509_v61 = vrot.slane %v508_v60, 1  ;;  %v528_v62 = vadd.f32 %v527_v59, %v526_v53  ;;  %v720_v53 = vadd.f32 %v719_v46, %v718_v30  ;;  %v3052_v30 = vstv %s2290_s15  ;;  %s2275_s15 = sld [smem:[#allocation11 + $0x1]] }
 0x150   : > { %v657_v16 = vpop.permute.xlu2 %656 }
 0x151   : > { %v510_v9 = vadd.f32 %v509_v61, %v508_v60  ;;  %v529_v11 = vrot.slane %v528_v62, 1  ;;  %v665_v8 = vadd.f32 %v657_v16, %v639_v29  ;;  %v786_v60 = vmul.f32 %v2914_v63, %v2800_v10  ;;  %v3028_v29 = vpop.permute.xlu0 %793 }
 0x152   : > { %v811_v61 = vmul.f32 %v2925_v5, %v2786_v0  ;;  %v871_v63 = vmul.f32 %v2944_v24, %v2806_v12 }
 0x153   : > { %2334 = vpush %v510_v9  ;;  %v530_v13 = vadd.f32 %v529_v11, %v528_v62  ;;  %v691_v35 = vadd.f32 %v683_v19, %v665_v8  ;;  %v2993_v62 = vstv %s2286_s20  ;;  %v3021_v11 = vstv %s2287_s10  ;;  %s2279_s20 = sld [smem:[#allocation7 + $0xf]] }
 0x154   : > { %v986_v2 = vmul.f32 %v2993_v62, %v2788_v1  ;;  %v987_v5 = vmul.f32 %v2993_v62, %v2792_v6  ;;  %v988_v7 = vmul.f32 %v2993_v62, %v2786_v0  ;;  %v1012_v14 = vmul.f32 %v3021_v11, %v2788_v1 }
 0x155   : > { %2336 = vpush %v530_v13  ;;  %v2968_v41 = vadd.f32 %v693_v31, %v691_v35  ;;  %v1014_v19 = vmul.f32 %v3021_v11, %v2786_v0  ;;  %v3040_v35 = vstv %s2289_s11  ;;  %s2295_s11 = sld [smem:[#allocation7 + $0x19]] }
 0x156   : > { %994 = vrot.lane.b32.xlu0 %v986_v2, %s2654_s22  ;;  %v1049_v39 = vmul.f32 %v3040_v35, %v2815_v18 }
 0x157   : > { %v717_v50 = vmul.f32 %v2968_v41, %v2968_v41  ;;  %v703_v54 = vsel %vm495_vm0, %v2968_v41, 0.0 }
 0x159   : > { %v723_v58 = vsel %vm495_vm0, %v717_v50, 0.0  ;;  %v3032_v8 = vpop.permute.xlu0 %795 }
 0x15e   : > { %v681_v28 = vpop.permute.xlu1 %680  ;;  %996 = vrot.lane.b32.xlu0 %v987_v5, %s2654_s22 }
 0x15f   : > { %v690_v42 = vadd.f32 %v681_v28, %v664_v38  ;;  %v1048_v38 = vmul.f32 %v3040_v35, %v2806_v12 }
 0x161   : > { %v2974_v45 = vadd.f32 %v693_v31, %v690_v42  ;;  %v1013_v31 = vmul.f32 %v3021_v11, %v2792_v6  ;;  %v3038_v32 = vpop.permute.xlu0 %817 }
 0x163   : > { %v701_v48 = vsel %vm495_vm0, %v2974_v45, 0.0  ;;  %v716_v49 = vmul.f32 %v2974_v45, %v2974_v45 }
 0x164   : > { %v702_v52 = vadd.f32 %v701_v48, %v700_v47 }
 0x165   : > { %v721_v55 = vsel %vm495_vm0, %v716_v49, 0.0  ;;  %v1074_v49 = vmul.f32 %v3052_v30, %v2806_v12 }
 0x166   : > { %v704_v56 = vadd.f32 %v703_v54, %v702_v52  ;;  %v722_v57 = vadd.f32 %v721_v55, %v720_v53  ;;  %998 = vrot.lane.b32.xlu0 %v988_v7, %s2654_s22 }
 0x168   : > { %705 = vadd.xlane.f32.xlu2 %v704_v56  ;;  %v724_v59 = vadd.f32 %v723_v58, %v722_v57 }
 0x169   : > { %v820_v22 = vpop.permute.xlu0 %819 }
 0x16a   : > { %725 = vadd.xlane.f32.xlu1 %v724_v59 }
 0x16e   : > { %1020 = vrot.lane.b32.xlu0 %v1012_v14, %s2655_s23 }
 0x171   : > { %v824_v46 = vpop.permute.xlu0 %823 }
 0x176   : > { %1022 = vrot.lane.b32.xlu0 %v1013_v31, %s2655_s23 }
 0x17e   : > { %1024 = vrot.lane.b32.xlu0 %v1014_v19, %s2655_s23 }
 0x180   : > { %797 = vrot.lane.b32.xlu2 %v786_v60, %s2654_s22  ;;  %v854_v60 = vpop.permute.xlu0 %853 }
 0x183   : > { %821 = vrot.lane.b32.xlu1 %v811_v61, %s2655_s23 }
 0x184   : > { %s2335_s21 = spop %2334 }
 0x185   : > { %s3001_s25 = smul.f32 0.002232143, %s2335_s21  ;;  %s2282_s21 = sld [smem:[#allocation8 + $0x2]] }
 0x186   : > { %s2337_s26 = spop %2336  ;;  %1056 = vrot.lane.b32.xlu0 %v1048_v38, %s2654_s22 }
 0x187   : > { %s534_s30 = smul.f32 %s3001_s25, %s3001_s25 }
 0x188   : > { %s533_s27 = smul.f32 0.002232143, %s2337_s26  ;;  %857 = vrot.lane.b32.xlu2 %v847_v3, %s2654_s22 }
 0x18a   : > { %s535_s8 = ssub.f32 %s533_s27, %s534_s30 }
 0x18b   : > { %879 = vrot.lane.b32.xlu1 %v871_v63, %s2655_s23 }
 0x18c   : > { %s537_s9 = sadd.f32 1e-05, %s535_s8 }
 0x18e   : > { %v538_v37 = vstv %s537_s9  ;;  %1058 = vrot.lane.b32.xlu0 %v1049_v39, %s2654_s22 }
 0x18f   : > { %2465 = vrsqrt.f32 %v538_v37  ;;  %vm545_vm2 = vweird.f32 %v538_v37 }
 0x190   : > { %859 = vrot.lane.b32.xlu2 %v848_v4, %s2654_s22 }
 0x193   : > { %883 = vrot.lane.b32.xlu1 %v873_v40, %s2655_s23 }
 0x195   : > { %v2466_v9 = vpop.eup %2465 }
 0x196   : > { %v540_v15 = vmul.f32 %v2466_v9, %v538_v37  ;;  %vm546_vm1 = vweird.f32 %v2466_v9  ;;  %1082 = vrot.lane.b32.xlu0 %v1074_v49, %s2655_s23  ;;  %v772_v37 = vstv %s2276_s18  ;;  %s2298_s18 = sld [smem:[#allocation7 + $0x1c]] }
 0x197   : > { %vm547_vm3 = vmor %vm545_vm2, %vm546_vm1  ;;  %v774_v40 = vmul.f32 %v772_v37, %v2792_v6  ;;  %v773_v7 = vmul.f32 %v772_v37, %v2788_v1  ;;  %v776_v14 = vmul.f32 %v772_v37, %v2800_v10 }
 0x198   : > { %v541_v13 = vmul.f32 %v2466_v9, %v540_v15 }
 0x199   : > { %v804_v15 = vadd.f32 %v3028_v29, %v774_v40 }
 0x19a   : > { %v542_v16 = vmul.f32 0.5, %v541_v13  ;;  %v803_v13 = vadd.f32 %v3026_v25, %v773_v7 }
 0x19c   : > { %v543_v20 = vsub.f32 1.5, %v542_v16  ;;  %v834_v16 = vstv %s2279_s20  ;;  %v829_v31 = vadd.f32 %v3038_v32, %v803_v13  ;;  %s2299_s20 = sld [smem:[#allocation7 + $0x1d]] }
 0x19d   : > { %v835_v19 = vmul.f32 %v834_v16, %v2806_v12  ;;  %v837_v32 = vmul.f32 %v834_v16, %v2813_v17 }
 0x19e   : > { %v544_v24 = vmul.f32 %v2466_v9, %v543_v20 }
 0x1a0   : > { %v548_v21 = vsel %vm547_vm3, %v2466_v9, %v544_v24  ;;  %v856_v9 = vpop.permute.xlu0 %855  ;;  %v830_v24 = vadd.f32 %v820_v22, %v804_v15 }
 0x1a1   : > { %2338 = vpush %v548_v21  ;;  %v836_v21 = vmul.f32 %v834_v16, %v2815_v18 }
 0x1a8   : > { %v882_v29 = vpop.permute.xlu0 %881 }
 0x1d2   : > { %s2339_s16 = spop %2338 }
 0x1d3   : > { %s550_s29 = smul.f32 %s2339_s16, %s536_s12  ;;  %s2296_s12 = sld [smem:[#allocation7 + $0x1a]] }
 0x1d5   : > { %s552_s13 = smul.f32 %s550_s29, %s3001_s25  ;;  %v554_v28 = vstv %s550_s29 }
 0x1d6   : > { %v555_v42 = vmul.f32 %v554_v28, %v2879_v27  ;;  %v556_v43 = vmul.f32 %v554_v28, %v2882_v33  ;;  %v557_v44 = vmul.f32 %v554_v28, %v2886_v36  ;;  %v558_v47 = vmul.f32 %v554_v28, %v2898_v51 }
 0x1d7   : > { %s553_s17 = ssub.f32 %s551_s14, %s552_s13  ;;  %v775_v28 = vmul.f32 %v772_v37, %v2786_v0 }
 0x1d8   : > { %s2274_s14 = sld [smem:[#allocation9 + $0x1]] }
 0x1d9   : > { %v559_v48 = vstv %s553_s17 }
 0x1da   : > { %v560_v50 = vadd.f32 %v559_v48, %v555_v42  ;;  %v561_v52 = vadd.f32 %v559_v48, %v556_v43  ;;  %v562_v53 = vadd.f32 %v559_v48, %v557_v44  ;;  %v563_v54 = vadd.f32 %v559_v48, %v558_v47 }
 0x1db   : > { %v706_v55 = vpop.xlane.xlu2 %705  ;;  %v840_v42 = vadd.f32 %v836_v21, %v830_v24  ;;  %v839_v43 = vadd.f32 %v835_v19, %v829_v31  ;;  %v838_v44 = vmul.f32 %v834_v16, %v2823_v23  ;;  %v805_v47 = vadd.f32 %v3032_v8, %v775_v28 }
 0x1dc   : > { %564 = vst.msk [vmem:[#allocation2] sm:$0xff] %vm495_vm0, %v560_v50  ;;  %v707_v27 = vrot.slane %v706_v55, 4  ;;  %v989_v28 = vmul.f32 %v2993_v62, %v2800_v10 }
 0x1dd   : > { %565 = vst.msk [vmem:[#allocation2 + $0x8] sm:$0xff] %vm495_vm0, %v561_v52  ;;  %v726_v33 = vpop.xlane.xlu1 %725  ;;  %v866_v22 = vadd.f32 %v856_v9, %v840_v42  ;;  %v865_v49 = vadd.f32 %v854_v60, %v839_v43  ;;  %v1015_v42 = vmul.f32 %v3021_v11, %v2800_v10  ;;  %v1051_v11 = vmul.f32 %v3040_v35, %v2823_v23 }
 0x1de   : > { %566 = vst.msk [vmem:[#allocation2 + $0x10] sm:$0xff] %vm495_vm0, %v562_v53  ;;  %v708_v36 = vadd.f32 %v707_v27, %v706_v55  ;;  %v727_v51 = vrot.slane %v726_v33, 4 }
 0x1df   : > { %567 = vst.msk [vmem:[#allocation2 + $0x18] sm:$0xff] %vm495_vm0, %v563_v54  ;;  %v892_v54 = vadd.f32 %v882_v29, %v866_v22 }
 0x1e0   : > { %v709_v56 = vrot.slane %v708_v36, 2  ;;  %v728_v57 = vadd.f32 %v727_v51, %v726_v33  ;;  %v896_v33 = vstv %s2282_s21  ;;  %s2285_s21 = sld [smem:[#allocation7 + $0x12]] }
 0x1e2   : > { %v729_v58 = vrot.slane %v728_v57, 2  ;;  %v710_v59 = vadd.f32 %v709_v56, %v708_v36  ;;  %v886_v36 = vpop.permute.xlu0 %885 }
 0x1e3   : > { %v798_v5 = vpop.permute.xlu2 %797 }
 0x1e4   : > { %v711_v61 = vrot.slane %v710_v59, 1  ;;  %v730_v2 = vadd.f32 %v729_v58, %v728_v57  ;;  %v806_v38 = vadd.f32 %v798_v5, %v776_v14 }
 0x1e6   : > { %v712_v3 = vadd.f32 %v711_v61, %v710_v59  ;;  %v731_v63 = vrot.slane %v730_v2, 1  ;;  %v832_v25 = vadd.f32 %v824_v46, %v806_v38  ;;  %v3076_v46 = vadd.f32 %v896_v33, %v892_v54 }
 0x1e7   : > { %v1076_v59 = vmul.f32 %v3052_v30, %v2813_v17 }
 0x1e8   : > { %2340 = vpush %v712_v3  ;;  %v732_v4 = vadd.f32 %v731_v63, %v730_v2  ;;  %v842_v50 = vadd.f32 %v838_v44, %v832_v25  ;;  %v918_v61 = vmul.f32 %v3076_v46, %v3076_v46  ;;  %v1050_v25 = vmul.f32 %v3040_v35, %v2813_v17 }
 0x1e9   : > { %1086 = vrot.lane.b32.xlu0 %v1076_v59, %s2655_s23  ;;  %v1077_v17 = vmul.f32 %v3052_v30, %v2823_v23 }
 0x1ea   : > { %2342 = vpush %v732_v4  ;;  %v902_v4 = vsel %vm495_vm0, %v3076_v46, 0.0  ;;  %v922_v13 = vsel %vm495_vm0, %v918_v61, 0.0 }
 0x1eb   : > { %v858_v20 = vpop.permute.xlu2 %857 }
 0x1f3   : > { %v860_v48 = vpop.permute.xlu2 %859 }
 0x1f4   : > { %v868_v55 = vadd.f32 %v860_v48, %v842_v50 }
 0x1f5   : > { %v822_v39 = vpop.permute.xlu1 %821 }
 0x1f6   : > { %v831_v52 = vadd.f32 %v822_v39, %v805_v47  ;;  %v894_v57 = vadd.f32 %v886_v36, %v868_v55  ;;  %v1075_v47 = vmul.f32 %v3052_v30, %v2815_v18 }
 0x1f8   : > { %v841_v51 = vadd.f32 %v837_v32, %v831_v52  ;;  %v3084_v2 = vadd.f32 %v896_v33, %v894_v57  ;;  %v3132_v32 = vpop.permute.xlu0 %994  ;;  %v3142_v52 = vstv %s2296_s12 }
 0x1f9   : > { %v1216_v55 = vmul.f32 %v3142_v52, %v2792_v6 }
 0x1fa   : > { %v867_v58 = vadd.f32 %v858_v20, %v841_v51  ;;  %v920_v15 = vmul.f32 %v3084_v2, %v3084_v2  ;;  %v906_v20 = vsel %vm495_vm0, %v3084_v2, 0.0 }
 0x1fc   : > { %v926_v19 = vsel %vm495_vm0, %v920_v15, 0.0 }
 0x1fd   : > { %v880_v53 = vpop.permute.xlu1 %879 }
 0x1fe   : > { %v891_v27 = vadd.f32 %v880_v53, %v865_v49  ;;  %v3127_v49 = vstv %s2295_s11  ;;  %v1215_v53 = vmul.f32 %v3142_v52, %v2788_v1 }
 0x1ff   : > { %v1189_v50 = vmul.f32 %v3127_v49, %v2788_v1  ;;  %v1190_v35 = vmul.f32 %v3127_v49, %v2792_v6  ;;  %v1191_v30 = vmul.f32 %v3127_v49, %v2786_v0  ;;  %v1217_v1 = vmul.f32 %v3142_v52, %v2786_v0 }
 0x200   : > { %v3074_v56 = vadd.f32 %v896_v33, %v891_v27  ;;  %v3137_v23 = vpop.permute.xlu0 %996  ;;  %v3166_v0 = vstv %s2298_s18 }
 0x202   : > { %v917_v8 = vmul.f32 %v3074_v56, %v3074_v56  ;;  %v901_v63 = vsel %vm495_vm0, %v3074_v56, 0.0 }
 0x203   : > { %v903_v40 = vadd.f32 %v902_v4, %v901_v63 }
 0x204   : > { %v921_v37 = vsel %vm495_vm0, %v917_v8, 0.0 }
 0x205   : > { %v884_v60 = vpop.permute.xlu1 %883  ;;  %v923_v16 = vadd.f32 %v922_v13, %v921_v37 }
 0x206   : > { %v893_v3 = vadd.f32 %v884_v60, %v867_v58 }
 0x208   : > { %v3089_v5 = vadd.f32 %v896_v33, %v893_v3  ;;  %v3146_v54 = vpop.permute.xlu0 %998 }
 0x20a   : > { %v904_v7 = vsel %vm495_vm0, %v3089_v5, 0.0  ;;  %v919_v9 = vmul.f32 %v3089_v5, %v3089_v5 }
 0x20b   : > { %v905_v14 = vadd.f32 %v904_v7, %v903_v40 }
 0x20c   : > { %v924_v24 = vsel %vm495_vm0, %v919_v9, 0.0 }
 0x20d   : > { %v907_v21 = vadd.f32 %v906_v20, %v905_v14  ;;  %v925_v31 = vadd.f32 %v924_v24, %v923_v16  ;;  %v975_v20 = vstv %s2285_s21 }
 0x20f   : > { %908 = vadd.xlane.f32.xlu2 %v907_v21  ;;  %v927_v38 = vadd.f32 %v926_v19, %v925_v31  ;;  %v3179_v31 = vld [vmem:[#allocation3] sm:$0xff] }
 0x210   : > { %v3151_v27 = vpop.permute.xlu0 %1020  ;;  %v976_v19 = vmul.f32 %v3179_v31, %v975_v20 }
 0x211   : > { %928 = vadd.xlane.f32.xlu1 %v927_v38 }
 0x218   : > { %v1023_v3 = vpop.permute.xlu0 %1022 }
 0x219   : > { %s2341_s25 = spop %2340 }
 0x21a   : > { %s3105_s26 = smul.f32 0.002232143, %s2341_s25  ;;  %s2288_s25 = sld [smem:[#allocation7 + $0x15]] }
 0x21b   : > { %s2343_s30 = spop %2342 }
 0x21c   : > { %s736_s27 = smul.f32 %s3105_s26, %s3105_s26 }
 0x21d   : > { %s735_s8 = smul.f32 0.002232143, %s2343_s30  ;;  %s2304_s30 = sld [smem:[#allocation7 + $0x1f]] }
 0x21f   : > { %s737_s9 = ssub.f32 %s735_s8, %s736_s27 }
 0x221   : > { %s739_s10 = sadd.f32 1e-05, %s737_s9 }
 0x223   : > { %v740_v39 = vstv %s739_s10 }
 0x224   : > { %2467 = vrsqrt.f32 %v740_v39  ;;  %vm747_vm5 = vweird.f32 %v740_v39 }
 0x227   : > { %1000 = vrot.lane.b32.xlu2 %v989_v28, %s2654_s22 }
 0x22a   : > { %v2468_v29 = vpop.eup %2467  ;;  %1026 = vrot.lane.b32.xlu1 %v1015_v42, %s2655_s23  ;;  %v1006_v42 = vadd.f32 %v3132_v32, %v976_v19  ;;  %v3195_v32 = vld [vmem:[#allocation3 + $0x18] sm:$0xff] }
 0x22b   : > { %v742_v43 = vmul.f32 %v2468_v29, %v740_v39  ;;  %vm748_vm4 = vweird.f32 %v2468_v29 }
 0x22c   : > { %vm749_vm6 = vmor %vm747_vm5, %vm748_vm4 }
 0x22d   : > { %v743_v44 = vmul.f32 %v2468_v29, %v742_v43  ;;  %v3183_v43 = vld [vmem:[#allocation3 + $0x8] sm:$0xff] }
 0x22f   : > { %v744_v22 = vmul.f32 0.5, %v743_v44  ;;  %1060 = vrot.lane.b32.xlu2 %v1050_v25, %s2654_s22  ;;  %v977_v25 = vmul.f32 %v3183_v43, %v975_v20  ;;  %v3186_v44 = vld [vmem:[#allocation3 + $0x20] sm:$0xff] }
 0x231   : > { %v745_v62 = vsub.f32 1.5, %v744_v22 }
 0x232   : > { %1084 = vrot.lane.b32.xlu1 %v1075_v47, %s2655_s23  ;;  %v978_v47 = vmul.f32 %v3186_v44, %v975_v20 }
 0x233   : > { %v746_v10 = vmul.f32 %v2468_v29, %v745_v62  ;;  %v1032_v62 = vadd.f32 %v3151_v27, %v1006_v42 }
 0x235   : > { %v750_v48 = vsel %vm749_vm6, %v2468_v29, %v746_v10  ;;  %v1037_v29 = vstv %s2288_s25  ;;  %v3190_v10 = vld [vmem:[#allocation3 + $0x10] sm:$0xff]  ;;  %s2308_s25 = sld [smem:[#allocation7 + $0x23]] }
 0x236   : > { %2344 = vpush %v750_v48  ;;  %v1007_v48 = vadd.f32 %v3137_v23, %v977_v25 }
 0x237   : > { %1062 = vrot.lane.b32.xlu2 %v1051_v11, %s2654_s22  ;;  %v1038_v11 = vmul.f32 %v3190_v10, %v1037_v29 }
 0x23a   : > { %1088 = vrot.lane.b32.xlu1 %v1077_v17, %s2655_s23  ;;  %v1008_v17 = vadd.f32 %v3146_v54, %v978_v47 }
 0x242   : > { %1197 = vrot.lane.b32.xlu1 %v1189_v50, %s2654_s22  ;;  %v1042_v50 = vadd.f32 %v1038_v11, %v1032_v62 }
 0x24a   : > { %1199 = vrot.lane.b32.xlu1 %v1190_v35, %s2654_s22  ;;  %v1039_v35 = vmul.f32 %v3195_v32, %v1037_v29 }
 0x252   : > { %1201 = vrot.lane.b32.xlu1 %v1191_v30, %s2654_s22 }
 0x25a   : > { %1223 = vrot.lane.b32.xlu1 %v1215_v53, %s2655_s23  ;;  %v1033_v53 = vadd.f32 %v1023_v3, %v1007_v48 }
 0x262   : > { %1225 = vrot.lane.b32.xlu1 %v1216_v55, %s2655_s23 }
 0x267   : > { %s2345_s16 = spop %2344 }
 0x268   : > { %s752_s29 = smul.f32 %s2345_s16, %s2274_s14  ;;  %s2283_s16 = sld [smem:[#allocation9 + $0x2]] }
 0x26a   : > { %s754_s13 = smul.f32 %s752_s29, %s3105_s26  ;;  %v756_v33 = vstv %s752_s29  ;;  %1227 = vrot.lane.b32.xlu1 %v1217_v1, %s2655_s23  ;;  %s2291_s26 = sld [smem:[#allocation8 + $0x3]]  ;;  %v3201_v1 = vld [vmem:[#allocation3 + $0x30] sm:$0xff] }
 0x26b   : > { %v757_v36 = vmul.f32 %v756_v33, %v2960_v34  ;;  %v758_v51 = vmul.f32 %v756_v33, %v2962_v26  ;;  %v759_v57 = vmul.f32 %v756_v33, %v2974_v45  ;;  %v760_v6 = vmul.f32 %v756_v33, %v2968_v41  ;;  %v1025_v26 = vpop.permute.xlu0 %1024  ;;  %v3198_v33 = vld [vmem:[#allocation3 + $0x28] sm:$0xff]  ;;  %s2284_s29 = sld [smem:[#allocation11 + $0x2]] }
 0x26c   : > { %s755_s17 = ssub.f32 %s2275_s15, %s754_s13  ;;  %v1251_v34 = vmul.f32 %v3166_v0, %v2806_v12  ;;  %v1252_v41 = vmul.f32 %v3166_v0, %v2815_v18  ;;  %v3174_v45 = vstv %s2299_s20  ;;  %v1034_v55 = vadd.f32 %v1025_v26, %v1008_v17  ;;  %v3204_v26 = vld [vmem:[#allocation3 + $0x38] sm:$0xff] }
 0x26d   : > { %v1278_v40 = vmul.f32 %v3174_v45, %v2815_v18  ;;  %v979_v27 = vmul.f32 %v3198_v33, %v975_v20  ;;  %s2305_s15 = sld [smem:[#allocation7 + $0x20]] }
 0x26e   : > { %v761_v8 = vstv %s755_s17  ;;  %s2307_s13 = sld [smem:[#allocation7 + $0x22]] }
 0x26f   : > { %v762_v58 = vadd.f32 %v761_v8, %v757_v36  ;;  %v763_v59 = vadd.f32 %v761_v8, %v758_v51  ;;  %v764_v60 = vadd.f32 %v761_v8, %v759_v57  ;;  %v765_v61 = vadd.f32 %v761_v8, %v760_v6 }
 0x270   : > { %v1040_v36 = vmul.f32 %v3201_v1, %v1037_v29  ;;  %v1043_v57 = vadd.f32 %v1039_v35, %v1033_v53  ;;  %v3242_v53 = vstv %s2304_s30  ;;  %s2297_s30 = sld [smem:[#allocation7 + $0x1b]] }
 0x271   : > { %767 = vst.msk [vmem:[#allocation2 + $0x20] sm:$0xff] %vm495_vm0, %v762_v58 }
 0x272   : > { %768 = vst.msk [vmem:[#allocation2 + $0x28] sm:$0xff] %vm495_vm0, %v763_v59  ;;  %1259 = vrot.lane.b32.xlu1 %v1251_v34, %s2654_s22  ;;  %v1044_v8 = vadd.f32 %v1040_v36, %v1034_v55  ;;  %v1392_v55 = vmul.f32 %v3179_v31, %v3242_v53  ;;  %v1192_v36 = vmul.f32 %v3198_v33, %v3127_v49 }
 0x273   : > { %769 = vst.msk [vmem:[#allocation2 + $0x30] sm:$0xff] %vm495_vm0, %v764_v60  ;;  %v1057_v9 = vpop.permute.xlu0 %1056  ;;  %v1099_v60 = vstv %s2291_s26  ;;  %v1279_v49 = vmul.f32 %v3201_v1, %v3174_v45  ;;  %s2294_s26 = sld [smem:[#allocation7 + $0x18]] }
 0x274   : > { %770 = vst.msk [vmem:[#allocation2 + $0x38] sm:$0xff] %vm495_vm0, %v765_v61  ;;  %v1068_v51 = vadd.f32 %v1057_v9, %v1042_v50  ;;  %v1280_v50 = vmul.f32 %v3204_v26, %v3174_v45 }
 0x27a   : > { %1261 = vrot.lane.b32.xlu1 %v1252_v41, %s2654_s22  ;;  %v1041_v41 = vmul.f32 %v3204_v26, %v1037_v29 }
 0x27b   : > { %v1059_v28 = vpop.permute.xlu0 %1058 }
 0x27c   : > { %v1069_v3 = vadd.f32 %v1059_v28, %v1043_v57 }
 0x282   : > { %v909_v63 = vpop.xlane.xlu2 %908  ;;  %1287 = vrot.lane.b32.xlu1 %v1278_v40, %s2655_s23 }
 0x283   : > { %v910_v4 = vrot.slane %v909_v63, 4  ;;  %v1083_v30 = vpop.permute.xlu0 %1082 }
 0x284   : > { %v929_v37 = vpop.xlane.xlu1 %928  ;;  %v1094_v58 = vadd.f32 %v1083_v30, %v1068_v51  ;;  %v1277_v51 = vmul.f32 %v3190_v10, %v3174_v45  ;;  %v1393_v45 = vmul.f32 %v3183_v43, %v3242_v53 }
 0x285   : > { %v911_v7 = vadd.f32 %v910_v4, %v909_v63  ;;  %v930_v12 = vrot.slane %v929_v37, 4 }
 0x286   : > { %v3207_v4 = vadd.f32 %v1099_v60, %v1094_v58 }
 0x287   : > { %v912_v15 = vrot.slane %v911_v7, 2  ;;  %v931_v13 = vadd.f32 %v930_v12, %v929_v37 }
 0x289   : > { %v932_v14 = vrot.slane %v931_v13, 2  ;;  %v913_v16 = vadd.f32 %v912_v15, %v911_v7  ;;  %v1120_v15 = vmul.f32 %v3207_v4, %v3207_v4 }
 0x28a   : > { %v1001_v22 = vpop.permute.xlu2 %1000  ;;  %1291 = vrot.lane.b32.xlu1 %v1280_v50, %s2655_s23 }
 0x28b   : > { %v914_v24 = vrot.slane %v913_v16, 1  ;;  %v933_v21 = vadd.f32 %v932_v14, %v931_v13  ;;  %v1009_v6 = vadd.f32 %v1001_v22, %v979_v27  ;;  %v1087_v61 = vpop.permute.xlu0 %1086  ;;  %v1124_v28 = vsel %vm495_vm0, %v1120_v15, 0.0 }
 0x28c   : > { %v1218_v27 = vmul.f32 %v3198_v33, %v3142_v52 }
 0x28d   : > { %v915_v38 = vadd.f32 %v914_v24, %v913_v16  ;;  %v934_v39 = vrot.slane %v933_v21, 1  ;;  %v1104_v24 = vsel %vm495_vm0, %v3207_v4, 0.0 }
 0x28f   : > { %2346 = vpush %v915_v38  ;;  %v935_v18 = vadd.f32 %v934_v39, %v933_v21 }
 0x291   : > { %2348 = vpush %v935_v18 }
 0x292   : > { %v1061_v54 = vpop.permute.xlu2 %1060  ;;  %1400 = vrot.lane.b32.xlu1 %v1392_v55, %s2654_s22 }
 0x293   : > { %v1070_v59 = vadd.f32 %v1061_v54, %v1044_v8  ;;  %v1253_v54 = vmul.f32 %v3201_v1, %v3166_v0 }
 0x295   : > { %v1096_v37 = vadd.f32 %v1087_v61, %v1070_v59  ;;  %v1254_v59 = vmul.f32 %v3204_v26, %v3166_v0  ;;  %v1394_v0 = vmul.f32 %v3186_v44, %v3242_v53 }
 0x297   : > { %v3213_v13 = vadd.f32 %v1099_v60, %v1096_v37 }
 0x299   : > { %v1122_v18 = vmul.f32 %v3213_v13, %v3213_v13  ;;  %v1107_v25 = vsel %vm495_vm0, %v3213_v13, 0.0 }
 0x29a   : > { %v1063_v9 = vpop.permute.xlu2 %1062  ;;  %1402 = vrot.lane.b32.xlu1 %v1393_v45, %s2654_s22 }
 0x29b   : > { %v1127_v11 = vsel %vm495_vm0, %v1122_v18, 0.0 }
 0x29c   : > { %v1027_v23 = vpop.permute.xlu1 %1026 }
 0x29d   : > { %v1035_v34 = vadd.f32 %v1027_v23, %v1009_v6 }
 0x29f   : > { %v1045_v7 = vadd.f32 %v1041_v41, %v1035_v34  ;;  %v3275_v41 = vstv %s2305_s15 }
 0x2a1   : > { %v1071_v20 = vadd.f32 %v1063_v9, %v1045_v7  ;;  %v1421_v9 = vmul.f32 %v3198_v33, %v3275_v41 }
 0x2a2   : > { %1404 = vrot.lane.b32.xlu1 %v1394_v0, %s2654_s22 }
 0x2a4   : > { %v1085_v63 = vpop.permute.xlu1 %1084 }
 0x2a5   : > { %v1095_v40 = vadd.f32 %v1085_v63, %v1069_v3  ;;  %v1418_v63 = vmul.f32 %v3179_v31, %v3275_v41 }
 0x2a7   : > { %v3209_v12 = vadd.f32 %v1099_v60, %v1095_v40  ;;  %v1419_v40 = vmul.f32 %v3183_v43, %v3275_v41 }
 0x2a9   : > { %v1121_v14 = vmul.f32 %v3209_v12, %v3209_v12  ;;  %v1105_v16 = vsel %vm495_vm0, %v3209_v12, 0.0 }
 0x2aa   : > { %v1106_v38 = vadd.f32 %v1105_v16, %v1104_v24  ;;  %1426 = vrot.lane.b32.xlu1 %v1418_v63, %s2655_s23  ;;  %v3294_v24 = vstv %s2307_s13  ;;  %s2292_s13 = sld [smem:[#allocation9 + $0x3]] }
 0x2ab   : > { %v1125_v21 = vsel %vm495_vm0, %v1121_v14, 0.0 }
 0x2ac   : > { %v1089_v19 = vpop.permute.xlu1 %1088  ;;  %v1126_v42 = vadd.f32 %v1125_v21, %v1124_v28  ;;  %v1108_v47 = vadd.f32 %v1107_v25, %v1106_v38 }
 0x2ad   : > { %v1097_v39 = vadd.f32 %v1089_v19, %v1071_v20 }
 0x2ae   : > { %v1128_v17 = vadd.f32 %v1127_v11, %v1126_v42  ;;  %v1454_v42 = vmul.f32 %v3190_v10, %v3294_v24 }
 0x2af   : > { %v3225_v29 = vadd.f32 %v1099_v60, %v1097_v39 }
 0x2b1   : > { %v1109_v22 = vsel %vm495_vm0, %v3225_v29, 0.0  ;;  %v1123_v62 = vmul.f32 %v3225_v29, %v3225_v29 }
 0x2b2   : > { %v1110_v48 = vadd.f32 %v1109_v22, %v1108_v47  ;;  %1428 = vrot.lane.b32.xlu1 %v1419_v40, %s2655_s23 }
 0x2b3   : > { %v1129_v35 = vsel %vm495_vm0, %v1123_v62, 0.0 }
 0x2b4   : > { %1111 = vadd.xlane.f32.xlu2 %v1110_v48  ;;  %v1130_v30 = vadd.f32 %v1129_v35, %v1128_v17  ;;  %v3265_v3 = vpop.permute.xlu1 %1197 }
 0x2b6   : > { %1131 = vadd.xlane.f32.xlu0 %v1130_v30 }
 0x2ba   : > { %1432 = vrot.lane.b32.xlu1 %v1421_v9, %s2655_s23 }
 0x2bc   : > { %v3270_v34 = vpop.permute.xlu1 %1199 }
 0x2c0   : > { %s2347_s27 = spop %2346 }
 0x2c1   : > { %s3238_s8 = smul.f32 0.002232143, %s2347_s27  ;;  %s2300_s27 = sld [smem:[#allocation8 + $0x4]] }
 0x2c2   : > { %s2349_s9 = spop %2348  ;;  %1462 = vrot.lane.b32.xlu1 %v1454_v42, %s2654_s22 }
 0x2c3   : > { %s939_s10 = smul.f32 %s3238_s8, %s3238_s8 }
 0x2c4   : > { %s938_s11 = smul.f32 0.002232143, %s2349_s9  ;;  %v3279_v37 = vpop.permute.xlu1 %1201 }
 0x2c6   : > { %s940_s12 = ssub.f32 %s938_s11, %s939_s10 }
 0x2c8   : > { %s942_s14 = sadd.f32 1e-05, %s940_s12 }
 0x2ca   : > { %v943_v23 = vstv %s942_s14  ;;  %1229 = vrot.lane.b32.xlu0 %v1218_v27, %s2655_s23 }
 0x2cb   : > { %2469 = vrsqrt.f32 %v943_v23  ;;  %vm950_vm8 = vweird.f32 %v943_v23 }
 0x2cc   : > { %1203 = vrot.lane.b32.xlu2 %v1192_v36, %s2654_s22  ;;  %v3285_v7 = vpop.permute.xlu1 %1223  ;;  %v1178_v36 = vstv %s2294_s26 }
 0x2d1   : > { %v2470_v57 = vpop.eup %2469 }
 0x2d2   : > { %v945_v52 = vmul.f32 %v2470_v57, %v943_v23  ;;  %1285 = vrot.lane.b32.xlu0 %v1277_v51, %s2655_s23  ;;  %vm951_vm7 = vweird.f32 %v2470_v57 }
 0x2d3   : > { %vm952_vm9 = vmor %vm950_vm8, %vm951_vm7 }
 0x2d4   : > { %v946_v6 = vmul.f32 %v2470_v57, %v945_v52  ;;  %1263 = vrot.lane.b32.xlu2 %v1253_v54, %s2654_s22  ;;  %v1226_v38 = vpop.permute.xlu1 %1225  ;;  %v1180_v54 = vmul.f32 %v3183_v43, %v1178_v36 }
 0x2d6   : > { %v947_v8 = vmul.f32 0.5, %v946_v6  ;;  %v1179_v6 = vmul.f32 %v3179_v31, %v1178_v36 }
 0x2d8   : > { %v948_v58 = vsub.f32 1.5, %v947_v8 }
 0x2da   : > { %1289 = vrot.lane.b32.xlu0 %v1279_v49, %s2655_s23  ;;  %v949_v60 = vmul.f32 %v2470_v57, %v948_v58  ;;  %v1210_v58 = vadd.f32 %v3270_v34, %v1180_v54 }
 0x2dc   : > { %v953_v61 = vsel %vm952_vm9, %v2470_v57, %v949_v60  ;;  %1265 = vrot.lane.b32.xlu2 %v1254_v59, %s2654_s22  ;;  %v1182_v59 = vmul.f32 %v3198_v33, %v1178_v36  ;;  %v1209_v60 = vadd.f32 %v3265_v3, %v1179_v6  ;;  %v1236_v0 = vadd.f32 %v1226_v38, %v1210_v58 }
 0x2dd   : > { %2350 = vpush %v953_v61  ;;  %v1240_v61 = vstv %s2297_s30  ;;  %s2317_s30 = sld [smem:[#allocation7 + $0x29]] }
 0x2de   : > { %v1242_v63 = vmul.f32 %v3195_v32, %v1240_v61  ;;  %v1235_v9 = vadd.f32 %v3285_v7, %v1209_v60 }
 0x30e   : > { %s2351_s17 = spop %2350 }
 0x30f   : > { %s955_s18 = smul.f32 %s2351_s17, %s2283_s16  ;;  %s2316_s17 = sld [smem:[#allocation7 + $0x28]] }
 0x311   : > { %s957_s20 = smul.f32 %s955_s18, %s3238_s8  ;;  %v959_v15 = vstv %s955_s18  ;;  %s2313_s8 = sld [smem:[#allocation7 + $0x25]] }
 0x312   : > { %v960_v14 = vmul.f32 %v959_v15, %v3074_v56  ;;  %v961_v16 = vmul.f32 %v959_v15, %v3076_v46  ;;  %v962_v20 = vmul.f32 %v959_v15, %v3089_v5  ;;  %v963_v21 = vmul.f32 %v959_v15, %v3084_v2  ;;  %v1228_v46 = vpop.permute.xlu1 %1227  ;;  %s2293_s18 = sld [smem:[#allocation11 + $0x3]] }
 0x313   : > { %s958_s21 = ssub.f32 %s2284_s29, %s957_s20  ;;  %v1455_v56 = vmul.f32 %v3195_v32, %v3294_v24  ;;  %v3307_v5 = vstv %s2308_s25  ;;  %v1241_v15 = vmul.f32 %v3190_v10, %v1240_v61 }
 0x314   : > { %v1481_v22 = vmul.f32 %v3195_v32, %v3307_v5  ;;  %s2314_s29 = sld [smem:[#allocation7 + $0x26]] }
 0x315   : > { %v964_v19 = vstv %s958_s21  ;;  %1464 = vrot.lane.b32.xlu1 %v1455_v56, %s2654_s22  ;;  %v1245_v3 = vadd.f32 %v1241_v15, %v1235_v9  ;;  %v1483_v15 = vmul.f32 %v3204_v26, %v3307_v5 }
 0x316   : > { %v965_v39 = vadd.f32 %v964_v19, %v960_v14  ;;  %v966_v18 = vadd.f32 %v964_v19, %v961_v16  ;;  %v967_v28 = vadd.f32 %v964_v19, %v962_v20  ;;  %v968_v25 = vadd.f32 %v964_v19, %v963_v21 }
 0x317   : > { %v1181_v14 = vmul.f32 %v3186_v44, %v1178_v36  ;;  %v1246_v20 = vadd.f32 %v1242_v63, %v1236_v0  ;;  %v1244_v21 = vmul.f32 %v3204_v26, %v1240_v61 }
 0x318   : > { %970 = vst.msk [vmem:[#allocation2 + $0x40] sm:$0xff] %vm495_vm0, %v965_v39 }
 0x319   : > { %971 = vst.msk [vmem:[#allocation2 + $0x48] sm:$0xff] %vm495_vm0, %v966_v18  ;;  %v1211_v39 = vadd.f32 %v3279_v37, %v1181_v14  ;;  %v3355_v14 = vstv %s2313_s8  ;;  %s2306_s8 = sld [smem:[#allocation7 + $0x21]] }
 0x31a   : > { %972 = vst.msk [vmem:[#allocation2 + $0x50] sm:$0xff] %vm495_vm0, %v967_v28  ;;  %v1260_v11 = vpop.permute.xlu1 %1259 }
 0x31b   : > { %973 = vst.msk [vmem:[#allocation2 + $0x58] sm:$0xff] %vm495_vm0, %v968_v25  ;;  %v1271_v42 = vadd.f32 %v1260_v11, %v1245_v3  ;;  %v1237_v25 = vadd.f32 %v1228_v46, %v1211_v39  ;;  %v1480_v3 = vmul.f32 %v3190_v10, %v3307_v5 }
 0x31d   : > { %1490 = vrot.lane.b32.xlu1 %v1481_v22, %s2655_s23 }
 0x322   : > { %v1262_v49 = vpop.permute.xlu1 %1261 }
 0x323   : > { %v1272_v38 = vadd.f32 %v1262_v49, %v1246_v20  ;;  %v1420_v20 = vmul.f32 %v3186_v44, %v3275_v41  ;;  %v1456_v41 = vmul.f32 %v3201_v1, %v3294_v24 }
 0x325   : > { %1494 = vrot.lane.b32.xlu1 %v1483_v15, %s2655_s23 }
 0x327   : > { %v1112_v2 = vpop.xlane.xlu2 %1111 }
 0x328   : > { %v1113_v47 = vrot.slane %v1112_v2, 4 }
 0x329   : > { %v1132_v62 = vpop.xlane.xlu0 %1131 }
 0x32a   : > { %v1114_v48 = vadd.f32 %v1113_v47, %v1112_v2  ;;  %v1133_v17 = vrot.slane %v1132_v62, 4  ;;  %v1288_v19 = vpop.permute.xlu1 %1287  ;;  %v1243_v2 = vmul.f32 %v3201_v1, %v1240_v61 }
 0x32b   : > { %v1298_v56 = vadd.f32 %v1288_v19, %v1272_v38  ;;  %v1457_v38 = vmul.f32 %v3204_v26, %v3294_v24  ;;  %v1597_v24 = vmul.f32 %v3186_v44, %v3355_v14 }
 0x32c   : > { %v1115_v50 = vrot.slane %v1114_v48, 2  ;;  %v1134_v35 = vadd.f32 %v1133_v17, %v1132_v62  ;;  %v1302_v62 = vstv %s2300_s27  ;;  %s2303_s27 = sld [smem:[#allocation7 + $0x1e]] }
 0x32e   : > { %v1135_v30 = vrot.slane %v1134_v35, 2  ;;  %v1116_v55 = vadd.f32 %v1115_v50, %v1114_v48  ;;  %v3326_v50 = vadd.f32 %v1302_v62, %v1298_v56 }
 0x32f   : > { %v1204_v27 = vpop.permute.xlu2 %1203 }
 0x330   : > { %v1117_v23 = vrot.slane %v1116_v55, 1  ;;  %v1136_v51 = vadd.f32 %v1135_v30, %v1134_v35  ;;  %v1212_v40 = vadd.f32 %v1204_v27, %v1182_v59  ;;  %v1247_v35 = vadd.f32 %v1243_v2, %v1237_v25 }
 0x331   : > { %v1324_v46 = vmul.f32 %v3326_v50, %v3326_v50  ;;  %v1308_v54 = vsel %vm495_vm0, %v3326_v50, 0.0 }
 0x332   : > { %v1118_v57 = vadd.f32 %v1117_v23, %v1116_v55  ;;  %v1137_v52 = vrot.slane %v1136_v51, 1  ;;  %v1292_v48 = vpop.permute.xlu1 %1291 }
 0x333   : > { %v1328_v58 = vsel %vm495_vm0, %v1324_v46, 0.0 }
 0x334   : > { %2352 = vpush %v1118_v57  ;;  %v1138_v8 = vadd.f32 %v1137_v52, %v1136_v51 }
 0x336   : > { %2354 = vpush %v1138_v8 }
 0x337   : > { %v1264_v45 = vpop.permute.xlu2 %1263 }
 0x338   : > { %v1273_v37 = vadd.f32 %v1264_v45, %v1247_v35 }
 0x33a   : > { %v3385_v2 = vpop.permute.xlu1 %1400 }
 0x33c   : > { %v1230_v16 = vpop.permute.xlu0 %1229 }
 0x33d   : > { %v1238_v34 = vadd.f32 %v1230_v16, %v1212_v40  ;;  %v1595_v16 = vmul.f32 %v3179_v31, %v3355_v14 }
 0x33f   : > { %v1248_v18 = vadd.f32 %v1244_v21, %v1238_v34  ;;  %v1266_v28 = vpop.permute.xlu2 %1265  ;;  %1603 = vrot.lane.b32.xlu1 %v1595_v16, %s2654_s22  ;;  %v1395_v34 = vmul.f32 %v3198_v33, %v3242_v53  ;;  %v1596_v21 = vmul.f32 %v3183_v43, %v3355_v14 }
 0x341   : > { %v1274_v47 = vadd.f32 %v1266_v28, %v1248_v18  ;;  %v1482_v28 = vmul.f32 %v3201_v1, %v3307_v5 }
 0x342   : > { %v3390_v5 = vpop.permute.xlu1 %1402 }
 0x343   : > { %v1300_v30 = vadd.f32 %v1292_v48, %v1274_v47  ;;  %v3392_v47 = vstv %s2314_s29 }
 0x344   : > { %v1286_v7 = vpop.permute.xlu0 %1285  ;;  %v1624_v35 = vmul.f32 %v3198_v33, %v3392_v47 }
 0x345   : > { %v1297_v22 = vadd.f32 %v1286_v7, %v1271_v42  ;;  %v3332_v27 = vadd.f32 %v1302_v62, %v1300_v30 }
 0x347   : > { %v3324_v17 = vadd.f32 %v1302_v62, %v1297_v22  ;;  %v1326_v8 = vmul.f32 %v3332_v27, %v3332_v27  ;;  %v1312_v61 = vsel %vm495_vm0, %v3332_v27, 0.0  ;;  %1605 = vrot.lane.b32.xlu1 %v1596_v21, %s2654_s22  ;;  %v1621_v22 = vmul.f32 %v3179_v31, %v3392_v47 }
 0x349   : > { %v1323_v55 = vmul.f32 %v3324_v17, %v3324_v17  ;;  %v1307_v23 = vsel %vm495_vm0, %v3324_v17, 0.0  ;;  %v1332_v40 = vsel %vm495_vm0, %v1326_v8, 0.0 }
 0x34a   : > { %v1309_v52 = vadd.f32 %v1308_v54, %v1307_v23  ;;  %v3399_v48 = vpop.permute.xlu1 %1404 }
 0x34b   : > { %v1327_v57 = vsel %vm495_vm0, %v1323_v55, 0.0 }
 0x34c   : > { %v1290_v11 = vpop.permute.xlu0 %1289  ;;  %v1329_v60 = vadd.f32 %v1328_v58, %v1327_v57 }
 0x34d   : > { %v1299_v36 = vadd.f32 %v1290_v11, %v1273_v37  ;;  %v3405_v37 = vstv %s2316_s17  ;;  %s2323_s17 = sld [smem:[#allocation7 + $0x2c]] }
 0x34e   : > { %v1657_v11 = vmul.f32 %v3190_v10, %v3405_v37 }
 0x34f   : > { %v3336_v51 = vadd.f32 %v1302_v62, %v1299_v36  ;;  %1607 = vrot.lane.b32.xlu1 %v1597_v24, %s2654_s22  ;;  %v1622_v62 = vmul.f32 %v3183_v43, %v3392_v47 }
 0x351   : > { %v1310_v6 = vsel %vm495_vm0, %v3336_v51, 0.0  ;;  %v1325_v49 = vmul.f32 %v3336_v51, %v3336_v51 }
 0x352   : > { %v1311_v59 = vadd.f32 %v1310_v6, %v1309_v52  ;;  %v1427_v30 = vpop.permute.xlu1 %1426 }
 0x353   : > { %v1330_v45 = vsel %vm495_vm0, %v1325_v49, 0.0 }
 0x354   : > { %v1313_v0 = vadd.f32 %v1312_v61, %v1311_v59  ;;  %v1331_v63 = vadd.f32 %v1330_v45, %v1329_v60 }
 0x356   : > { %1314 = vadd.xlane.f32.xlu2 %v1313_v0  ;;  %v1333_v9 = vadd.f32 %v1332_v40, %v1331_v63 }
 0x357   : > { %1629 = vrot.lane.b32.xlu1 %v1621_v22, %s2655_s23 }
 0x358   : > { %1334 = vadd.xlane.f32.xlu0 %v1333_v9  ;;  %v1381_v9 = vstv %s2303_s27  ;;  %s2325_s27 = sld [smem:[#allocation7 + $0x2e]] }
 0x35a   : > { %v1429_v8 = vpop.permute.xlu1 %1428 }
 0x35f   : > { %1631 = vrot.lane.b32.xlu1 %v1622_v62, %s2655_s23 }
 0x365   : > { %s2353_s9 = spop %2352 }
 0x366   : > { %s3359_s10 = smul.f32 0.002232143, %s2353_s9  ;;  %s2309_s9 = sld [smem:[#allocation8 + $0x5]] }
 0x367   : > { %s2355_s11 = spop %2354  ;;  %1635 = vrot.lane.b32.xlu1 %v1624_v35, %s2655_s23 }
 0x368   : > { %s1142_s12 = smul.f32 %s3359_s10, %s3359_s10 }
 0x369   : > { %s1141_s14 = smul.f32 0.002232143, %s2355_s11 }
 0x36b   : > { %s1143_s15 = ssub.f32 %s1141_s14, %s1142_s12 }
 0x36c   : > { %1430 = vrot.lane.b32.xlu0 %v1420_v20, %s2655_s23 }
 0x36d   : > { %s1145_s16 = sadd.f32 1e-05, %s1143_s15 }
 0x36e   : > { %1406 = vrot.lane.b32.xlu2 %v1395_v34, %s2654_s22 }
 0x36f   : > { %v1146_v19 = vstv %s1145_s16  ;;  %1665 = vrot.lane.b32.xlu1 %v1657_v11, %s2654_s22 }
 0x370   : > { %2471 = vrsqrt.f32 %v1146_v19  ;;  %vm1153_vm11 = vweird.f32 %v1146_v19 }
 0x374   : > { %1466 = vrot.lane.b32.xlu0 %v1456_v41, %s2654_s22  ;;  %v1383_v41 = vmul.f32 %v3183_v43, %v1381_v9 }
 0x376   : > { %v2472_v53 = vpop.eup %2471  ;;  %1488 = vrot.lane.b32.xlu2 %v1480_v3, %s2655_s23 }
 0x377   : > { %v1148_v39 = vmul.f32 %v2472_v53, %v1146_v19  ;;  %vm1154_vm10 = vweird.f32 %v2472_v53  ;;  %v1382_v19 = vmul.f32 %v3179_v31, %v1381_v9 }
 0x378   : > { %vm1155_vm12 = vmor %vm1153_vm11, %vm1154_vm10 }
 0x379   : > { %v1149_v18 = vmul.f32 %v2472_v53, %v1148_v39 }
 0x37b   : > { %v1150_v42 = vmul.f32 0.5, %v1149_v18  ;;  %v1412_v18 = vadd.f32 %v3385_v2, %v1382_v19  ;;  %v1385_v2 = vmul.f32 %v3198_v33, %v1381_v9 }
 0x37c   : > { %1468 = vrot.lane.b32.xlu0 %v1457_v38, %s2654_s22 }
 0x37d   : > { %v1151_v25 = vsub.f32 1.5, %v1150_v42  ;;  %v1443_v42 = vstv %s2306_s8  ;;  %s2312_s8 = sld [smem:[#allocation7 + $0x24]] }
 0x37e   : > { %1492 = vrot.lane.b32.xlu2 %v1482_v28, %s2655_s23  ;;  %v1413_v28 = vadd.f32 %v3390_v5, %v1383_v41  ;;  %v1444_v22 = vmul.f32 %v3190_v10, %v1443_v42  ;;  %v1445_v62 = vmul.f32 %v3195_v32, %v1443_v42 }
 0x37f   : > { %v1152_v7 = vmul.f32 %v2472_v53, %v1151_v25  ;;  %v1384_v25 = vmul.f32 %v3186_v44, %v1381_v9 }
 0x380   : > { %v1439_v24 = vadd.f32 %v1429_v8, %v1413_v28 }
 0x381   : > { %v1156_v56 = vsel %vm1155_vm12, %v2472_v53, %v1152_v7  ;;  %v1414_v11 = vadd.f32 %v3399_v48, %v1384_v25 }
 0x382   : > { %2356 = vpush %v1156_v56  ;;  %v1438_v56 = vadd.f32 %v1427_v30, %v1412_v18 }
 0x3b3   : > { %s2357_s20 = spop %2356 }
 0x3b4   : > { %s1158_s21 = smul.f32 %s2357_s20, %s2292_s13  ;;  %s2322_s13 = sld [smem:[#allocation7 + $0x2b]] }
 0x3b5   : > { %s2302_s20 = sld [smem:[#allocation11 + $0x4]] }
 0x3b6   : > { %s1160_s25 = smul.f32 %s1158_s21, %s3359_s10  ;;  %v1162_v55 = vstv %s1158_s21 }
 0x3b7   : > { %v1163_v46 = vmul.f32 %v1162_v55, %v3207_v4  ;;  %v1164_v36 = vmul.f32 %v1162_v55, %v3209_v12  ;;  %v1165_v23 = vmul.f32 %v1162_v55, %v3213_v13  ;;  %v1166_v54 = vmul.f32 %v1162_v55, %v3225_v29  ;;  %v1433_v13 = vpop.permute.xlu1 %1432 }
 0x3b8   : > { %s1161_s26 = ssub.f32 %s2293_s18, %s1160_s25  ;;  %v1658_v4 = vmul.f32 %v3195_v32, %v3405_v37  ;;  %v3422_v12 = vstv %s2317_s30 }
 0x3b9   : > { %v1684_v29 = vmul.f32 %v3195_v32, %v3422_v12  ;;  %s2301_s18 = sld [smem:[#allocation9 + $0x4]] }
 0x3ba   : > { %v1167_v57 = vstv %s1161_s26  ;;  %1667 = vrot.lane.b32.xlu1 %v1658_v4, %s2654_s22 }
 0x3bb   : > { %v1168_v52 = vadd.f32 %v1167_v57, %v1163_v46  ;;  %v1169_v6 = vadd.f32 %v1167_v57, %v1164_v36  ;;  %v1170_v49 = vadd.f32 %v1167_v57, %v1165_v23  ;;  %v1171_v58 = vadd.f32 %v1167_v57, %v1166_v54 }
 0x3bc   : > { %v1448_v46 = vadd.f32 %v1444_v22, %v1438_v56  ;;  %v1449_v36 = vadd.f32 %v1445_v62, %v1439_v24  ;;  %v1446_v23 = vmul.f32 %v3201_v1, %v1443_v42 }
 0x3bd   : > { %1173 = vst.msk [vmem:[#allocation2 + $0x60] sm:$0xff] %vm495_vm0, %v1168_v52 }
 0x3be   : > { %1174 = vst.msk [vmem:[#allocation2 + $0x68] sm:$0xff] %vm495_vm0, %v1169_v6 }
 0x3bf   : > { %1175 = vst.msk [vmem:[#allocation2 + $0x70] sm:$0xff] %vm495_vm0, %v1170_v49  ;;  %v1463_v15 = vpop.permute.xlu1 %1462 }
 0x3c0   : > { %1176 = vst.msk [vmem:[#allocation2 + $0x78] sm:$0xff] %vm495_vm0, %v1171_v58  ;;  %v1474_v54 = vadd.f32 %v1463_v15, %v1448_v46  ;;  %v1623_v46 = vmul.f32 %v3186_v44, %v3392_v47 }
 0x3c2   : > { %1693 = vrot.lane.b32.xlu1 %v1684_v29, %s2655_s23 }
 0x3c7   : > { %v1465_v7 = vpop.permute.xlu1 %1464 }
 0x3c8   : > { %v1475_v57 = vadd.f32 %v1465_v7, %v1449_v36  ;;  %v1659_v36 = vmul.f32 %v3201_v1, %v3405_v37 }
 0x3c9   : > { %v1315_v59 = vpop.xlane.xlu2 %1314 }
 0x3ca   : > { %v1316_v60 = vrot.slane %v1315_v59, 4 }
 0x3cb   : > { %v1335_v61 = vpop.xlane.xlu0 %1334 }
 0x3cc   : > { %v1317_v45 = vadd.f32 %v1316_v60, %v1315_v59  ;;  %v1336_v0 = vrot.slane %v1335_v61, 4  ;;  %v1505_v59 = vstv %s2309_s9  ;;  %s2315_s9 = sld [smem:[#allocation7 + $0x27]] }
 0x3ce   : > { %v1318_v63 = vrot.slane %v1317_v45, 2  ;;  %v1337_v40 = vadd.f32 %v1336_v0, %v1335_v61 }
 0x3cf   : > { %v1491_v30 = vpop.permute.xlu1 %1490 }
 0x3d0   : > { %v1338_v16 = vrot.slane %v1337_v40, 2  ;;  %v1319_v20 = vadd.f32 %v1318_v63, %v1317_v45  ;;  %v1501_v4 = vadd.f32 %v1491_v30, %v1475_v57  ;;  %v1447_v45 = vmul.f32 %v3204_v26, %v1443_v42 }
 0x3d1   : > { %v1407_v3 = vpop.permute.xlu2 %1406  ;;  %v1685_v30 = vmul.f32 %v3201_v1, %v3422_v12 }
 0x3d2   : > { %v1320_v34 = vrot.slane %v1319_v20, 1  ;;  %v1339_v21 = vadd.f32 %v1338_v16, %v1337_v40  ;;  %v1415_v52 = vadd.f32 %v1407_v3, %v1385_v2  ;;  %v3440_v0 = vadd.f32 %v1505_v59, %v1501_v4 }
 0x3d4   : > { %v1321_v53 = vadd.f32 %v1320_v34, %v1319_v20  ;;  %v1340_v39 = vrot.slane %v1339_v21, 1  ;;  %v1441_v48 = vadd.f32 %v1433_v13, %v1415_v52  ;;  %v1527_v20 = vmul.f32 %v3440_v0, %v3440_v0 }
 0x3d5   : > { %v1511_v41 = vsel %vm495_vm0, %v3440_v0, 0.0 }
 0x3d6   : > { %2358 = vpush %v1321_v53  ;;  %v1341_v38 = vadd.f32 %v1340_v39, %v1339_v21  ;;  %v1451_v9 = vadd.f32 %v1447_v45, %v1441_v48  ;;  %v1531_v18 = vsel %vm495_vm0, %v1527_v20, 0.0  ;;  %v3506_v48 = vstv %s2323_s17 }
 0x3d7   : > { %v1495_v16 = vpop.permute.xlu1 %1494  ;;  %v1824_v45 = vmul.f32 %v3179_v31, %v3506_v48 }
 0x3d8   : > { %2360 = vpush %v1341_v38 }
 0x3d9   : > { %v1489_v35 = vpop.permute.xlu2 %1488 }
 0x3da   : > { %v1500_v6 = vadd.f32 %v1489_v35, %v1474_v54 }
 0x3dc   : > { %v3437_v60 = vadd.f32 %v1505_v59, %v1500_v6 }
 0x3de   : > { %v1431_v55 = vpop.permute.xlu0 %1430  ;;  %v1526_v40 = vmul.f32 %v3437_v60, %v3437_v60  ;;  %v1510_v13 = vsel %vm495_vm0, %v3437_v60, 0.0 }
 0x3df   : > { %v1440_v5 = vadd.f32 %v1431_v55, %v1414_v11  ;;  %v1512_v39 = vadd.f32 %v1511_v41, %v1510_v13  ;;  %v1686_v55 = vmul.f32 %v3204_v26, %v3422_v12  ;;  %v1598_v11 = vmul.f32 %v3198_v33, %v3355_v14 }
 0x3e0   : > { %v1530_v53 = vsel %vm495_vm0, %v1526_v40, 0.0  ;;  %v1683_v14 = vmul.f32 %v3190_v10, %v3422_v12 }
 0x3e1   : > { %v1450_v49 = vadd.f32 %v1446_v23, %v1440_v5  ;;  %v1493_v58 = vpop.permute.xlu2 %1492  ;;  %v1532_v25 = vadd.f32 %v1531_v18, %v1530_v53  ;;  %1697 = vrot.lane.b32.xlu1 %v1686_v55, %s2655_s23  ;;  %v1660_v23 = vmul.f32 %v3204_v26, %v3405_v37  ;;  %v3491_v37 = vpop.permute.xlu1 %1603 }
 0x3e6   : > { %v1467_v8 = vpop.permute.xlu0 %1466 }
 0x3e7   : > { %v1476_v29 = vadd.f32 %v1467_v8, %v1450_v49  ;;  %v3493_v8 = vstv %s2322_s13 }
 0x3e8   : > { %v1799_v4 = vmul.f32 %v3183_v43, %v3493_v8 }
 0x3e9   : > { %v1502_v61 = vadd.f32 %v1493_v58, %v1476_v29  ;;  %v1798_v58 = vmul.f32 %v3179_v31, %v3493_v8  ;;  %v1606_v12 = vpop.permute.xlu1 %1605 }
 0x3eb   : > { %v3442_v63 = vadd.f32 %v1505_v59, %v1502_v61  ;;  %1806 = vrot.lane.b32.xlu1 %v1798_v58, %s2654_s22 }
 0x3ed   : > { %v1528_v21 = vmul.f32 %v3442_v63, %v3442_v63  ;;  %v1513_v3 = vsel %vm495_vm0, %v3442_v63, 0.0 }
 0x3ee   : > { %v1469_v15 = vpop.permute.xlu0 %1468  ;;  %v1514_v42 = vadd.f32 %v1513_v3, %v1512_v39 }
 0x3ef   : > { %v1477_v34 = vadd.f32 %v1469_v15, %v1451_v9  ;;  %v1533_v28 = vsel %vm495_vm0, %v1528_v21, 0.0  ;;  %v1825_v9 = vmul.f32 %v3183_v43, %v3506_v48 }
 0x3f0   : > { %v1534_v22 = vadd.f32 %v1533_v28, %v1532_v25 }
 0x3f1   : > { %v1503_v19 = vadd.f32 %v1495_v16, %v1477_v34  ;;  %v3501_v29 = vpop.permute.xlu1 %1607 }
 0x3f3   : > { %v3457_v38 = vadd.f32 %v1505_v59, %v1503_v19  ;;  %1808 = vrot.lane.b32.xlu1 %v1799_v4, %s2654_s22  ;;  %v1800_v59 = vmul.f32 %v3186_v44, %v3493_v8 }
 0x3f5   : > { %v1515_v7 = vsel %vm495_vm0, %v3457_v38, 0.0  ;;  %v1529_v56 = vmul.f32 %v3457_v38, %v3457_v38 }
 0x3f6   : > { %v1516_v24 = vadd.f32 %v1515_v7, %v1514_v42  ;;  %v1584_v7 = vstv %s2312_s8 }
 0x3f7   : > { %v1535_v62 = vsel %vm495_vm0, %v1529_v56, 0.0  ;;  %v1585_v55 = vmul.f32 %v3179_v31, %v1584_v7 }
 0x3f8   : > { %1517 = vadd.xlane.f32.xlu0 %v1516_v24  ;;  %v1536_v35 = vadd.f32 %v1535_v62, %v1534_v22 }
 0x3f9   : > { %v1630_v61 = vpop.permute.xlu1 %1629 }
 0x3fa   : > { %1537 = vadd.xlane.f32.xlu2 %v1536_v35 }
 0x3fb   : > { %1810 = vrot.lane.b32.xlu1 %v1800_v59, %s2654_s22 }
 0x401   : > { %v1632_v34 = vpop.permute.xlu1 %1631 }
 0x403   : > { %1832 = vrot.lane.b32.xlu1 %v1824_v45, %s2655_s23 }
 0x407   : > { %s2359_s10 = spop %2358 }
 0x408   : > { %s3469_s11 = smul.f32 0.002232143, %s2359_s10  ;;  %s2318_s10 = sld [smem:[#allocation8 + $0x6]] }
 0x409   : > { %s2361_s12 = spop %2360 }
 0x40a   : > { %s1345_s14 = smul.f32 %s3469_s11, %s3469_s11 }
 0x40b   : > { %s1344_s15 = smul.f32 0.002232143, %s2361_s12  ;;  %1834 = vrot.lane.b32.xlu1 %v1825_v9, %s2655_s23 }
 0x40c   : > { %1609 = vrot.lane.b32.xlu0 %v1598_v11, %s2654_s22  ;;  %v1586_v11 = vmul.f32 %v3183_v43, %v1584_v7 }
 0x40d   : > { %s1346_s16 = ssub.f32 %s1344_s15, %s1345_s14 }
 0x40f   : > { %s1348_s29 = sadd.f32 1e-05, %s1346_s16 }
 0x411   : > { %v1349_v2 = vstv %s1348_s29  ;;  %s2326_s29 = sld [smem:[#allocation7 + $0x2f]] }
 0x412   : > { %2473 = vrsqrt.f32 %v1349_v2  ;;  %1633 = vrot.lane.b32.xlu2 %v1623_v46, %s2655_s23  ;;  %vm1356_vm14 = vweird.f32 %v1349_v2 }
 0x414   : > { %1669 = vrot.lane.b32.xlu0 %v1659_v36, %s2654_s22 }
 0x418   : > { %v2474_v5 = vpop.eup %2473 }
 0x419   : > { %v1351_v54 = vmul.f32 %v2474_v5, %v1349_v2  ;;  %vm1357_vm13 = vweird.f32 %v2474_v5 }
 0x41a   : > { %1691 = vrot.lane.b32.xlu2 %v1683_v14, %s2655_s23  ;;  %vm1358_vm15 = vmor %vm1356_vm14, %vm1357_vm13 }
 0x41b   : > { %v1352_v47 = vmul.f32 %v2474_v5, %v1351_v54  ;;  %v1616_v54 = vadd.f32 %v1606_v12, %v1586_v11 }
 0x41c   : > { %1671 = vrot.lane.b32.xlu0 %v1660_v23, %s2654_s22  ;;  %v1615_v23 = vadd.f32 %v3491_v37, %v1585_v55 }
 0x41d   : > { %v1353_v57 = vmul.f32 0.5, %v1352_v47  ;;  %v1646_v47 = vstv %s2315_s9  ;;  %v1642_v43 = vadd.f32 %v1632_v34, %v1616_v54 }
 0x41e   : > { %v1648_v58 = vmul.f32 %v3195_v32, %v1646_v47  ;;  %v1649_v9 = vmul.f32 %v3201_v1, %v1646_v47 }
 0x41f   : > { %v1354_v52 = vsub.f32 1.5, %v1353_v57 }
 0x420   : > { %v1652_v45 = vadd.f32 %v1648_v58, %v1642_v43 }
 0x421   : > { %v1355_v6 = vmul.f32 %v2474_v5, %v1354_v52 }
 0x422   : > { %1695 = vrot.lane.b32.xlu2 %v1685_v30, %s2655_s23  ;;  %v1587_v30 = vmul.f32 %v3186_v44, %v1584_v7 }
 0x423   : > { %v1359_v49 = vsel %vm1358_vm15, %v2474_v5, %v1355_v6  ;;  %v1641_v6 = vadd.f32 %v1630_v61, %v1615_v23 }
 0x424   : > { %2362 = vpush %v1359_v49  ;;  %v1647_v49 = vmul.f32 %v3190_v10, %v1646_v47  ;;  %v1617_v4 = vadd.f32 %v3501_v29, %v1587_v30 }
 0x426   : > { %v1651_v59 = vadd.f32 %v1647_v49, %v1641_v6  ;;  %v3586_v6 = vld [vmem:[#allocation3 + $0x20] sm:$0xff]  ;;  %v3590_v49 = vld [vmem:[#allocation3 + $0x18] sm:$0xff] }
 0x427   : > { %v1826_v43 = vmul.f32 %v3586_v6, %v3506_v48 }
 0x455   : > { %s2363_s21 = spop %2362 }
 0x456   : > { %s1361_s25 = smul.f32 %s2363_s21, %s2301_s18  ;;  %s2311_s18 = sld [smem:[#allocation11 + $0x5]] }
 0x458   : > { %s1363_s26 = smul.f32 %s1361_s25, %s3469_s11  ;;  %v1365_v40 = vstv %s1361_s25 }
 0x459   : > { %v1366_v15 = vmul.f32 %v1365_v40, %v3324_v17  ;;  %v1367_v16 = vmul.f32 %v1365_v40, %v3326_v50  ;;  %v1368_v20 = vmul.f32 %v1365_v40, %v3336_v51  ;;  %v1369_v13 = vmul.f32 %v1365_v40, %v3332_v27  ;;  %v1636_v50 = vpop.permute.xlu1 %1635 }
 0x45a   : > { %s1364_s30 = ssub.f32 %s2302_s20, %s1363_s26  ;;  %v1827_v17 = vmul.f32 %v3198_v33, %v3506_v48  ;;  %v3526_v27 = vstv %s2325_s27  ;;  %v1588_v40 = vmul.f32 %v3198_v33, %v1584_v7 }
 0x45b   : > { %v1860_v51 = vmul.f32 %v3190_v10, %v3526_v27  ;;  %v1862_v31 = vmul.f32 %v3201_v1, %v3526_v27  ;;  %s2327_s27 = sld [smem:[#allocation8 + $0x7]] }
 0x45c   : > { %v1370_v21 = vstv %s1364_s30  ;;  %1838 = vrot.lane.b32.xlu1 %v1827_v17, %s2655_s23  ;;  %v1650_v17 = vmul.f32 %v3204_v26, %v1646_v47  ;;  %s2324_s30 = sld [smem:[#allocation7 + $0x2d]] }
 0x45d   : > { %v1371_v19 = vadd.f32 %v1370_v21, %v1366_v15  ;;  %v1372_v41 = vadd.f32 %v1370_v21, %v1367_v16  ;;  %v1373_v3 = vadd.f32 %v1370_v21, %v1368_v20  ;;  %v1374_v53 = vadd.f32 %v1370_v21, %v1369_v13 }
 0x45f   : > { %1376 = vst.msk [vmem:[#allocation2 + $0x80] sm:$0xff] %vm495_vm0, %v1371_v19 }
 0x460   : > { %1377 = vst.msk [vmem:[#allocation2 + $0x88] sm:$0xff] %vm495_vm0, %v1372_v41  ;;  %v1708_v41 = vstv %s2318_s10 }
 0x461   : > { %1378 = vst.msk [vmem:[#allocation2 + $0x90] sm:$0xff] %vm495_vm0, %v1373_v3  ;;  %v1666_v56 = vpop.permute.xlu1 %1665 }
 0x462   : > { %1379 = vst.msk [vmem:[#allocation2 + $0x98] sm:$0xff] %vm495_vm0, %v1374_v53  ;;  %v1677_v61 = vadd.f32 %v1666_v56, %v1651_v59 }
 0x464   : > { %1868 = vrot.lane.b32.xlu1 %v1860_v51, %s2654_s22 }
 0x469   : > { %v1668_v52 = vpop.permute.xlu1 %1667 }
 0x46a   : > { %v1678_v15 = vadd.f32 %v1668_v52, %v1652_v45  ;;  %v3577_v52 = vld [vmem:[#allocation3 + $0x28] sm:$0xff] }
 0x46b   : > { %v1518_v39 = vpop.xlane.xlu0 %1517 }
 0x46c   : > { %v1519_v18 = vrot.slane %v1518_v39, 4  ;;  %1872 = vrot.lane.b32.xlu1 %v1862_v31, %s2654_s22  ;;  %v1801_v31 = vmul.f32 %v3577_v52, %v3493_v8  ;;  %v1861_v8 = vmul.f32 %v3590_v49, %v3526_v27 }
 0x46d   : > { %v1538_v28 = vpop.xlane.xlu2 %1537 }
 0x46e   : > { %v1520_v42 = vadd.f32 %v1519_v18, %v1518_v39  ;;  %v1539_v25 = vrot.slane %v1538_v28, 4 }
 0x470   : > { %v1521_v24 = vrot.slane %v1520_v42, 2  ;;  %v1540_v22 = vadd.f32 %v1539_v25, %v1538_v28 }
 0x471   : > { %v1694_v16 = vpop.permute.xlu1 %1693 }
 0x472   : > { %v1541_v62 = vrot.slane %v1540_v22, 2  ;;  %v1522_v35 = vadd.f32 %v1521_v24, %v1520_v42  ;;  %v1704_v21 = vadd.f32 %v1694_v16, %v1678_v15 }
 0x474   : > { %v1523_v46 = vrot.slane %v1522_v35, 1  ;;  %v1542_v36 = vadd.f32 %v1541_v62, %v1540_v22  ;;  %v3546_v33 = vadd.f32 %v1708_v41, %v1704_v21 }
 0x475   : > { %v1634_v2 = vpop.permute.xlu2 %1633 }
 0x476   : > { %v1524_v14 = vadd.f32 %v1523_v46, %v1522_v35  ;;  %v1543_v5 = vrot.slane %v1542_v36, 1  ;;  %v1643_v44 = vadd.f32 %v1634_v2, %v1617_v4  ;;  %v1730_v42 = vmul.f32 %v3546_v33, %v3546_v33  ;;  %v3567_v2 = vld [vmem:[#allocation3 + $0x38] sm:$0xff] }
 0x477   : > { %v1714_v56 = vsel %vm495_vm0, %v3546_v33, 0.0 }
 0x478   : > { %2364 = vpush %v1524_v14  ;;  %v1544_v57 = vadd.f32 %v1543_v5, %v1542_v36  ;;  %v1653_v32 = vadd.f32 %v1649_v9, %v1643_v44  ;;  %v1734_v55 = vsel %vm495_vm0, %v1730_v42, 0.0  ;;  %v1863_v14 = vmul.f32 %v3567_v2, %v3526_v27  ;;  %v3602_v44 = vld [vmem:[#allocation3 + $0x30] sm:$0xff] }
 0x479   : > { %v1698_v28 = vpop.permute.xlu1 %1697 }
 0x47a   : > { %2366 = vpush %v1544_v57  ;;  %1874 = vrot.lane.b32.xlu1 %v1863_v14, %s2654_s22 }
 0x47d   : > { %v1692_v37 = vpop.permute.xlu2 %1691 }
 0x47e   : > { %v1610_v12 = vpop.permute.xlu0 %1609  ;;  %v1703_v10 = vadd.f32 %v1692_v37, %v1677_v61  ;;  %v1885_v37 = vstv %s2326_s29  ;;  %s2320_s29 = sld [smem:[#allocation11 + $0x6]] }
 0x47f   : > { %v1618_v20 = vadd.f32 %v1610_v12, %v1588_v40  ;;  %v3596_v12 = vld [vmem:[#allocation3 + $0x10] sm:$0xff]  ;;  %v1887_v48 = vmul.f32 %v3590_v49, %v1885_v37  ;;  %v1888_v40 = vmul.f32 %v3602_v44, %v1885_v37  ;;  %v1889_v61 = vmul.f32 %v3567_v2, %v1885_v37 }
 0x480   : > { %v3543_v29 = vadd.f32 %v1708_v41, %v1703_v10  ;;  %v1886_v4 = vmul.f32 %v3596_v12, %v1885_v37 }
 0x481   : > { %v1644_v3 = vadd.f32 %v1636_v50, %v1618_v20  ;;  %v1807_v20 = vpop.permute.xlu1 %1806 }
 0x482   : > { %v1729_v51 = vmul.f32 %v3543_v29, %v3543_v29  ;;  %v1713_v50 = vsel %vm495_vm0, %v3543_v29, 0.0 }
 0x483   : > { %v1654_v39 = vadd.f32 %v1650_v17, %v1644_v3  ;;  %v1715_v62 = vadd.f32 %v1714_v56, %v1713_v50 }
 0x484   : > { %v1733_v22 = vsel %vm495_vm0, %v1729_v51, 0.0 }
 0x485   : > { %v1696_v13 = vpop.permute.xlu2 %1695  ;;  %v1735_v36 = vadd.f32 %v1734_v55, %v1733_v22 }
 0x486   : > { %v1670_v34 = vpop.permute.xlu0 %1669 }
 0x487   : > { %v1679_v19 = vadd.f32 %v1670_v34, %v1653_v32 }
 0x489   : > { %v1705_v53 = vadd.f32 %v1696_v13, %v1679_v19  ;;  %v1809_v32 = vpop.permute.xlu1 %1808 }
 0x48b   : > { %v3548_v1 = vadd.f32 %v1708_v41, %v1705_v53 }
 0x48d   : > { %v1731_v26 = vmul.f32 %v3548_v1, %v3548_v1  ;;  %v1716_v24 = vsel %vm495_vm0, %v3548_v1, 0.0 }
 0x48e   : > { %v1672_v18 = vpop.permute.xlu0 %1671  ;;  %v1717_v46 = vadd.f32 %v1716_v24, %v1715_v62 }
 0x48f   : > { %v1680_v25 = vadd.f32 %v1672_v18, %v1654_v39  ;;  %v1736_v11 = vsel %vm495_vm0, %v1731_v26, 0.0 }
 0x490   : > { %v1737_v47 = vadd.f32 %v1736_v11, %v1735_v36 }
 0x491   : > { %v1706_v7 = vadd.f32 %v1698_v28, %v1680_v25  ;;  %v1811_v34 = vpop.permute.xlu1 %1810 }
 0x493   : > { %v3563_v35 = vadd.f32 %v1708_v41, %v1706_v7 }
 0x495   : > { %v1718_v5 = vsel %vm495_vm0, %v3563_v35, 0.0  ;;  %v1732_v23 = vmul.f32 %v3563_v35, %v3563_v35 }
 0x496   : > { %v1719_v54 = vadd.f32 %v1718_v5, %v1717_v46  ;;  %v2495_v5 = vld [vmem:[#allocation3] sm:$0xff] }
 0x497   : > { %v1738_v57 = vsel %vm495_vm0, %v1732_v23, 0.0 }
 0x498   : > { %1720 = vadd.xlane.f32.xlu0 %v1719_v54  ;;  %v1739_v30 = vadd.f32 %v1738_v57, %v1737_v47  ;;  %v1849_v47 = vstv %s2324_s30 }
 0x499   : > { %v1833_v28 = vpop.permute.xlu1 %1832 }
 0x49a   : > { %1740 = vadd.xlane.f32.xlu2 %v1739_v30  ;;  %v2496_v30 = vld [vmem:[#allocation3 + $0x8] sm:$0xff] }
 0x4a9   : > { %s2365_s11 = spop %2364 }
 0x4aa   : > { %s3581_s12 = smul.f32 0.002232143, %s2365_s11 }
 0x4ab   : > { %s2367_s14 = spop %2366 }
 0x4ac   : > { %s1548_s15 = smul.f32 %s3581_s12, %s3581_s12  ;;  %1812 = vrot.lane.b32.xlu0 %v1801_v31, %s2654_s22 }
 0x4ad   : > { %s1547_s16 = smul.f32 0.002232143, %s2367_s14 }
 0x4af   : > { %s1549_s13 = ssub.f32 %s1547_s16, %s1548_s15 }
 0x4b0   : > { %s2319_s16 = sld [smem:[#allocation9 + $0x6]] }
 0x4b1   : > { %s1551_s17 = sadd.f32 1e-05, %s1549_s13 }
 0x4b2   : > { %1836 = vrot.lane.b32.xlu2 %v1826_v43, %s2655_s23 }
 0x4b3   : > { %v1552_v58 = vstv %s1551_s17 }
 0x4b4   : > { %2475 = vrsqrt.f32 %v1552_v58  ;;  %1870 = vrot.lane.b32.xlu0 %v1861_v8, %s2654_s22  ;;  %vm1559_vm2 = vweird.f32 %v1552_v58  ;;  %s2310_s22 = sld [smem:[#allocation9 + $0x5]] }
 0x4ba   : > { %v2476_v59 = vpop.eup %2475  ;;  %1894 = vrot.lane.b32.xlu2 %v1886_v4, %s2655_s23 }
 0x4bb   : > { %v1554_v45 = vmul.f32 %v2476_v59, %v1552_v58  ;;  %vm1560_vm1 = vweird.f32 %v2476_v59  ;;  %v1850_v58 = vmul.f32 %v3596_v12, %v1849_v47 }
 0x4bc   : > { %1896 = vrot.lane.b32.xlu0 %v1887_v48, %s2655_s23  ;;  %vm1561_vm3 = vmor %vm1559_vm2, %vm1560_vm1 }
 0x4bd   : > { %v1555_v27 = vmul.f32 %v2476_v59, %v1554_v45 }
 0x4bf   : > { %v1556_v9 = vmul.f32 0.5, %v1555_v27 }
 0x4c1   : > { %v1557_v15 = vsub.f32 1.5, %v1556_v9 }
 0x4c2   : > { %1898 = vrot.lane.b32.xlu2 %v1888_v40, %s2655_s23  ;;  %v1852_v40 = vmul.f32 %v3602_v44, %v1849_v47 }
 0x4c3   : > { %v1558_v16 = vmul.f32 %v2476_v59, %v1557_v15 }
 0x4c4   : > { %1900 = vrot.lane.b32.xlu0 %v1889_v61, %s2655_s23  ;;  %s2321_s23 = sld [smem:[#allocation7 + $0x2a]] }
 0x4c5   : > { %v1562_v10 = vsel %vm1561_vm3, %v2476_v59, %v1558_v16  ;;  %v1851_v16 = vmul.f32 %v3590_v49, %v1849_v47 }
 0x4c6   : > { %2368 = vpush %v1562_v10 }
 0x4ca   : > { %v1787_v62 = vstv %s2321_s23 }
 0x4cb   : > { %v1788_v23 = vmul.f32 %v2495_v5, %v1787_v62  ;;  %v1789_v31 = vmul.f32 %v2496_v30, %v1787_v62  ;;  %v1790_v43 = vmul.f32 %v3586_v6, %v1787_v62  ;;  %v1791_v9 = vmul.f32 %v3577_v52, %v1787_v62 }
 0x4cd   : > { %v1818_v54 = vadd.f32 %v1807_v20, %v1788_v23  ;;  %v1819_v48 = vadd.f32 %v1809_v32, %v1789_v31  ;;  %v1820_v59 = vadd.f32 %v1811_v34, %v1790_v43 }
 0x4cf   : > { %v1844_v8 = vadd.f32 %v1833_v28, %v1818_v54 }
 0x4d1   : > { %v1854_v45 = vadd.f32 %v1850_v58, %v1844_v8 }
 0x4f7   : > { %s2369_s20 = spop %2368 }
 0x4f8   : > { %s1564_s21 = smul.f32 %s2369_s20, %s2310_s22 }
 0x4fa   : > { %s1566_s25 = smul.f32 %s1564_s21, %s3581_s12  ;;  %v1568_v13 = vstv %s1564_s21 }
 0x4fb   : > { %v1569_v21 = vmul.f32 %v1568_v13, %v3437_v60  ;;  %v1570_v19 = vmul.f32 %v1568_v13, %v3440_v0  ;;  %v1571_v41 = vmul.f32 %v1568_v13, %v3442_v63  ;;  %v1572_v3 = vmul.f32 %v1568_v13, %v3457_v38  ;;  %v1835_v63 = vpop.permute.xlu1 %1834 }
 0x4fc   : > { %s1567_s26 = ssub.f32 %s2311_s18, %s1566_s25  ;;  %v1845_v15 = vadd.f32 %v1835_v63, %v1819_v48 }
 0x4fe   : > { %v1573_v53 = vstv %s1567_s26 }
 0x4ff   : > { %v1574_v17 = vadd.f32 %v1573_v53, %v1569_v21  ;;  %v1575_v51 = vadd.f32 %v1573_v53, %v1570_v19  ;;  %v1576_v39 = vadd.f32 %v1573_v53, %v1571_v41  ;;  %v1577_v18 = vadd.f32 %v1573_v53, %v1572_v3 }
 0x500   : > { %v1855_v21 = vadd.f32 %v1851_v16, %v1845_v15  ;;  %v1911_v19 = vstv %s2327_s27  ;;  %v1853_v3 = vmul.f32 %v3567_v2, %v1849_v47 }
 0x501   : > { %1579 = vst.msk [vmem:[#allocation2 + $0xa0] sm:$0xff] %vm495_vm0, %v1574_v17 }
 0x502   : > { %1580 = vst.msk [vmem:[#allocation2 + $0xa8] sm:$0xff] %vm495_vm0, %v1575_v51 }
 0x503   : > { %1581 = vst.msk [vmem:[#allocation2 + $0xb0] sm:$0xff] %vm495_vm0, %v1576_v39  ;;  %v1839_v46 = vpop.permute.xlu1 %1838 }
 0x504   : > { %1582 = vst.msk [vmem:[#allocation2 + $0xb8] sm:$0xff] %vm495_vm0, %v1577_v18 }
 0x50b   : > { %v1721_v60 = vpop.xlane.xlu0 %1720  ;;  %v1869_v37 = vpop.permute.xlu1 %1868 }
 0x50c   : > { %v1722_v0 = vrot.slane %v1721_v60, 4  ;;  %v1880_v10 = vadd.f32 %v1869_v37, %v1854_v45 }
 0x50d   : > { %v1741_v42 = vpop.xlane.xlu2 %1740 }
 0x50e   : > { %v1723_v38 = vadd.f32 %v1722_v0, %v1721_v60  ;;  %v1742_v25 = vrot.slane %v1741_v42, 4 }
 0x510   : > { %v1724_v50 = vrot.slane %v1723_v38, 2  ;;  %v1743_v26 = vadd.f32 %v1742_v25, %v1741_v42 }
 0x512   : > { %v1744_v7 = vrot.slane %v1743_v26, 2  ;;  %v1725_v56 = vadd.f32 %v1724_v50, %v1723_v38 }
 0x513   : > { %v1873_v13 = vpop.permute.xlu1 %1872 }
 0x514   : > { %v1726_v24 = vrot.slane %v1725_v56, 1  ;;  %v1745_v22 = vadd.f32 %v1744_v7, %v1743_v26 }
 0x515   : > { %v1837_v36 = vpop.permute.xlu2 %1836 }
 0x516   : > { %v1727_v55 = vadd.f32 %v1726_v24, %v1725_v56  ;;  %v1746_v11 = vrot.slane %v1745_v22, 1  ;;  %v1846_v27 = vadd.f32 %v1837_v36, %v1820_v59 }
 0x518   : > { %2370 = vpush %v1727_v55  ;;  %v1747_v14 = vadd.f32 %v1746_v11, %v1745_v22  ;;  %v1856_v6 = vadd.f32 %v1852_v40, %v1846_v27 }
 0x51a   : > { %2372 = vpush %v1747_v14  ;;  %v1882_v34 = vadd.f32 %v1873_v13, %v1856_v6 }
 0x51b   : > { %v1875_v18 = vpop.permute.xlu1 %1874 }
 0x51d   : > { %v1895_v4 = vpop.permute.xlu2 %1894 }
 0x51e   : > { %v1813_v57 = vpop.permute.xlu0 %1812  ;;  %v1906_v12 = vadd.f32 %v1895_v4, %v1880_v10 }
 0x51f   : > { %v1821_v20 = vadd.f32 %v1813_v57, %v1791_v9 }
 0x520   : > { %v3623_v17 = vadd.f32 %v1911_v19, %v1906_v12 }
 0x521   : > { %v1847_v41 = vadd.f32 %v1839_v46, %v1821_v20 }
 0x522   : > { %v1932_v28 = vmul.f32 %v3623_v17, %v3623_v17  ;;  %v1916_v42 = vsel %vm495_vm0, %v3623_v17, 0.0 }
 0x523   : > { %v1857_v39 = vadd.f32 %v1853_v3, %v1847_v41 }
 0x524   : > { %v1936_v56 = vsel %vm495_vm0, %v1932_v28, 0.0 }
 0x525   : > { %v1899_v32 = vpop.permute.xlu2 %1898  ;;  %v1883_v63 = vadd.f32 %v1875_v18, %v1857_v39 }
 0x526   : > { %v1871_v61 = vpop.permute.xlu0 %1870  ;;  %v1908_v52 = vadd.f32 %v1899_v32, %v1882_v34 }
 0x527   : > { %v1881_v53 = vadd.f32 %v1871_v61, %v1855_v21 }
 0x528   : > { %v3629_v60 = vadd.f32 %v1911_v19, %v1908_v52 }
 0x52a   : > { %v1934_v7 = vmul.f32 %v3629_v60, %v3629_v60  ;;  %v1919_v62 = vsel %vm495_vm0, %v3629_v60, 0.0 }
 0x52c   : > { %v1939_v36 = vsel %vm495_vm0, %v1934_v7, 0.0 }
 0x52e   : > { %v1897_v44 = vpop.permute.xlu0 %1896 }
 0x52f   : > { %v1907_v51 = vadd.f32 %v1897_v44, %v1881_v53 }
 0x531   : > { %v3625_v49 = vadd.f32 %v1911_v19, %v1907_v51 }
 0x533   : > { %v1917_v0 = vsel %vm495_vm0, %v3625_v49, 0.0  ;;  %v1933_v2 = vmul.f32 %v3625_v49, %v3625_v49 }
 0x534   : > { %v1918_v50 = vadd.f32 %v1917_v0, %v1916_v42 }
 0x535   : > { %v1937_v38 = vsel %vm495_vm0, %v1933_v2, 0.0 }
 0x536   : > { %v1901_v25 = vpop.permute.xlu0 %1900  ;;  %v1938_v24 = vadd.f32 %v1937_v38, %v1936_v56  ;;  %v1920_v55 = vadd.f32 %v1919_v62, %v1918_v50 }
 0x537   : > { %v1909_v26 = vadd.f32 %v1901_v25, %v1883_v63 }
 0x538   : > { %v1940_v5 = vadd.f32 %v1939_v36, %v1938_v24 }
 0x539   : > { %v3641_v22 = vadd.f32 %v1911_v19, %v1909_v26 }
 0x53b   : > { %v1921_v11 = vsel %vm495_vm0, %v3641_v22, 0.0  ;;  %v1935_v46 = vmul.f32 %v3641_v22, %v3641_v22 }
 0x53c   : > { %v1922_v14 = vadd.f32 %v1921_v11, %v1920_v55 }
 0x53d   : > { %v1941_v23 = vsel %vm495_vm0, %v1935_v46, 0.0 }
 0x53e   : > { %1923 = vadd.xlane.f32.xlu1 %v1922_v14  ;;  %v1942_v54 = vadd.f32 %v1941_v23, %v1940_v5 }
 0x540   : > { %1943 = vadd.xlane.f32.xlu2 %v1942_v54 }
 0x549   : > { %s2371_s8 = spop %2370 }
 0x54a   : > { %s1749_s9 = smul.f32 0.002232143, %s2371_s8  ;;  %s2328_s8 = sld [smem:[#allocation9 + $0x7]] }
 0x54b   : > { %s2373_s10 = spop %2372 }
 0x54c   : > { %s1751_s11 = smul.f32 %s1749_s9, %s1749_s9 }
 0x54d   : > { %s1750_s12 = smul.f32 0.002232143, %s2373_s10 }
 0x54f   : > { %s1752_s14 = ssub.f32 %s1750_s12, %s1751_s11 }
 0x551   : > { %s1754_s15 = sadd.f32 1e-05, %s1752_s14 }
 0x553   : > { %v1755_v47 = vstv %s1754_s15 }
 0x554   : > { %2477 = vrsqrt.f32 %v1755_v47  ;;  %vm1762_vm5 = vweird.f32 %v1755_v47 }
 0x55a   : > { %v2478_v57 = vpop.eup %2477 }
 0x55b   : > { %v1757_v30 = vmul.f32 %v2478_v57, %v1755_v47  ;;  %vm1763_vm4 = vweird.f32 %v2478_v57 }
 0x55c   : > { %vm1764_vm6 = vmor %vm1762_vm5, %vm1763_vm4 }
 0x55d   : > { %v1758_v31 = vmul.f32 %v2478_v57, %v1757_v30 }
 0x55f   : > { %v1759_v43 = vmul.f32 0.5, %v1758_v31 }
 0x561   : > { %v1760_v8 = vsub.f32 1.5, %v1759_v43 }
 0x563   : > { %v1761_v58 = vmul.f32 %v2478_v57, %v1760_v8 }
 0x565   : > { %v1765_v37 = vsel %vm1764_vm6, %v2478_v57, %v1761_v58 }
 0x566   : > { %2374 = vpush %v1765_v37 }
 0x597   : > { %s2375_s13 = spop %2374 }
 0x598   : > { %s1767_s17 = smul.f32 %s2375_s13, %s2319_s16 }
 0x59a   : > { %s1769_s22 = smul.f32 %s1767_s17, %s1749_s9  ;;  %v1771_v4 = vstv %s1767_s17  ;;  %s2329_s9 = sld [smem:[#allocation11 + $0x7]] }
 0x59b   : > { %v1772_v48 = vmul.f32 %v1771_v4, %v3543_v29  ;;  %v1773_v59 = vmul.f32 %v1771_v4, %v3546_v33  ;;  %v1774_v45 = vmul.f32 %v1771_v4, %v3548_v1  ;;  %v1775_v27 = vmul.f32 %v1771_v4, %v3563_v35 }
 0x59c   : > { %s1770_s18 = ssub.f32 %s2320_s29, %s1769_s22 }
 0x59e   : > { %v1776_v40 = vstv %s1770_s18 }
 0x59f   : > { %v1777_v9 = vadd.f32 %v1776_v40, %v1772_v48  ;;  %v1778_v61 = vadd.f32 %v1776_v40, %v1773_v59  ;;  %v1779_v15 = vadd.f32 %v1776_v40, %v1774_v45  ;;  %v1780_v16 = vadd.f32 %v1776_v40, %v1775_v27 }
 0x5a1   : > { %1782 = vst.msk [vmem:[#allocation2 + $0xc0] sm:$0xff] %vm495_vm0, %v1777_v9 }
 0x5a2   : > { %1783 = vst.msk [vmem:[#allocation2 + $0xc8] sm:$0xff] %vm495_vm0, %v1778_v61 }
 0x5a3   : > { %1784 = vst.msk [vmem:[#allocation2 + $0xd0] sm:$0xff] %vm495_vm0, %v1779_v15 }
 0x5a4   : > { %1785 = vst.msk [vmem:[#allocation2 + $0xd8] sm:$0xff] %vm495_vm0, %v1780_v16 }
 0x5b1   : > { %v1924_v29 = vpop.xlane.xlu1 %1923 }
 0x5b2   : > { %v1925_v10 = vrot.slane %v1924_v29, 4 }
 0x5b3   : > { %v1944_v33 = vpop.xlane.xlu2 %1943 }
 0x5b4   : > { %v1926_v6 = vadd.f32 %v1925_v10, %v1924_v29  ;;  %v1945_v1 = vrot.slane %v1944_v33, 4 }
 0x5b6   : > { %v1927_v20 = vrot.slane %v1926_v6, 2  ;;  %v1946_v35 = vadd.f32 %v1945_v1, %v1944_v33 }
 0x5b8   : > { %v1928_v13 = vadd.f32 %v1927_v20, %v1926_v6  ;;  %v1947_v12 = vrot.slane %v1946_v35, 2 }
 0x5ba   : > { %v1948_v21 = vadd.f32 %v1947_v12, %v1946_v35  ;;  %v1929_v19 = vrot.slane %v1928_v13, 1 }
 0x5bc   : > { %v1930_v32 = vadd.f32 %v1929_v19, %v1928_v13  ;;  %v1949_v34 = vrot.slane %v1948_v21, 1 }
 0x5be   : > { %2376 = vpush %v1930_v32  ;;  %v1950_v41 = vadd.f32 %v1949_v34, %v1948_v21 }
 0x5c0   : > { %2378 = vpush %v1950_v41 }
 0x5ef   : > { %s2377_s20 = spop %2376 }
 0x5f0   : > { %s1952_s21 = smul.f32 0.002232143, %s2377_s20 }
 0x5f1   : > { %s2379_s25 = spop %2378 }
 0x5f2   : > { %s1954_s26 = smul.f32 %s1952_s21, %s1952_s21 }
 0x5f3   : > { %s1953_s23 = smul.f32 0.002232143, %s2379_s25 }
 0x5f5   : > { %s1955_s30 = ssub.f32 %s1953_s23, %s1954_s26 }
 0x5f7   : > { %s1957_s27 = sadd.f32 1e-05, %s1955_s30 }
 0x5f9   : > { %v1958_v3 = vstv %s1957_s27 }
 0x5fa   : > { %2479 = vrsqrt.f32 %v1958_v3  ;;  %vm1965_vm8 = vweird.f32 %v1958_v3 }
 0x600   : > { %v2480_v53 = vpop.eup %2479 }
 0x601   : > { %v1960_v44 = vmul.f32 %v2480_v53, %v1958_v3  ;;  %vm1966_vm7 = vweird.f32 %v2480_v53 }
 0x602   : > { %vm1967_vm9 = vmor %vm1965_vm8, %vm1966_vm7 }
 0x603   : > { %v1961_v52 = vmul.f32 %v2480_v53, %v1960_v44 }
 0x605   : > { %v1962_v51 = vmul.f32 0.5, %v1961_v52 }
 0x607   : > { %v1963_v39 = vsub.f32 1.5, %v1962_v51 }
 0x609   : > { %v1964_v18 = vmul.f32 %v2480_v53, %v1963_v39 }
 0x60b   : > { %v1968_v28 = vsel %vm1967_vm9, %v2480_v53, %v1964_v18 }
 0x60c   : > { %2380 = vpush %v1968_v28 }
 0x63d   : > { %s2381_s10 = spop %2380 }
 0x63e   : > { %s1970_s11 = smul.f32 %s2381_s10, %s2328_s8 }
 0x640   : > { %s1972_s12 = smul.f32 %s1970_s11, %s1952_s21  ;;  %v1974_v0 = vstv %s1970_s11 }
 0x641   : > { %v1975_v2 = vmul.f32 %v1974_v0, %v3623_v17  ;;  %v1976_v42 = vmul.f32 %v1974_v0, %v3625_v49  ;;  %v1977_v63 = vmul.f32 %v1974_v0, %v3629_v60  ;;  %v1978_v38 = vmul.f32 %v1974_v0, %v3641_v22 }
 0x642   : > { %s1973_s14 = ssub.f32 %s2329_s9, %s1972_s12 }
 0x644   : > { %v1979_v25 = vstv %s1973_s14 }
 0x645   : > { %v1980_v50 = vadd.f32 %v1979_v25, %v1975_v2  ;;  %v1981_v26 = vadd.f32 %v1979_v25, %v1976_v42  ;;  %v1982_v7 = vadd.f32 %v1979_v25, %v1977_v63  ;;  %v1983_v56 = vadd.f32 %v1979_v25, %v1978_v38 }
 0x647   : > { %1985 = vst.msk [vmem:[#allocation2 + $0xe0] sm:$0xff] %vm495_vm0, %v1980_v50 }
 0x648   : > { %1986 = vst.msk [vmem:[#allocation2 + $0xe8] sm:$0xff] %vm495_vm0, %v1981_v26 }
 0x649   : > { %1987 = vst.msk [vmem:[#allocation2 + $0xf0] sm:$0xff] %vm495_vm0, %v1982_v7 }
 0x64a   : > { %1988 = vst.msk [vmem:[#allocation2 + $0xf8] sm:$0xff] %vm495_vm0, %v1983_v56 }
 0x64b PF: > { %s1989_s15 = sld [smem:[#allocation14 + %s2705_s28]]  ;;  %s2330_s16 = sshll.u32 %s2705_s28, 3  ;;  %v1994_v17 = vld [vmem:[#allocation2] sm:$0xff]  ;;  %v1995_v49 = vld [vmem:[#allocation2 + $0x8] sm:$0xff]  ;;  %v1996_v23 = vld [vmem:[#allocation2 + $0x10] sm:$0xff]  ;;  %vm2119_vm0 = vcmask 113664  }
 0x64c   : > { %s1993_s29 = sld [smem:[#allocation12 + %s2330_s16]]  ;;  %s2007_s13 = sadd.s32 1, %s2330_s16  ;;  %v2010_v60 = vld [vmem:[#allocation2 + $0x20] sm:$0xff]  ;;  %v2011_v24 = vld [vmem:[#allocation2 + $0x28] sm:$0xff]  ;;  %v2012_v4 = vld [vmem:[#allocation2 + $0x30] sm:$0xff] }
 0x64d   : > { %s2008_s17 = sld [smem:[#allocation12 + %s2007_s13]]  ;;  %s2023_s22 = sadd.s32 2, %s2330_s16  ;;  %v2026_v55 = vld [vmem:[#allocation2 + $0x40] sm:$0xff]  ;;  %v2027_v5 = vld [vmem:[#allocation2 + $0x48] sm:$0xff]  ;;  %v2028_v20 = vld [vmem:[#allocation2 + $0x50] sm:$0xff] }
 0x64e   : > { %s2024_s18 = sld [smem:[#allocation12 + %s2023_s22]]  ;;  %s2039_s20 = sadd.s32 3, %s2330_s16  ;;  %v2042_v36 = vld [vmem:[#allocation2 + $0x60] sm:$0xff]  ;;  %v2043_v30 = vld [vmem:[#allocation2 + $0x68] sm:$0xff]  ;;  %v2044_v34 = vld [vmem:[#allocation2 + $0x70] sm:$0xff] }
 0x64f   : > { %s2040_s21 = sld [smem:[#allocation12 + %s2039_s20]]  ;;  %s2055_s25 = sadd.s32 4, %s2330_s16  ;;  %v2058_v58 = vld [vmem:[#allocation2 + $0x80] sm:$0xff]  ;;  %v2059_v27 = vld [vmem:[#allocation2 + $0x88] sm:$0xff]  ;;  %v1997_v44 = vld [vmem:[#allocation2 + $0x18] sm:$0xff] }
 0x650   : > { %s2056_s26 = sld [smem:[#allocation12 + %s2055_s25]]  ;;  %s2071_s23 = sadd.s32 5, %s2330_s16  ;;  %v2074_v61 = vld [vmem:[#allocation2 + $0xa0] sm:$0xff]  ;;  %v2075_v6 = vld [vmem:[#allocation2 + $0xa8] sm:$0xff]  ;;  %v2060_v0 = vld [vmem:[#allocation2 + $0x90] sm:$0xff] }
 0x651   : > { %s3669_s30 = sld [smem:[#allocation12 + %s2071_s23]]  ;;  %s2087_s27 = sadd.s32 6, %s2330_s16  ;;  %v3671_v22 = vstv %s1989_s15  ;;  %v2090_v13 = vld [vmem:[#allocation2 + $0xc0] sm:$0xff]  ;;  %v2091_v3 = vld [vmem:[#allocation2 + $0xc8] sm:$0xff]  ;;  %v2013_v2 = vld [vmem:[#allocation2 + $0x38] sm:$0xff] }
 0x652   : > { %v3673_v62 = vstv %s1993_s29  ;;  %s2088_s28 = sld [smem:[#allocation12 + %s2087_s27]]  ;;  %s2103_s8 = sadd.s32 7, %s2330_s16  ;;  %v2106_v12 = vld [vmem:[#allocation2 + $0xe0] sm:$0xff]  ;;  %v2107_v18 = vld [vmem:[#allocation2 + $0xe8] sm:$0xff]  ;;  %v2029_v50 = vld [vmem:[#allocation2 + $0x58] sm:$0xff] }
 0x653   : > { %v1999_v11 = vmul.f32 %v3673_v62, %v1994_v17  ;;  %v2014_v46 = vstv %s2008_s17  ;;  %s3676_s9 = sld [smem:[#allocation12 + %s2103_s8]]  ;;  %v2000_v14 = vmul.f32 %v3673_v62, %v1995_v49  ;;  %v2001_v40 = vmul.f32 %v3673_v62, %v1996_v23  ;;  %v2076_v17 = vld [vmem:[#allocation2 + $0xb0] sm:$0xff] }
 0x654   : > { %v2015_v54 = vmul.f32 %v2014_v46, %v2010_v60  ;;  %v2030_v47 = vstv %s2024_s18  ;;  %v2016_v57 = vmul.f32 %v2014_v46, %v2011_v24  ;;  %v2017_v1 = vmul.f32 %v2014_v46, %v2012_v4  ;;  %v2092_v23 = vld [vmem:[#allocation2 + $0xd0] sm:$0xff] }
 0x655   : > { %v2003_v31 = vadd.f32 %v1999_v11, %v3671_v22  ;;  %v2031_v43 = vmul.f32 %v2030_v47, %v2026_v55  ;;  %v3680_v8 = vstv %s2040_s21  ;;  %v2004_v37 = vadd.f32 %v2000_v14, %v3671_v22 }
 0x656   : > { %v2047_v48 = vmul.f32 %v3680_v8, %v2042_v36  ;;  %v3684_v59 = vstv %s2056_s26  ;;  %v2032_v45 = vmul.f32 %v2030_v47, %v2027_v5  ;;  %v2048_v29 = vmul.f32 %v3680_v8, %v2043_v30  ;;  %v2045_v36 = vld [vmem:[#allocation2 + $0x78] sm:$0xff] }
 0x657   : > { %v2019_v9 = vadd.f32 %v2015_v54, %v2003_v31  ;;  %v3688_v15 = vstv %s3669_s30  ;;  %v2020_v16 = vadd.f32 %v2016_v57, %v2004_v37  ;;  %v2063_v10 = vmul.f32 %v3684_v59, %v2058_v58  ;;  %v2108_v37 = vld [vmem:[#allocation2 + $0xf0] sm:$0xff] }
 0x658   : > { %v3692_v33 = vstv %s2088_s28  ;;  %v2064_v32 = vmul.f32 %v3684_v59, %v2059_v27  ;;  %v2079_v41 = vmul.f32 %v3688_v15, %v2074_v61  ;;  %v2005_v53 = vadd.f32 %v2001_v40, %v3671_v22  ;;  %v2077_v27 = vld [vmem:[#allocation2 + $0xb8] sm:$0xff] }
 0x659   : > { %v2035_v35 = vadd.f32 %v2031_v43, %v2019_v9  ;;  %v3695_v21 = vstv %s3676_s9  ;;  %v2036_v19 = vadd.f32 %v2032_v45, %v2020_v16  ;;  %v2080_v39 = vmul.f32 %v3688_v15, %v2075_v6  ;;  %v2061_v43 = vld [vmem:[#allocation2 + $0x98] sm:$0xff] }
 0x65a   : > { %v2033_v28 = vmul.f32 %v2030_v47, %v2028_v20  ;;  %v2095_v42 = vmul.f32 %v3692_v33, %v2090_v13  ;;  %v2111_v63 = vmul.f32 %v3695_v21, %v2106_v12  ;;  %v2021_v38 = vadd.f32 %v2017_v1, %v2005_v53  ;;  %v2109_v1 = vld [vmem:[#allocation2 + $0xf8] sm:$0xff] }
 0x65b   : > { %v2051_v52 = vadd.f32 %v2047_v48, %v2035_v35  ;;  %v2052_v51 = vadd.f32 %v2048_v29, %v2036_v19  ;;  %v2049_v25 = vmul.f32 %v3680_v8, %v2044_v34  ;;  %v2096_v56 = vmul.f32 %v3692_v33, %v2091_v3  ;;  %v2093_v29 = vld [vmem:[#allocation2 + $0xd8] sm:$0xff] }
 0x65c   : > { %v2002_v49 = vmul.f32 %v3673_v62, %v1997_v44  ;;  %v2112_v60 = vmul.f32 %v3695_v21, %v2107_v18  ;;  %v2037_v24 = vadd.f32 %v2033_v28, %v2021_v38  ;;  %v2065_v55 = vmul.f32 %v3684_v59, %v2060_v0 }
 0x65d   : > { %v2067_v26 = vadd.f32 %v2063_v10, %v2051_v52  ;;  %v2068_v7 = vadd.f32 %v2064_v32, %v2052_v51  ;;  %v2018_v11 = vmul.f32 %v2014_v46, %v2013_v2  ;;  %v2034_v57 = vmul.f32 %v2030_v47, %v2029_v50 }
 0x65e   : > { %v2006_v54 = vadd.f32 %v2002_v49, %v3671_v22  ;;  %v2053_v30 = vadd.f32 %v2049_v25, %v2037_v24  ;;  %v2081_v31 = vmul.f32 %v3688_v15, %v2076_v17  ;;  %v2050_v48 = vmul.f32 %v3680_v8, %v2045_v36 }
 0x65f   : > { %v2083_v14 = vadd.f32 %v2079_v41, %v2067_v26  ;;  %v2084_v5 = vadd.f32 %v2080_v39, %v2068_v7  ;;  %v2097_v45 = vmul.f32 %v3692_v33, %v2092_v23  ;;  %v2066_v9 = vmul.f32 %v3684_v59, %v2061_v43 }
 0x660   : > { %v2022_v4 = vadd.f32 %v2018_v11, %v2006_v54  ;;  %v2069_v46 = vadd.f32 %v2065_v55, %v2053_v30  ;;  %v2113_v16 = vmul.f32 %v3695_v21, %v2108_v37  ;;  %v2082_v8 = vmul.f32 %v3688_v15, %v2077_v27 }
 0x661   : > { %v2099_v58 = vadd.f32 %v2095_v42, %v2083_v14  ;;  %v2100_v62 = vadd.f32 %v2096_v56, %v2084_v5  ;;  %v2098_v35 = vmul.f32 %v3692_v33, %v2093_v29  ;;  %v2114_v59 = vmul.f32 %v3695_v21, %v2109_v1 }
 0x662   : > { %v2038_v47 = vadd.f32 %v2034_v57, %v2022_v4  ;;  %v2085_v61 = vadd.f32 %v2081_v31, %v2069_v46 }
 0x663   : > { %v2115_v40 = vadd.f32 %v2111_v63, %v2099_v58  ;;  %v2116_v22 = vadd.f32 %v2112_v60, %v2100_v62 }
 0x664   : > { %v2054_v10 = vadd.f32 %v2050_v48, %v2038_v47  ;;  %v2101_v6 = vadd.f32 %v2097_v45, %v2085_v61 }
 0x665   : > { %2120 = vst.msk [vmem:[%s2782_s19] sm:$0xff] %vm2119_vm0, %v2115_v40 }
 0x666   : > { %2121 = vst.msk [vmem:[%s2782_s19 + $0x8] sm:$0xff] %vm2119_vm0, %v2116_v22  ;;  %v2070_v20 = vadd.f32 %v2066_v9, %v2054_v10  ;;  %v2117_v13 = vadd.f32 %v2113_v16, %v2101_v6 }
 0x668   : > { %v2086_v12 = vadd.f32 %v2082_v8, %v2070_v20  ;;  %2122 = vst.msk [vmem:[%s2782_s19 + $0x10] sm:$0xff] %vm2119_vm0, %v2117_v13 }
 0x66a   : > { %v2102_v19 = vadd.f32 %v2098_v35, %v2086_v12 }
 0x66c   : > { %v2118_v32 = vadd.f32 %v2114_v59, %v2102_v19 }
 0x66e   : > { %2123 = vst.msk [vmem:[%s2782_s19 + $0x18] sm:$0xff] %vm2119_vm0, %v2118_v32 }
 0x66f PF: > { %s22_s24 = sadd.s32 1, %s2643_s24  }
 0x670   : > { %p19_p8 = scmp.ge.s32.totalorder %s22_s24, 6  }
 0x672   :  { %21 = sbr.rel (!%p19_p8) target bundleno = 5 (0x5), region = 124 }
 0x677   :  { %2145 = vsyncpa [#allocation4], 1 }
 0x678   :  { %2147 = vsyncpa [#allocation4 + $0x1], 1 }
 0x679   :  { %2148 = vsyncpa [#allocation5], 1 }
 0x67a   :  { %2150 = vsyncpa [#allocation5 + $0x1], 1 }
 0x67b   :  { %2151 = vsyncpa [#allocation6], 1 }
 0x67c   :  { %2153 = vsyncpa [#allocation6 + $0x1], 1 }
 0x67d   :  { %2154 = vsyncpa [#allocation10], 1 }
 0x67e   :  { %2155 = vsyncpa [#allocation13], 1 }

</bundles_post_ra>
